<compile_context>
chip_gen: v5e
topology: v5e:2x2
jax: 0.10.0
libtpu: 0.0.40
codegen_flags: <defaults>
</compile_context>

<pallas_src>
import functools

import jax
import jax.numpy as jnp
from jax.experimental import pallas as pl
from jax.experimental.pallas import tpu as pltpu


def _conv2d_cd_kernel(x_ref, w_ref, o_ref, slab_ref, *, H, W, C_in, C_out_p):
    """One batch element per grid step.

    x_ref:    (1, H+2, W+2, C_in)  bf16, zero-padded input
    w_ref:    (9*C_in, C_out_p)    bf16, folded + flattened weights (resident)
    o_ref:    (1, H, W, C_out_p)   f32, lane-dense output
    slab_ref: (H*W, 9*C_in)        bf16 VMEM scratch (im2col slab)
    """
    # im2col: 9 shifted-window copies into the slab (pure VPU/store work).
    for kh in range(3):
        for kw in range(3):
            tap = kh * 3 + kw
            patch = x_ref[0, kh:kh + H, kw:kw + W, :].reshape(H * W, C_in)
            slab_ref[:, tap * C_in:(tap + 1) * C_in] = patch
    # Single MXU matmul: (H*W, 9*C_in) @ (9*C_in, C_out_p), f32 accumulation.
    acc = jnp.dot(slab_ref[...], w_ref[...], preferred_element_type=jnp.float32)
    o_ref[0] = acc.reshape(H, W, C_out_p)


def conv2d_cd(x_nchw, weight_oihw, theta=0.7):
    """Forward pass of Conv2d_cd.

    x_nchw:      (N, C_in, H, W) float32
    weight_oihw: (C_out, C_in, 3, 3) float32
    Returns:     (N, C_out, H, W) float32
    """
    N, C_in, H, W = x_nchw.shape
    C_out, C_in_w, KH, KW = weight_oihw.shape
    assert (KH, KW) == (3, 3) and C_in_w == C_in
    theta = float(theta)

    # ---- weight prep (wrapper-side; kernel consumes a ready matrix) --------
    # Fold the CD 1x1 conv into the 3x3 center tap (mathematically exact).
    w = weight_oihw.astype(jnp.float32)
    w_folded = w.at[:, :, 1, 1].add(-theta * jnp.sum(w, axis=(2, 3)))
    # OIHW -> HWIO -> (9*C_in, C_out); pad C_out to a multiple of 128 so the
    # matmul N-dim and the output stores are lane-dense.
    C_out_p = max(128, ((C_out + 127) // 128) * 128)
    w_mat = jnp.transpose(w_folded, (2, 3, 1, 0)).reshape(9 * C_in, C_out)
    w_mat = jnp.pad(w_mat, ((0, 0), (0, C_out_p - C_out))).astype(jnp.bfloat16)

    # ---- activation prep: NCHW -> NHWC, zero pad (stride=1, pad=1), bf16 ---
    x_nhwc = jnp.transpose(x_nchw, (0, 2, 3, 1)).astype(jnp.bfloat16)
    x_pad = jnp.pad(x_nhwc, ((0, 0), (1, 1), (1, 1), (0, 0)))

    kernel = functools.partial(_conv2d_cd_kernel, H=H, W=W, C_in=C_in,
                               C_out_p=C_out_p)

    # VMEM budget: double-buffered x & out blocks + resident weight + slab.
    x_blk = (H + 2) * (W + 2) * C_in * 2
    out_blk = H * W * C_out_p * 4
    w_blk = 9 * C_in * C_out_p * 2
    slab_blk = H * W * 9 * C_in * 2
    vmem_limit = int(min(64 * 1024 * 1024,
                         max(16 * 1024 * 1024,
                             2 * (x_blk + out_blk) + w_blk + slab_blk
                             + (2 << 20))))

    # TODO(synk): for large H (whole-image blocks no longer fitting VMEM),
    # add a row-tiling grid axis with a 2-row halo via element-offset maps.
    out_nhwc = pl.pallas_call(
        kernel,
        out_shape=jax.ShapeDtypeStruct((N, H, W, C_out_p), jnp.float32),
        grid_spec=pltpu.PrefetchScalarGridSpec(
            num_scalar_prefetch=0,
            grid=(N,),
            in_specs=[
                pl.BlockSpec((1, H + 2, W + 2, C_in), lambda n: (n, 0, 0, 0)),
                # Constant index_map -> weight DMA'd once, stays resident.
                pl.BlockSpec((9 * C_in, C_out_p), lambda n: (0, 0)),
            ],
            out_specs=pl.BlockSpec((1, H, W, C_out_p), lambda n: (n, 0, 0, 0)),
            scratch_shapes=[pltpu.VMEM((H * W, 9 * C_in), jnp.bfloat16)],
        ),
        compiler_params=pltpu.CompilerParams(
            dimension_semantics=("parallel",),
            vmem_limit_bytes=vmem_limit),
    )(x_pad, w_mat)

    # Drop channel padding, back to NCHW.
    return jnp.transpose(out_nhwc[..., :C_out], (0, 3, 1, 2))


def _reference_f32(x_nchw, weight_oihw, theta=0.7):
    # Pure-JAX f32 reference mirroring the PyTorch forward exactly.
    dn = jax.lax.conv_dimension_numbers(x_nchw.shape, weight_oihw.shape,
                                        ("NCHW", "OIHW", "NCHW"))
    out_normal = jax.lax.conv_general_dilated(
        x_nchw, weight_oihw, window_strides=(1, 1), padding=((1, 1), (1, 1)),
        dimension_numbers=dn)
    kernel_diff = weight_oihw.sum(axis=(2, 3))[:, :, None, None]
    out_diff = jax.lax.conv_general_dilated(
        x_nchw, kernel_diff, window_strides=(1, 1), padding=((0, 0), (0, 0)),
        dimension_numbers=dn)
    return out_normal - theta * out_diff


def _reference_bf16_folded(x_nchw, weight_oihw, theta=0.7):
    # Same math as the kernel (folded weights, bf16 inputs, f32 accumulation):
    # used for a tight numerical check.
    w = weight_oihw.astype(jnp.float32)
    w_folded = w.at[:, :, 1, 1].add(-theta * jnp.sum(w, axis=(2, 3)))
    dn = jax.lax.conv_dimension_numbers(x_nchw.shape, w_folded.shape,
                                        ("NCHW", "OIHW", "NCHW"))
    return jax.lax.conv_general_dilated(
        x_nchw.astype(jnp.bfloat16), w_folded.astype(jnp.bfloat16),
        window_strides=(1, 1), padding=((1, 1), (1, 1)),
        dimension_numbers=dn, preferred_element_type=jnp.float32)


if __name__ == "__main__":
    key = jax.random.PRNGKey(0)
    k_x, k_w = jax.random.split(key)

    N, C_in, C_out, H, W = 2, 4, 8, 16, 16
    theta = 0.7

    x = jax.random.normal(k_x, (N, C_in, H, W), dtype=jnp.float32)
    weight = 0.1 * jax.random.normal(k_w, (C_out, C_in, 3, 3), dtype=jnp.float32)

    out = jax.block_until_ready(conv2d_cd(x, weight, theta=theta))
    assert out.shape == (N, C_out, H, W)

    # Tight check vs. an exactly-equivalent bf16/folded-weight reference.
    ref_tight = jax.block_until_ready(_reference_bf16_folded(x, weight, theta))
    assert jnp.allclose(out, ref_tight, atol=2e-3, rtol=2e-3), \
        "mismatch vs bf16 folded reference"

    # Looser check vs. the true f32 module reference (bf16 inputs bound the
    # achievable accuracy).
    ref_f32 = jax.block_until_ready(_reference_f32(x, weight, theta))
    assert jnp.allclose(out, ref_f32, atol=5e-2, rtol=5e-2), \
        "mismatch vs f32 reference"

    print("KERNEL_OK")
</pallas_src>

<mosaic_0001>
module attributes {stable_mosaic.version = 11 : i64} {
  func.func @_conv2d_cd_kernel(%arg0: i32, %arg1: memref<1x18x18x4xbf16, #tpu.memory_space<vmem>>, %arg2: memref<36x128xbf16, #tpu.memory_space<vmem>>, %arg3: memref<1x16x16x128xf32, #tpu.memory_space<vmem>>, %arg4: memref<256x36xbf16, #tpu.memory_space<vmem>>) attributes {dimension_semantics = [#tpu.dimension_semantics<parallel>], iteration_bounds = array<i64: 2>, scalar_prefetch = 0 : i64, scratch_operands = 1 : i64, tpu.core_type = #tpu.core_type<tc>, window_params = [{transform_indices = @transform_0, window_bounds = array<i64: 1, 18, 18, 4>}, {pipeline_mode = #tpu.pipeline_mode<synchronous>, transform_indices = @transform_1, window_bounds = array<i64: 36, 128>}, {transform_indices = @transform_2, window_bounds = array<i64: 1, 16, 16, 128>}]} {
    %c0 = arith.constant 0 : index
    %c0_0 = arith.constant 0 : index
    %c0_1 = arith.constant 0 : index
    %c0_2 = arith.constant 0 : index
    %0 = vector.load %arg1[%c0, %c0_0, %c0_1, %c0_2] : memref<1x18x18x4xbf16, #tpu.memory_space<vmem>>, vector<1x16x16x4xbf16>
    %1 = vector.shape_cast %0 : vector<1x16x16x4xbf16> to vector<16x16x4xbf16>
    %2 = vector.shape_cast %1 : vector<16x16x4xbf16> to vector<256x4xbf16>
    %c0_3 = arith.constant 0 : index
    %c0_4 = arith.constant 0 : index
    %3 = vector.load %arg4[%c0_3, %c0_4] : memref<256x36xbf16, #tpu.memory_space<vmem>>, vector<256x4xbf16>
    tpu.vector_store %arg4[%c0_3, %c0_4], %2 {strides = array<i32>} : memref<256x36xbf16, #tpu.memory_space<vmem>>, vector<256x4xbf16>,
    %c0_5 = arith.constant 0 : index
    %c0_6 = arith.constant 0 : index
    %c1 = arith.constant 1 : index
    %c0_7 = arith.constant 0 : index
    %4 = vector.load %arg1[%c0_5, %c0_6, %c1, %c0_7] : memref<1x18x18x4xbf16, #tpu.memory_space<vmem>>, vector<1x16x16x4xbf16>
    %5 = vector.shape_cast %4 : vector<1x16x16x4xbf16> to vector<16x16x4xbf16>
    %6 = vector.shape_cast %5 : vector<16x16x4xbf16> to vector<256x4xbf16>
    %c0_8 = arith.constant 0 : index
    %c4 = arith.constant 4 : index
    %7 = vector.load %arg4[%c0_8, %c4] : memref<256x36xbf16, #tpu.memory_space<vmem>>, vector<256x4xbf16>
    tpu.vector_store %arg4[%c0_8, %c4], %6 {strides = array<i32>} : memref<256x36xbf16, #tpu.memory_space<vmem>>, vector<256x4xbf16>,
    %c0_9 = arith.constant 0 : index
    %c0_10 = arith.constant 0 : index
    %c2 = arith.constant 2 : index
    %c0_11 = arith.constant 0 : index
    %8 = vector.load %arg1[%c0_9, %c0_10, %c2, %c0_11] : memref<1x18x18x4xbf16, #tpu.memory_space<vmem>>, vector<1x16x16x4xbf16>
    %9 = vector.shape_cast %8 : vector<1x16x16x4xbf16> to vector<16x16x4xbf16>
    %10 = vector.shape_cast %9 : vector<16x16x4xbf16> to vector<256x4xbf16>
    %c0_12 = arith.constant 0 : index
    %c8 = arith.constant 8 : index
    %11 = vector.load %arg4[%c0_12, %c8] : memref<256x36xbf16, #tpu.memory_space<vmem>>, vector<256x4xbf16>
    tpu.vector_store %arg4[%c0_12, %c8], %10 {strides = array<i32>} : memref<256x36xbf16, #tpu.memory_space<vmem>>, vector<256x4xbf16>,
    %c0_13 = arith.constant 0 : index
    %c1_14 = arith.constant 1 : index
    %c0_15 = arith.constant 0 : index
    %c0_16 = arith.constant 0 : index
    %12 = vector.load %arg1[%c0_13, %c1_14, %c0_15, %c0_16] : memref<1x18x18x4xbf16, #tpu.memory_space<vmem>>, vector<1x16x16x4xbf16>
    %13 = vector.shape_cast %12 : vector<1x16x16x4xbf16> to vector<16x16x4xbf16>
    %14 = vector.shape_cast %13 : vector<16x16x4xbf16> to vector<256x4xbf16>
    %c0_17 = arith.constant 0 : index
    %c12 = arith.constant 12 : index
    %15 = vector.load %arg4[%c0_17, %c12] : memref<256x36xbf16, #tpu.memory_space<vmem>>, vector<256x4xbf16>
    tpu.vector_store %arg4[%c0_17, %c12], %14 {strides = array<i32>} : memref<256x36xbf16, #tpu.memory_space<vmem>>, vector<256x4xbf16>,
    %c0_18 = arith.constant 0 : index
    %c1_19 = arith.constant 1 : index
    %c1_20 = arith.constant 1 : index
    %c0_21 = arith.constant 0 : index
    %16 = vector.load %arg1[%c0_18, %c1_19, %c1_20, %c0_21] : memref<1x18x18x4xbf16, #tpu.memory_space<vmem>>, vector<1x16x16x4xbf16>
    %17 = vector.shape_cast %16 : vector<1x16x16x4xbf16> to vector<16x16x4xbf16>
    %18 = vector.shape_cast %17 : vector<16x16x4xbf16> to vector<256x4xbf16>
    %c0_22 = arith.constant 0 : index
    %c16 = arith.constant 16 : index
    %19 = vector.load %arg4[%c0_22, %c16] : memref<256x36xbf16, #tpu.memory_space<vmem>>, vector<256x4xbf16>
    tpu.vector_store %arg4[%c0_22, %c16], %18 {strides = array<i32>} : memref<256x36xbf16, #tpu.memory_space<vmem>>, vector<256x4xbf16>,
    %c0_23 = arith.constant 0 : index
    %c1_24 = arith.constant 1 : index
    %c2_25 = arith.constant 2 : index
    %c0_26 = arith.constant 0 : index
    %20 = vector.load %arg1[%c0_23, %c1_24, %c2_25, %c0_26] : memref<1x18x18x4xbf16, #tpu.memory_space<vmem>>, vector<1x16x16x4xbf16>
    %21 = vector.shape_cast %20 : vector<1x16x16x4xbf16> to vector<16x16x4xbf16>
    %22 = vector.shape_cast %21 : vector<16x16x4xbf16> to vector<256x4xbf16>
    %c0_27 = arith.constant 0 : index
    %c20 = arith.constant 20 : index
    %23 = vector.load %arg4[%c0_27, %c20] : memref<256x36xbf16, #tpu.memory_space<vmem>>, vector<256x4xbf16>
    tpu.vector_store %arg4[%c0_27, %c20], %22 {strides = array<i32>} : memref<256x36xbf16, #tpu.memory_space<vmem>>, vector<256x4xbf16>,
    %c0_28 = arith.constant 0 : index
    %c2_29 = arith.constant 2 : index
    %c0_30 = arith.constant 0 : index
    %c0_31 = arith.constant 0 : index
    %24 = vector.load %arg1[%c0_28, %c2_29, %c0_30, %c0_31] : memref<1x18x18x4xbf16, #tpu.memory_space<vmem>>, vector<1x16x16x4xbf16>
    %25 = vector.shape_cast %24 : vector<1x16x16x4xbf16> to vector<16x16x4xbf16>
    %26 = vector.shape_cast %25 : vector<16x16x4xbf16> to vector<256x4xbf16>
    %c0_32 = arith.constant 0 : index
    %c24 = arith.constant 24 : index
    %27 = vector.load %arg4[%c0_32, %c24] : memref<256x36xbf16, #tpu.memory_space<vmem>>, vector<256x4xbf16>
    tpu.vector_store %arg4[%c0_32, %c24], %26 {strides = array<i32>} : memref<256x36xbf16, #tpu.memory_space<vmem>>, vector<256x4xbf16>,
    %c0_33 = arith.constant 0 : index
    %c2_34 = arith.constant 2 : index
    %c1_35 = arith.constant 1 : index
    %c0_36 = arith.constant 0 : index
    %28 = vector.load %arg1[%c0_33, %c2_34, %c1_35, %c0_36] : memref<1x18x18x4xbf16, #tpu.memory_space<vmem>>, vector<1x16x16x4xbf16>
    %29 = vector.shape_cast %28 : vector<1x16x16x4xbf16> to vector<16x16x4xbf16>
    %30 = vector.shape_cast %29 : vector<16x16x4xbf16> to vector<256x4xbf16>
    %c0_37 = arith.constant 0 : index
    %c28 = arith.constant 28 : index
    %31 = vector.load %arg4[%c0_37, %c28] : memref<256x36xbf16, #tpu.memory_space<vmem>>, vector<256x4xbf16>
    tpu.vector_store %arg4[%c0_37, %c28], %30 {strides = array<i32>} : memref<256x36xbf16, #tpu.memory_space<vmem>>, vector<256x4xbf16>,
    %c0_38 = arith.constant 0 : index
    %c2_39 = arith.constant 2 : index
    %c2_40 = arith.constant 2 : index
    %c0_41 = arith.constant 0 : index
    %32 = vector.load %arg1[%c0_38, %c2_39, %c2_40, %c0_41] : memref<1x18x18x4xbf16, #tpu.memory_space<vmem>>, vector<1x16x16x4xbf16>
    %33 = vector.shape_cast %32 : vector<1x16x16x4xbf16> to vector<16x16x4xbf16>
    %34 = vector.shape_cast %33 : vector<16x16x4xbf16> to vector<256x4xbf16>
    %c0_42 = arith.constant 0 : index
    %c32 = arith.constant 32 : index
    %35 = vector.load %arg4[%c0_42, %c32] : memref<256x36xbf16, #tpu.memory_space<vmem>>, vector<256x4xbf16>
    tpu.vector_store %arg4[%c0_42, %c32], %34 {strides = array<i32>} : memref<256x36xbf16, #tpu.memory_space<vmem>>, vector<256x4xbf16>,
    %c0_43 = arith.constant 0 : index
    %c0_44 = arith.constant 0 : index
    %36 = vector.load %arg4[%c0_43, %c0_44] : memref<256x36xbf16, #tpu.memory_space<vmem>>, vector<256x36xbf16>
    %c0_45 = arith.constant 0 : index
    %c0_46 = arith.constant 0 : index
    %37 = vector.load %arg2[%c0_45, %c0_46] : memref<36x128xbf16, #tpu.memory_space<vmem>>, vector<36x128xbf16>
    %cst = arith.constant dense<0.000000e+00> : vector<256x128xf32>
    %38 = tpu.matmul %36, %37, %cst {dimension_numbers = #tpu.dot_dimension_numbers<[1], [0], [0], [1], [0, 0, 1, 1], [], []>} : vector<256x36xbf16>, vector<36x128xbf16>, vector<256x128xf32> -> vector<256x128xf32>
    %39 = vector.shape_cast %38 : vector<256x128xf32> to vector<16x16x128xf32>
    %c0_47 = arith.constant 0 : index
    %c0_48 = arith.constant 0 : index
    %c0_49 = arith.constant 0 : index
    %c0_50 = arith.constant 0 : index
    %40 = vector.load %arg3[%c0_47, %c0_48, %c0_49, %c0_50] : memref<1x16x16x128xf32, #tpu.memory_space<vmem>>, vector<1x16x16x128xf32>
    %41 = vector.shape_cast %40 : vector<1x16x16x128xf32> to vector<16x16x128xf32>
    %42 = vector.shape_cast %39 : vector<16x16x128xf32> to vector<1x16x16x128xf32>
    tpu.vector_store %arg3[%c0_47, %c0_48, %c0_49, %c0_50], %42 {strides = array<i32>} : memref<1x16x16x128xf32, #tpu.memory_space<vmem>>, vector<1x16x16x128xf32>,
    return
  }
  func.func @transform_0(%arg0: i32) -> (i32, i32, i32, i32) {
    %c0_i32 = arith.constant 0 : i32
    %c0_i32_0 = arith.constant 0 : i32
    %c0_i32_1 = arith.constant 0 : i32
    %c0_i32_2 = arith.constant 0 : i32
    return %arg0, %c0_i32, %c0_i32_0, %c0_i32_1 : i32, i32, i32, i32
  }
  func.func @transform_1(%arg0: i32) -> (i32, i32) {
    %c0_i32 = arith.constant 0 : i32
    %c0_i32_0 = arith.constant 0 : i32
    %c0_i32_1 = arith.constant 0 : i32
    return %c0_i32, %c0_i32_0 : i32, i32
  }
  func.func @transform_2(%arg0: i32) -> (i32, i32, i32, i32) {
    %c0_i32 = arith.constant 0 : i32
    %c0_i32_0 = arith.constant 0 : i32
    %c0_i32_1 = arith.constant 0 : i32
    %c0_i32_2 = arith.constant 0 : i32
    return %arg0, %c0_i32, %c0_i32_0, %c0_i32_1 : i32, i32, i32, i32
  }
}

</mosaic_0001>

<bundles_post_ra>
// kernel: tpu_custom_call.1
= control target key start
LH: loop header
LB: loop body
LE: loop exit
PB: predicated region body
PF: predicated region fallthrough
CT: control target
= control target key end

     0   :  { %7 = vsyncpa [#allocation4], 0  ;;  %s5786_s0 = inlined_call_operand.vmem [shape: bf16[2,18,18,4], index: 0, kind: input, shape index: {}]   ;;  %s5787_s1 = inlined_call_operand.vmem [shape: bf16[36,128], index: 1, kind: input, shape index: {}]   ;;  %s5788_s2 = inlined_call_operand.hbm [shape: f32[2,16,16,128], index: 2, kind: output, shape index: {}]  }
   0x1   :  { %9 = vsyncpa [#allocation4 + $0x1], 0  ;;  %s4248_s9 = smov 0   ;;  %s4250_s10 = smov 0  }
   0x2   :  { %s4252_s11 = smov 0   ;;  %s4254_s12 = smov 0  }
   0x3 LB: > { %s4269_s13 = sadd.s32 4294967295, %s4222_s12   ;;  %s3680_s14 = sadd.s32 4294967294, %s4222_s12   ;;  %s4222_s12 = sphi %s4254_s12, %s5798_s12   ;;  %s4218_s11 = sphi %s4252_s11, %s5797_s11   ;;  %s4214_s10 = sphi %s4250_s10, %s5796_s10   ;;  %s4210_s9 = sphi %s4248_s9, %s5795_s9  }
   0x4   : > { %s4273_s15 = sadd.s32 1, %s4222_s12   ;;  %s69_s16 = sadd.s32 1, %s4218_s11 }
   0x5   : > { %s66_s17 = ssub.s32 %s4222_s12, %s4273_s15  ;;  %p79_p0 = scmp.ne.s32.totalorder %s4218_s11, %s4214_s10 }
   0x6   : > { %p67_p1 = scmp.eq.s32.totalorder %s66_s17, 0  ;;  %p80_p2 = scmp.eq.s32.totalorder %s4269_s13, 1 }
   0x7   : > { %p85_p3 = scmp.ne.s32.totalorder %s4214_s10, %s4210_s9  ;;  %p86_p4 = scmp.eq.s32.totalorder %s3680_s14, 1 }
   0x8   : > { %s4284_s18 = scalar_select %p67_p1, %s4218_s11, %s69_s16  }
   0x9   : > { %p4286_p5 = por %p80_p2, %p79_p0  ;;  %p4290_p6 = por %p86_p4, %p85_p3 }
   0xa   : > { %p3683_p7 = scmp.ge.s32.totalorder %s4222_s12, 1  ;;  %p115_p8 = scmp.lt.s32.totalorder %s4222_s12, 3 }
   0xc   : > { %p116_p9 = pnand %p3683_p7, %p115_p8 }
   0xd   : > { %p137_p10 = scmp.lt.s32.totalorder (!%p116_p9), %s4269_s13, 1  ;;  %s4224_s26 = smov (!%p116_p9), 4  }
   0xe   : > { %119 = sbr.rel (%p116_p9) target bundleno = 976 (0x3d0), region = 28  ;;  %s4225_s27 = smov (!%p116_p9), 8  }
   0xf   : > { %s4226_s28 = smov (!%p116_p9), 12   ;;  %s4227_s29 = smov (!%p116_p9), 16  }
  0x10   : > { %s4228_s30 = smov (!%p116_p9), 20   ;;  %s4229_s3 = smov (!%p116_p9), 24  }
  0x11   : > { %s4230_s4 = smov (!%p116_p9), 28   ;;  %s4231_s5 = smov (!%p116_p9), 32  }
  0x12   : > { %s4101_s24 = sshll.u32 (!%p116_p9), %s4269_s13, 8  ;;  %s4180_s7 = scalar_lea.hbm (!%p116_p9), %s5788_s2, 512 }
  0x13   : > { %s138_s21 = scalar_select %p137_p10, %s4269_s13, 1  ;;  %vm256_vm0 = vsmask.f32 3328  ;;  %vm257_vm1 = vsmask.f32 7440  ;;  %vm868_vm3 = vcmask 1042432  }
  0x14   : > { %vm4312_vm2 = vmor %vm256_vm0, %vm257_vm1  ;;  %vm869_vm4 = vcmask 1046532   ;;  %vm175_vm5 = vcmask 27648   ;;  %vm739_vm7 = vcmask 60448   ;;  %vm1079_vm8 = vcmask 93248  }
  0x15   : > { %s4111_s22 = smul.u32 216, %s138_s21  ;;  %vm4487_vm6 = vmor %vm868_vm3, %vm869_vm4  ;;  %vm1273_vm9 = vcmask 126048   ;;  %vm1834_vm10 = vcmask 158848   ;;  %vm2171_vm11 = vcmask 191648   ;;  %vm2365_vm12 = vcmask 224448   ;;  %s134_s21 = sand.u32 1, %s4214_s10  }
  0x16   : > { %vm3477_vm13 = vcmask 1041408   ;;  %vm2926_vm14 = vcmask 257248   ;;  %vm3263_vm15 = vcmask 290048   ;;  %vm3428_vm0 = vcmask 293888  }
  0x17   : > { %s4301_s25 = scalar_lea.vmem %s5786_s0, %s4111_s22  ;;  %s3684_s22 = sshll.u32 %s134_s21, 8 }
  0x18   : > { %v211_v0 = vld [vmem:[%s4301_s25 + $0xc] sm:$0xf]  ;;  %v212_v1 = vld [vmem:[%s4301_s25 + $0x10] sm:$0xf]  ;;  %v208_v2 = vld [vmem:[%s4301_s25] sm:$0xf] }
  0x19   : > { %v284_v3 = vshrl.u32 %v211_v0, 16  ;;  %v287_v4 = vshll.u32 %v211_v0, 16  ;;  %v293_v5 = vshll.u32 %v212_v1, 16  ;;  %v297_v6 = vshrl.u32 %v212_v1, 16  ;;  %v209_v7 = vld [vmem:[%s4301_s25 + $0x4] sm:$0xf] }
  0x1a   : > { %v260_v8 = vshrl.u32 %v208_v2, 16  ;;  %v263_v9 = vshll.u32 %v208_v2, 16  ;;  %v269_v10 = vshll.u32 %v209_v7, 16  ;;  %v273_v11 = vshrl.u32 %v209_v7, 16  ;;  %v213_v12 = vld [vmem:[%s4301_s25 + $0x14] sm:$0x1] }
  0x1b   : > { %v286_v13 = vrot.slane %v284_v3, 4  ;;  %v289_v14 = vrot.slane %v287_v4, 5  ;;  %v295_v15 = vrot.slane %v293_v5, 5  ;;  %v299_v16 = vrot.slane %v297_v6, 4  ;;  %v210_v17 = vld [vmem:[%s4301_s25 + $0x8] sm:$0x1] }
  0x1c   : > { %v262_v18 = vrot.slane %v260_v8, 4  ;;  %v265_v19 = vrot.slane %v263_v9, 5  ;;  %v275_v20 = vrot.slane %v273_v11, 4  ;;  %v218_v21 = vld [vmem:[%s4301_s25 + $0x28] sm:$0xf]  ;;  %v303_v24 = vshll.u32 %v213_v12, 16 }
  0x1d   : > { %v290_v22 = vor.u32 %v289_v14, %v286_v13  ;;  %v300_v23 = vor.u32 %v299_v16, %v295_v15  ;;  %v271_v27 = vrot.slane %v269_v10, 5  ;;  %v341_v28 = vshll.u32 %v218_v21, 16  ;;  %v217_v30 = vld [vmem:[%s4301_s25 + $0x24] sm:$0xf]  ;;  %v214_v35 = vld [vmem:[%s4301_s25 + $0x18] sm:$0xf] }
  0x1e   : > { %v266_v26 = vor.u32 %v265_v19, %v262_v18  ;;  %v345_v29 = vshrl.u32 %v218_v21, 16  ;;  %v279_v32 = vshll.u32 %v210_v17, 16  ;;  %v305_v38 = vrot.slane %v303_v24, 5  ;;  %v215_v40 = vld [vmem:[%s4301_s25 + $0x1c] sm:$0xf]  ;;  %s5694_s23 = scalar_lea.vmem [#allocation3], %s3684_s22 }
  0x1f   : > { %v291_v31 = vrot.slane %v290_v22, 4  ;;  %v276_v34 = vor.u32 %v275_v20, %v271_v27  ;;  %v301_v37 = vrot.slane %v300_v23, 4  ;;  %v332_v39 = vshrl.u32 %v217_v30, 16  ;;  %v219_v42 = vld [vmem:[%s4301_s25 + $0x2c] sm:$0x1] }
  0x20   : > { %v267_v33 = vrot.slane %v266_v26, 4  ;;  %v4325_v43 = vrot.slane %v341_v28, 5  ;;  %v347_v44 = vrot.slane %v345_v29, 4  ;;  %v335_v45 = vshll.u32 %v217_v30, 16  ;;  %v223_v50 = vld [vmem:[%s4301_s25 + $0x3c] sm:$0xf] }
  0x21   : > { %v296_v36 = vsel %vm4312_vm2, %v291_v31, %v295_v15  ;;  %v281_v46 = vrot.slane %v279_v32, 5  ;;  %v334_v47 = vrot.slane %v332_v39, 4  ;;  %v308_v48 = vshrl.u32 %v214_v35, 16  ;;  %v221_v58 = vld [vmem:[%s4301_s25 + $0x34] sm:$0xf] }
  0x22   : > { %647 = vrot.lane.b32.xlu1 %v296_v36, %s4224_s26  ;;  %v272_v41 = vsel %vm4312_vm2, %v267_v33, %v271_v27  ;;  %v311_v49 = vshll.u32 %v214_v35, 16  ;;  %v277_v51 = vrot.slane %v276_v34, 4  ;;  %v337_v52 = vrot.slane %v335_v45, 5  ;;  %v216_v6 = vld [vmem:[%s4301_s25 + $0x20] sm:$0x1] }
  0x23   : > { %643 = vrot.lane.b32.xlu0 %v272_v41, %s4224_s26  ;;  %v317_v53 = vshll.u32 %v215_v40, 16  ;;  %v321_v54 = vshrl.u32 %v215_v40, 16  ;;  %v351_v55 = vshll.u32 %v219_v42, 16  ;;  %v310_v56 = vrot.slane %v308_v48, 4  ;;  %v224_v15 = vld [vmem:[%s4301_s25 + $0x40] sm:$0xf] }
  0x24   : > { %v313_v57 = vrot.slane %v311_v49, 5  ;;  %v348_v59 = vor.u32 %v347_v44, %v4325_v43  ;;  %v380_v61 = vshrl.u32 %v223_v50, 16  ;;  %v383_v62 = vshll.u32 %v223_v50, 16  ;;  %v222_v16 = vld [vmem:[%s4301_s25 + $0x38] sm:$0x1] }
  0x25   : > { %v323_v60 = vrot.slane %v321_v54, 4  ;;  %v306_v63 = vsel %vm4312_vm2, %v301_v37, %v305_v38  ;;  %v338_v0 = vor.u32 %v337_v52, %v334_v47  ;;  %v319_v2 = vrot.slane %v317_v53, 5  ;;  %v227_v20 = vld [vmem:[%s4301_s25 + $0x4c] sm:$0xf]  ;;  %v220_v21 = vld [vmem:[%s4301_s25 + $0x30] sm:$0xf] }
  0x26   : > { %v314_v1 = vor.u32 %v313_v57, %v310_v56  ;;  %v282_v3 = vsel %vm4312_vm2, %v277_v51, %v281_v46  ;;  %v365_v4 = vshll.u32 %v221_v58, 16  ;;  %v369_v5 = vshrl.u32 %v221_v58, 16  ;;  %v226_v24 = vld [vmem:[%s4301_s25 + $0x48] sm:$0xf]  ;;  %v232_v47 = vld [vmem:[%s4301_s25 + $0x60] sm:$0xf] }
  0x27   : > { %v353_v7 = vrot.slane %v351_v55, 5  ;;  %v349_v9 = vrot.slane %v348_v59, 4  ;;  %v382_v10 = vrot.slane %v380_v61, 4  ;;  %v385_v11 = vrot.slane %v383_v62, 5  ;;  %v228_v49 = vld [vmem:[%s4301_s25 + $0x50] sm:$0x1] }
  0x28   : > { %v315_v8 = vrot.slane %v314_v1, 4  ;;  %v324_v12 = vor.u32 %v323_v60, %v319_v2  ;;  %v339_v13 = vrot.slane %v338_v0, 4  ;;  %v327_v17 = vshll.u32 %v216_v6, 16  ;;  %v230_v53 = vld [vmem:[%s4301_s25 + $0x58] sm:$0xf] }
  0x29   : > { %v4343_v18 = vrot.slane %v365_v4, 5  ;;  %v371_v19 = vrot.slane %v369_v5, 4  ;;  %v354_v26 = vsel %vm4312_vm2, %v349_v9, %v353_v7  ;;  %v386_v27 = vor.u32 %v385_v11, %v382_v10  ;;  %v225_v58 = vld [vmem:[%s4301_s25 + $0x44] sm:$0x1]  ;;  %v236_v11 = vld [vmem:[%s4301_s25 + $0x70] sm:$0xf] }
  0x2a   : > { %649 = vrot.lane.b32.xlu1 %v306_v63, %s4224_s26  ;;  %v320_v14 = vsel %vm4312_vm2, %v315_v8, %v319_v2  ;;  %v325_v22 = vrot.slane %v324_v12, 4  ;;  %v329_v23 = vrot.slane %v327_v17, 5  ;;  %v389_v28 = vshll.u32 %v224_v15, 16  ;;  %v229_v2 = vld [vmem:[%s4301_s25 + $0x54] sm:$0xf] }
  0x2b   : > { %645 = vrot.lane.b32.xlu0 %v282_v3, %s4224_s26  ;;  %651 = vrot.lane.b32.xlu2 %v320_v14, %s4224_s26  ;;  %v375_v29 = vshll.u32 %v222_v16, 16  ;;  %v344_v30 = vsel %vm4312_vm2, %v339_v13, %v4325_v43  ;;  %v413_v31 = vshll.u32 %v227_v20, 16  ;;  %v417_v32 = vshrl.u32 %v227_v20, 16  ;;  %v233_v6 = vld [vmem:[%s4301_s25 + $0x64] sm:$0xf] }
  0x2c   : > { %v356_v33 = vshrl.u32 %v220_v21, 16  ;;  %v372_v34 = vor.u32 %v371_v19, %v4343_v18  ;;  %v404_v35 = vshrl.u32 %v226_v24, 16  ;;  %v407_v36 = vshll.u32 %v226_v24, 16  ;;  %v235_v20 = vld [vmem:[%s4301_s25 + $0x6c] sm:$0xf] }
  0x2d   : > { %v359_v37 = vshll.u32 %v220_v21, 16  ;;  %v393_v38 = vshrl.u32 %v224_v15, 16  ;;  %v330_v39 = vsel %vm4312_vm2, %v325_v22, %v329_v23  ;;  %v391_v41 = vrot.slane %v389_v28, 5  ;;  %v231_v15 = vld [vmem:[%s4301_s25 + $0x5c] sm:$0x1] }
  0x2e   : > { %v358_v40 = vrot.slane %v356_v33, 4  ;;  %v387_v43 = vrot.slane %v386_v27, 4  ;;  %v377_v44 = vrot.slane %v375_v29, 5  ;;  %v4358_v45 = vrot.slane %v413_v31, 5 }
  0x2f   : > { %v361_v42 = vrot.slane %v359_v37, 5  ;;  %v419_v46 = vrot.slane %v417_v32, 4  ;;  %v373_v48 = vrot.slane %v372_v34, 4  ;;  %v406_v50 = vrot.slane %v404_v35, 4 }
  0x30   : > { %v409_v51 = vrot.slane %v407_v36, 5  ;;  %v395_v54 = vrot.slane %v393_v38, 4  ;;  %v452_v56 = vshrl.u32 %v232_v47, 16  ;;  %v455_v57 = vshll.u32 %v232_v47, 16  ;;  %v239_v47 = vld [vmem:[%s4301_s25 + $0x7c] sm:$0xf] }
  0x31   : > { %v362_v52 = vor.u32 %v361_v42, %v358_v40  ;;  %v392_v59 = vsel %vm4312_vm2, %v387_v43, %v391_v41  ;;  %v420_v60 = vor.u32 %v419_v46, %v4358_v45  ;;  %v423_v61 = vshll.u32 %v228_v49, 16  ;;  %v241_v42 = vld [vmem:[%s4301_s25 + $0x84] sm:$0xf]  ;;  %v234_v49 = vld [vmem:[%s4301_s25 + $0x68] sm:$0x1] }
  0x32   : > { %657 = vrot.lane.b32.xlu1 %v354_v26, %s4224_s26  ;;  %v378_v62 = vsel %vm4312_vm2, %v373_v48, %v377_v44  ;;  %v410_v63 = vor.u32 %v409_v51, %v406_v50  ;;  %v437_v0 = vshll.u32 %v230_v53, 16  ;;  %v441_v1 = vshrl.u32 %v230_v53, 16 }
  0x33   : > { %655 = vrot.lane.b32.xlu0 %v344_v30, %s4224_s26  ;;  %653 = vrot.lane.b32.xlu2 %v330_v39, %s4224_s26  ;;  %v363_v55 = vrot.slane %v362_v52, 4  ;;  %v396_v4 = vor.u32 %v395_v54, %v391_v41  ;;  %v399_v5 = vshll.u32 %v225_v58, 16  ;;  %v454_v7 = vrot.slane %v452_v56, 4  ;;  %v237_v41 = vld [vmem:[%s4301_s25 + $0x74] sm:$0x1] }
  0x34   : > { %v457_v8 = vrot.slane %v455_v57, 5  ;;  %v421_v9 = vrot.slane %v420_v60, 4  ;;  %v425_v10 = vrot.slane %v423_v61, 5  ;;  %v428_v12 = vshrl.u32 %v229_v2, 16  ;;  %v238_v54 = vld [vmem:[%s4301_s25 + $0x78] sm:$0xf] }
  0x35   : > { %v368_v3 = vsel %vm4312_vm2, %v363_v55, %v4343_v18  ;;  %v431_v13 = vshll.u32 %v229_v2, 16  ;;  %v411_v14 = vrot.slane %v410_v63, 4  ;;  %v4380_v16 = vrot.slane %v437_v0, 5 }
  0x36   : > { %v443_v17 = vrot.slane %v441_v1, 4  ;;  %v397_v18 = vrot.slane %v396_v4, 4  ;;  %v401_v19 = vrot.slane %v399_v5, 5  ;;  %v430_v21 = vrot.slane %v428_v12, 4  ;;  %v242_v4 = vld [vmem:[%s4301_s25 + $0x88] sm:$0xf] }
  0x37   : > { %v433_v22 = vrot.slane %v431_v13, 5  ;;  %v458_v23 = vor.u32 %v457_v8, %v454_v7  ;;  %v461_v24 = vshll.u32 %v233_v6, 16  ;;  %v485_v26 = vshll.u32 %v236_v11, 16 }
  0x38   : > { %v489_v27 = vshrl.u32 %v236_v11, 16  ;;  %v426_v28 = vsel %vm4312_vm2, %v421_v9, %v425_v10  ;;  %v447_v29 = vshll.u32 %v231_v15, 16  ;;  %v416_v30 = vsel %vm4312_vm2, %v411_v14, %v4358_v45  ;;  %v245_v9 = vld [vmem:[%s4301_s25 + $0x94] sm:$0xf]  ;;  %v240_v11 = vld [vmem:[%s4301_s25 + $0x80] sm:$0x1] }
  0x39   : > { %v444_v31 = vor.u32 %v443_v17, %v4380_v16  ;;  %v476_v32 = vshrl.u32 %v235_v20, 16  ;;  %v479_v33 = vshll.u32 %v235_v20, 16  ;;  %v465_v34 = vshrl.u32 %v233_v6, 16  ;;  %v244_v14 = vld [vmem:[%s4301_s25 + $0x90] sm:$0xf] }
  0x3a   : > { %663 = vrot.lane.b32.xlu1 %v392_v59, %s4224_s26  ;;  %v402_v35 = vsel %vm4312_vm2, %v397_v18, %v401_v19  ;;  %v434_v36 = vor.u32 %v433_v22, %v430_v21  ;;  %v459_v37 = vrot.slane %v458_v23, 4  ;;  %v463_v38 = vrot.slane %v461_v24, 5 }
  0x3b   : > { %661 = vrot.lane.b32.xlu0 %v378_v62, %s4224_s26  ;;  %659 = vrot.lane.b32.xlu2 %v368_v3, %s4224_s26  ;;  %v4392_v39 = vrot.slane %v485_v26, 5  ;;  %v491_v40 = vrot.slane %v489_v27, 4  ;;  %v445_v43 = vrot.slane %v444_v31, 4  ;;  %v449_v44 = vrot.slane %v447_v29, 5 }
  0x3c   : > { %v478_v45 = vrot.slane %v476_v32, 4  ;;  %v481_v46 = vrot.slane %v479_v33, 5  ;;  %v435_v48 = vrot.slane %v434_v36, 4  ;;  %v467_v50 = vrot.slane %v465_v34, 4 }
  0x3d   : > { %v464_v51 = vsel %vm4312_vm2, %v459_v37, %v463_v38  ;;  %v492_v52 = vor.u32 %v491_v40, %v4392_v39  ;;  %v495_v53 = vshll.u32 %v237_v41, 16  ;;  %v524_v55 = vshrl.u32 %v241_v42, 16  ;;  %v246_v37 = vld [vmem:[%s4301_s25 + $0x98] sm:$0x1]  ;;  %v250_v40 = vld [vmem:[%s4301_s25 + $0xa8] sm:$0xf] }
  0x3e   : > { %v527_v56 = vshll.u32 %v241_v42, 16  ;;  %v509_v57 = vshll.u32 %v239_v47, 16  ;;  %v513_v58 = vshrl.u32 %v239_v47, 16  ;;  %v450_v59 = vsel %vm4312_vm2, %v445_v43, %v449_v44  ;;  %v248_v42 = vld [vmem:[%s4301_s25 + $0xa0] sm:$0xf] }
  0x3f   : > { %v482_v60 = vor.u32 %v481_v46, %v478_v45  ;;  %v471_v61 = vshll.u32 %v234_v49, 16  ;;  %v440_v62 = vsel %vm4312_vm2, %v435_v48, %v4380_v16  ;;  %v468_v63 = vor.u32 %v467_v50, %v463_v38  ;;  %v243_v43 = vld [vmem:[%s4301_s25 + $0x8c] sm:$0x1]  ;;  %v247_v47 = vld [vmem:[%s4301_s25 + $0x9c] sm:$0xf] }
  0x40   : > { %v500_v0 = vshrl.u32 %v238_v54, 16  ;;  %v503_v1 = vshll.u32 %v238_v54, 16  ;;  %v493_v2 = vrot.slane %v492_v52, 4  ;;  %v497_v3 = vrot.slane %v495_v53, 5 }
  0x41   : > { %v526_v5 = vrot.slane %v524_v55, 4  ;;  %v529_v6 = vrot.slane %v527_v56, 5  ;;  %v4412_v7 = vrot.slane %v509_v57, 5  ;;  %v515_v8 = vrot.slane %v513_v58, 4 }
  0x42   : > { %669 = vrot.lane.b32.xlu1 %v426_v28, %s4224_s26  ;;  %v483_v10 = vrot.slane %v482_v60, 4  ;;  %v469_v12 = vrot.slane %v468_v63, 4  ;;  %v473_v13 = vrot.slane %v471_v61, 5  ;;  %v502_v15 = vrot.slane %v500_v0, 4 }
  0x43   : > { %667 = vrot.lane.b32.xlu0 %v416_v30, %s4224_s26  ;;  %665 = vrot.lane.b32.xlu2 %v402_v35, %s4224_s26  ;;  %v505_v16 = vrot.slane %v503_v1, 5  ;;  %v533_v17 = vshll.u32 %v242_v4, 16  ;;  %v557_v18 = vshll.u32 %v245_v9, 16  ;;  %v561_v19 = vshrl.u32 %v245_v9, 16  ;;  %v249_v1 = vld [vmem:[%s4301_s25 + $0xa4] sm:$0x1] }
  0x44   : > { %v498_v20 = vsel %vm4312_vm2, %v493_v2, %v497_v3  ;;  %v530_v21 = vor.u32 %v529_v6, %v526_v5  ;;  %v516_v22 = vor.u32 %v515_v8, %v4412_v7  ;;  %v519_v23 = vshll.u32 %v240_v11, 16  ;;  %v254_v5 = vld [vmem:[%s4301_s25 + $0xb8] sm:$0xf]  ;;  %v253_v8 = vld [vmem:[%s4301_s25 + $0xb4] sm:$0xf] }
  0x45   : > { %v488_v24 = vsel %vm4312_vm2, %v483_v10, %v4392_v39  ;;  %v548_v26 = vshrl.u32 %v244_v14, 16  ;;  %v551_v27 = vshll.u32 %v244_v14, 16  ;;  %v537_v28 = vshrl.u32 %v242_v4, 16 }
  0x46   : > { %v474_v29 = vsel %vm4312_vm2, %v469_v12, %v473_v13  ;;  %v506_v30 = vor.u32 %v505_v16, %v502_v15  ;;  %v4427_v31 = vrot.slane %v557_v18, 5  ;;  %v563_v32 = vrot.slane %v561_v19, 4 }
  0x47   : > { %v531_v33 = vrot.slane %v530_v21, 4  ;;  %v535_v34 = vrot.slane %v533_v17, 5  ;;  %v517_v35 = vrot.slane %v516_v22, 4  ;;  %v521_v36 = vrot.slane %v519_v23, 5 }
  0x48   : > { %v550_v38 = vrot.slane %v548_v26, 4  ;;  %v553_v39 = vrot.slane %v551_v27, 5  ;;  %v507_v41 = vrot.slane %v506_v30, 4  ;;  %v539_v44 = vrot.slane %v537_v28, 4 }
  0x49   : > { %v564_v45 = vor.u32 %v563_v32, %v4427_v31  ;;  %v567_v46 = vshll.u32 %v246_v37, 16  ;;  %v536_v48 = vsel %vm4312_vm2, %v531_v33, %v535_v34  ;;  %v522_v49 = vsel %vm4312_vm2, %v517_v35, %v521_v36  ;;  %v252_v36 = vld [vmem:[%s4301_s25 + $0xb0] sm:$0x1] }
  0x4a   : > { %675 = vrot.lane.b32.xlu1 %v464_v51, %s4224_s26  ;;  %v596_v50 = vshrl.u32 %v250_v40, 16  ;;  %v599_v51 = vshll.u32 %v250_v40, 16  ;;  %v554_v52 = vor.u32 %v553_v39, %v550_v38  ;;  %v581_v53 = vshll.u32 %v248_v42, 16 }
  0x4b   : > { %673 = vrot.lane.b32.xlu0 %v450_v59, %s4224_s26  ;;  %671 = vrot.lane.b32.xlu2 %v440_v62, %s4224_s26  ;;  %v585_v54 = vshrl.u32 %v248_v42, 16  ;;  %v543_v55 = vshll.u32 %v243_v43, 16  ;;  %v512_v56 = vsel %vm4312_vm2, %v507_v41, %v4412_v7  ;;  %v540_v57 = vor.u32 %v539_v44, %v535_v34  ;;  %v251_v62 = vld [vmem:[%s4301_s25 + $0xac] sm:$0xf] }
  0x4c   : > { %v572_v58 = vshrl.u32 %v247_v47, 16  ;;  %v575_v59 = vshll.u32 %v247_v47, 16  ;;  %v565_v60 = vrot.slane %v564_v45, 4  ;;  %v569_v61 = vrot.slane %v567_v46, 5 }
  0x4d   : > { %v598_v63 = vrot.slane %v596_v50, 4  ;;  %v601_v0 = vrot.slane %v599_v51, 5  ;;  %v555_v2 = vrot.slane %v554_v52, 4  ;;  %v583_v3 = vrot.slane %v581_v53, 5  ;;  %v775_v51 = vld [vmem:[%s4301_s25 + $0xc] sm:$0xe] }
  0x4e   : > { %v587_v4 = vrot.slane %v585_v54, 4  ;;  %v541_v6 = vrot.slane %v540_v57, 4  ;;  %v545_v7 = vrot.slane %v543_v55, 5  ;;  %v574_v9 = vrot.slane %v572_v58, 4  ;;  %v776_v53 = vld [vmem:[%s4301_s25 + $0x10] sm:$0xf] }
  0x4f   : > { %v577_v10 = vrot.slane %v575_v59, 5  ;;  %v570_v11 = vsel %vm4312_vm2, %v565_v60, %v569_v61  ;;  %v605_v12 = vshll.u32 %v251_v62, 16  ;;  %v602_v13 = vor.u32 %v601_v0, %v598_v63  ;;  %v774_v54 = vld [vmem:[%s4301_s25 + $0x8] sm:$0x1]  ;;  %v772_v61 = vld [vmem:[%s4301_s25] sm:$0xe] }
  0x50   : > { %v591_v14 = vshll.u32 %v249_v1, 16  ;;  %v629_v15 = vshll.u32 %v254_v5, 16  ;;  %v633_v16 = vshrl.u32 %v254_v5, 16  ;;  %v560_v17 = vsel %vm4312_vm2, %v555_v2, %v4427_v31  ;;  %v255_v31 = vld [vmem:[%s4301_s25 + $0xbc] sm:$0x1] }
  0x51   : > { %v588_v18 = vor.u32 %v587_v4, %v583_v3  ;;  %v620_v19 = vshrl.u32 %v253_v8, 16  ;;  %v609_v21 = vshrl.u32 %v251_v62, 16  ;;  %v546_v22 = vsel %vm4312_vm2, %v541_v6, %v545_v7  ;;  %v779_v63 = vld [vmem:[%s4301_s25 + $0x1c] sm:$0xf]  ;;  %v147_v0 = vld [vmem:[%s4301_s25 + $0x18] sm:$0xf] }
  0x52   : > { %681 = vrot.lane.b32.xlu1 %v498_v20, %s4224_s26  ;;  %v623_v20 = vshll.u32 %v253_v8, 16  ;;  %v578_v23 = vor.u32 %v577_v10, %v574_v9  ;;  %v607_v26 = vrot.slane %v605_v12, 5  ;;  %v631_v27 = vrot.slane %v629_v15, 5  ;;  %180 = vst.msk [vmem:[#allocation2 + $0x10] sm:$0xf] %vm175_vm5, %v147_v0 }
  0x53   : > { %679 = vrot.lane.b32.xlu0 %v488_v24, %s4224_s26  ;;  %677 = vrot.lane.b32.xlu2 %v474_v29, %s4224_s26  ;;  %v603_v24 = vrot.slane %v602_v13, 4  ;;  %v635_v28 = vrot.slane %v633_v16, 4  ;;  %v589_v29 = vrot.slane %v588_v18, 4  ;;  %v593_v30 = vrot.slane %v591_v14, 5  ;;  %v145_v2 = vld [vmem:[%s4301_s25 + $0xc] sm:$0xf] }
  0x54   : > { %v622_v32 = vrot.slane %v620_v19, 4  ;;  %v625_v33 = vrot.slane %v623_v20, 5  ;;  %v579_v34 = vrot.slane %v578_v23, 4  ;;  %v611_v35 = vrot.slane %v609_v21, 4  ;;  %178 = vst.msk [vmem:[#allocation2 + $0x8] sm:$0xf] %vm175_vm5, %v145_v2 }
  0x55   : > { %v608_v37 = vsel %vm4312_vm2, %v603_v24, %v607_v26  ;;  %v636_v38 = vor.u32 %v635_v28, %v631_v27  ;;  %v639_v39 = vshll.u32 %v255_v31, 16  ;;  %v594_v40 = vsel %vm4312_vm2, %v589_v29, %v593_v30  ;;  %v780_v6 = vld [vmem:[%s4301_s25 + $0x20] sm:$0x1]  ;;  %v778_v9 = vld [vmem:[%s4301_s25 + $0x18] sm:$0xe] }
  0x56   : > { %v626_v41 = vor.u32 %v625_v33, %v622_v32  ;;  %v584_v42 = vsel %vm4312_vm2, %v579_v34, %v583_v3  ;;  %v612_v43 = vor.u32 %v611_v35, %v607_v26  ;;  %v615_v44 = vshll.u32 %v252_v36, 16  ;;  %v143_v3 = vld [vmem:[%s4301_s25] sm:$0xf]  ;;  %v777_v12 = vld [vmem:[%s4301_s25 + $0x14] sm:$0x1] }
  0x57   : > { %v637_v45 = vrot.slane %v636_v38, 4  ;;  %v641_v46 = vrot.slane %v639_v39, 5  ;;  %v3687_v58 = vrot.slane %v775_v51, 9  ;;  %v880_v59 = vrot.slane %v776_v53, 5  ;;  %176 = vst.msk [vmem:[#allocation2] sm:$0xf] %vm175_vm5, %v143_v3 }
  0x58   : > { %v627_v47 = vrot.slane %v626_v41, 4  ;;  %v617_v50 = vrot.slane %v615_v44, 5  ;;  %v876_v60 = vrot.slane %v774_v54, 5  ;;  %v3686_v4 = vrot.slane %v772_v61, 9  ;;  %v782_v15 = vld [vmem:[%s4301_s25 + $0x28] sm:$0xf] }
  0x59   : > { %v642_v52 = vsel %vm4312_vm2, %v637_v45, %v641_v46  ;;  %v881_v5 = vsel %vm4487_vm6, %v3687_v58, %v880_v59  ;;  %v887_v7 = vrot.slane %v779_v63, 5  ;;  %v3688_v14 = vrot.slane %v778_v9, 9  ;;  %v148_v16 = vld [vmem:[%s4301_s25 + $0x1c] sm:$0xf]  ;;  %v144_v18 = vld [vmem:[%s4301_s25 + $0x4] sm:$0xf] }
  0x5a   : > { %687 = vrot.lane.b32.xlu1 %v536_v48, %s4224_s26  ;;  %v773_v48 = vld [vmem:[%s4301_s25 + $0x4] sm:$0xf]  ;;  %181 = vst.msk [vmem:[#allocation2 + $0x14] sm:$0xf] %vm175_vm5, %v148_v16  ;;  %v882_v19 = vrot.slane %v880_v59, 4  ;;  %v883_v20 = vrot.slane %v777_v12, 5 }
  0x5b   : > { %685 = vrot.lane.b32.xlu0 %v522_v49, %s4224_s26  ;;  %683 = vrot.lane.b32.xlu2 %v512_v56, %s4224_s26  ;;  %v613_v49 = vrot.slane %v612_v43, 4  ;;  %v873_v55 = vrot.slane %v773_v48, 5  ;;  %v632_v56 = vsel %vm4312_vm2, %v627_v47, %v631_v27  ;;  %v889_v13 = vrot.slane %v887_v7, 4  ;;  %177 = vst.msk [vmem:[#allocation2 + $0x4] sm:$0xf] %vm175_vm5, %v144_v18 }
  0x5c   : > { %v785_v23 = vld [vmem:[%s4301_s25 + $0x34] sm:$0xf]  ;;  %v894_v24 = vrot.slane %v782_v15, 5  ;;  %v888_v26 = vsel %vm4487_vm6, %v3688_v14, %v887_v7  ;;  %v783_v27 = vld [vmem:[%s4301_s25 + $0x2c] sm:$0x1]  ;;  %v884_v28 = vsel %vm4487_vm6, %v882_v19, %v883_v20 }
  0x5d   : > { %v618_v57 = vsel %vm4312_vm2, %v613_v49, %v617_v50  ;;  %v875_v62 = vrot.slane %v873_v55, 4  ;;  %v874_v10 = vsel %vm4487_vm6, %v3686_v4, %v873_v55  ;;  %v901_v30 = vrot.slane %v785_v23, 5  ;;  %v781_v31 = vld [vmem:[%s4301_s25 + $0x24] sm:$0xe]  ;;  %v788_v34 = vld [vmem:[%s4301_s25 + $0x40] sm:$0xf] }
  0x5e   : > { %v896_v32 = vrot.slane %v894_v24, 4  ;;  %v897_v33 = vrot.slane %v783_v27, 5  ;;  %v151_v35 = vld [vmem:[%s4301_s25 + $0x30] sm:$0xf]  ;;  %v150_v36 = vld [vmem:[%s4301_s25 + $0x28] sm:$0xf] }
  0x5f   : > { %v877_v8 = vsel %vm4487_vm6, %v875_v62, %v876_v60  ;;  %184 = vst.msk [vmem:[#allocation2 + $0x20] sm:$0xf] %vm175_vm5, %v151_v35  ;;  %v3689_v38 = vrot.slane %v781_v31, 9  ;;  %v908_v41 = vrot.slane %v788_v34, 5  ;;  %v789_v43 = vld [vmem:[%s4301_s25 + $0x44] sm:$0x1] }
  0x60   : > { %183 = vst.msk [vmem:[#allocation2 + $0x1c] sm:$0xf] %vm175_vm5, %v150_v36  ;;  %v787_v44 = vld [vmem:[%s4301_s25 + $0x3c] sm:$0xe]  ;;  %v786_v46 = vld [vmem:[%s4301_s25 + $0x38] sm:$0x1] }
  0x61   : > { %v895_v45 = vsel %vm4487_vm6, %v3689_v38, %v894_v24  ;;  %v910_v47 = vrot.slane %v908_v41, 4  ;;  %v911_v48 = vrot.slane %v789_v43, 5  ;;  %v3691_v49 = vrot.slane %v787_v44, 9  ;;  %v154_v50 = vld [vmem:[%s4301_s25 + $0x40] sm:$0xf] }
  0x62   : > { %693 = vrot.lane.b32.xlu1 %v570_v11, %s4224_s26  ;;  %v890_v11 = vrot.slane %v780_v6, 5  ;;  %187 = vst.msk [vmem:[#allocation2 + $0x2c] sm:$0xf] %vm175_vm5, %v154_v50  ;;  %v153_v51 = vld [vmem:[%s4301_s25 + $0x3c] sm:$0xf]  ;;  %v903_v54 = vrot.slane %v901_v30, 4 }
  0x63   : > { %691 = vrot.lane.b32.xlu0 %v560_v17, %s4224_s26  ;;  %689 = vrot.lane.b32.xlu2 %v546_v22, %s4224_s26  ;;  %v146_v17 = vld [vmem:[%s4301_s25 + $0x10] sm:$0xf]  ;;  %v791_v53 = vld [vmem:[%s4301_s25 + $0x4c] sm:$0xf]  ;;  %v904_v55 = vrot.slane %v786_v46, 5  ;;  %v909_v58 = vsel %vm4487_vm6, %v3691_v49, %v908_v41 }
  0x64   : > { %179 = vst.msk [vmem:[#allocation2 + $0xc] sm:$0xf] %vm175_vm5, %v146_v17  ;;  %v891_v21 = vsel %vm4487_vm6, %v889_v13, %v890_v11  ;;  %v784_v22 = vld [vmem:[%s4301_s25 + $0x30] sm:$0xe]  ;;  %v793_v59 = vld [vmem:[%s4301_s25 + $0x54] sm:$0xe] }
  0x65   : > { %v3690_v29 = vrot.slane %v784_v22, 9  ;;  %186 = vst.msk [vmem:[#allocation2 + $0x28] sm:$0xf] %vm175_vm5, %v153_v51  ;;  %v794_v60 = vld [vmem:[%s4301_s25 + $0x58] sm:$0xf]  ;;  %v915_v61 = vrot.slane %v791_v53, 5  ;;  %v905_v63 = vsel %vm4487_vm6, %v903_v54, %v904_v55 }
  0x66   : > { %v792_v62 = vld [vmem:[%s4301_s25 + $0x50] sm:$0x1]  ;;  %v790_v0 = vld [vmem:[%s4301_s25 + $0x48] sm:$0xe]  ;;  %v3693_v2 = vrot.slane %v793_v59, 9  ;;  %v922_v3 = vrot.slane %v794_v60, 5 }
  0x67   : > { %v157_v4 = vld [vmem:[%s4301_s25 + $0x54] sm:$0xf]  ;;  %v917_v6 = vrot.slane %v915_v61, 4  ;;  %v918_v7 = vrot.slane %v792_v62, 5  ;;  %v156_v11 = vld [vmem:[%s4301_s25 + $0x4c] sm:$0xf] }
  0x68   : > { %190 = vst.msk [vmem:[#allocation2 + $0x38] sm:$0xf] %vm175_vm5, %v157_v4  ;;  %v155_v13 = vld [vmem:[%s4301_s25 + $0x48] sm:$0xf]  ;;  %v923_v14 = vsel %vm4487_vm6, %v3693_v2, %v922_v3  ;;  %v796_v18 = vld [vmem:[%s4301_s25 + $0x60] sm:$0xe] }
  0x69   : > { %v919_v16 = vsel %vm4487_vm6, %v917_v6, %v918_v7  ;;  %v798_v17 = vld [vmem:[%s4301_s25 + $0x68] sm:$0x1]  ;;  %189 = vst.msk [vmem:[#allocation2 + $0x34] sm:$0xf] %vm175_vm5, %v156_v11  ;;  %v795_v20 = vld [vmem:[%s4301_s25 + $0x5c] sm:$0x1] }
  0x6a   : > { %699 = vrot.lane.b32.xlu1 %v608_v37, %s4224_s26  ;;  %v149_v37 = vld [vmem:[%s4301_s25 + $0x24] sm:$0xf]  ;;  %188 = vst.msk [vmem:[#allocation2 + $0x30] sm:$0xf] %vm175_vm5, %v155_v13  ;;  %v932_v22 = vrot.slane %v798_v17, 5 }
  0x6b   : > { %697 = vrot.lane.b32.xlu0 %v594_v40, %s4224_s26  ;;  %695 = vrot.lane.b32.xlu2 %v584_v42, %s4224_s26  ;;  %182 = vst.msk [vmem:[#allocation2 + $0x18] sm:$0xf] %vm175_vm5, %v149_v37  ;;  %v902_v40 = vsel %vm4487_vm6, %v3690_v29, %v901_v30  ;;  %v898_v42 = vsel %vm4487_vm6, %v896_v32, %v897_v33  ;;  %v160_v23 = vld [vmem:[%s4301_s25 + $0x64] sm:$0xf]  ;;  %v800_v27 = vld [vmem:[%s4301_s25 + $0x70] sm:$0xf] }
  0x6c   : > { %193 = vst.msk [vmem:[#allocation2 + $0x44] sm:$0xf] %vm175_vm5, %v160_v23  ;;  %v924_v29 = vrot.slane %v922_v3, 4  ;;  %v925_v30 = vrot.slane %v795_v20, 5  ;;  %v159_v31 = vld [vmem:[%s4301_s25 + $0x60] sm:$0xf] }
  0x6d   : > { %v158_v33 = vld [vmem:[%s4301_s25 + $0x58] sm:$0xf]  ;;  %v803_v37 = vld [vmem:[%s4301_s25 + $0x7c] sm:$0xf]  ;;  %v936_v38 = vrot.slane %v800_v27, 5 }
  0x6e   : > { %v802_v35 = vld [vmem:[%s4301_s25 + $0x78] sm:$0xe]  ;;  %192 = vst.msk [vmem:[#allocation2 + $0x40] sm:$0xf] %vm175_vm5, %v159_v31  ;;  %v799_v41 = vld [vmem:[%s4301_s25 + $0x6c] sm:$0xe] }
  0x6f   : > { %191 = vst.msk [vmem:[#allocation2 + $0x3c] sm:$0xf] %vm175_vm5, %v158_v33  ;;  %v943_v43 = vrot.slane %v803_v37, 5  ;;  %v163_v44 = vld [vmem:[%s4301_s25 + $0x78] sm:$0xf]  ;;  %v938_v46 = vrot.slane %v936_v38, 4 }
  0x70   : > { %196 = vst.msk [vmem:[#allocation2 + $0x50] sm:$0xf] %vm175_vm5, %v163_v44  ;;  %v3695_v50 = vrot.slane %v799_v41, 9  ;;  %v162_v51 = vld [vmem:[%s4301_s25 + $0x70] sm:$0xf] }
  0x71   : > { %v161_v53 = vld [vmem:[%s4301_s25 + $0x6c] sm:$0xf]  ;;  %195 = vst.msk [vmem:[#allocation2 + $0x4c] sm:$0xf] %vm175_vm5, %v162_v51  ;;  %v804_v60 = vld [vmem:[%s4301_s25 + $0x80] sm:$0x1] }
  0x72   : > { %705 = vrot.lane.b32.xlu1 %v642_v52, %s4224_s26  ;;  %v152_v52 = vld [vmem:[%s4301_s25 + $0x34] sm:$0xf]  ;;  %v937_v59 = vsel %vm4487_vm6, %v3695_v50, %v936_v38  ;;  %194 = vst.msk [vmem:[#allocation2 + $0x48] sm:$0xf] %vm175_vm5, %v161_v53  ;;  %v946_v6 = vrot.slane %v804_v60, 5 }
  0x73   : > { %703 = vrot.lane.b32.xlu0 %v632_v56, %s4224_s26  ;;  %701 = vrot.lane.b32.xlu2 %v618_v57, %s4224_s26  ;;  %185 = vst.msk [vmem:[#allocation2 + $0x24] sm:$0xf] %vm175_vm5, %v152_v52  ;;  %v912_v57 = vsel %vm4487_vm6, %v910_v47, %v911_v48  ;;  %v806_v48 = vld [vmem:[%s4301_s25 + $0x88] sm:$0xf]  ;;  %v809_v3 = vld [vmem:[%s4301_s25 + $0x94] sm:$0xf] }
  0x74   : > { %v950_v55 = vrot.slane %v806_v48, 5  ;;  %v165_v7 = vld [vmem:[%s4301_s25 + $0x84] sm:$0xf]  ;;  %v811_v11 = vld [vmem:[%s4301_s25 + $0x9c] sm:$0xe] }
  0x75   : > { %v812_v13 = vld [vmem:[%s4301_s25 + $0xa0] sm:$0xf]  ;;  %198 = vst.msk [vmem:[#allocation2 + $0x58] sm:$0xf] %vm175_vm5, %v165_v7  ;;  %v808_v17 = vld [vmem:[%s4301_s25 + $0x90] sm:$0xe] }
  0x76   : > { %v169_v20 = vld [vmem:[%s4301_s25 + $0x9c] sm:$0xf]  ;;  %v3698_v27 = vrot.slane %v808_v17, 9  ;;  %v813_v37 = vld [vmem:[%s4301_s25 + $0xa4] sm:$0x1] }
  0x77   : > { %202 = vst.msk [vmem:[#allocation2 + $0x68] sm:$0xf] %vm175_vm5, %v169_v20  ;;  %v819_v53 = vld [vmem:[%s4301_s25 + $0xbc] sm:$0x1] }
  0x78   : > { %v3705_v7 = vld [vmem:[%s4301_s25 + $0x1c] sm:$0xf] }
  0x79   : > { %v3710_v20 = vld [vmem:[%s4301_s25 + $0x3c] sm:$0xf] }
  0x7a   : > { %987 = vrot.lane.b32.xlu1 %v881_v5, %s4225_s27 }
  0x7b   : > { %985 = vrot.lane.b32.xlu0 %v877_v8, %s4225_s27  ;;  %983 = vrot.lane.b32.xlu2 %v874_v10, %s4225_s27  ;;  %v797_v8 = vld [vmem:[%s4301_s25 + $0x64] sm:$0xf]  ;;  %v3692_v10 = vrot.slane %v790_v0, 9 }
  0x7c   : > { %v929_v15 = vrot.slane %v797_v8, 5 }
  0x7d   : > { %v916_v19 = vsel %vm4487_vm6, %v3692_v10, %v915_v61  ;;  %v952_v61 = vrot.slane %v950_v55, 4 }
  0x82   : > { %993 = vrot.lane.b32.xlu1 %v891_v21, %s4225_s27  ;;  %v931_v21 = vrot.slane %v929_v15, 4 }
  0x83   : > { %991 = vrot.lane.b32.xlu0 %v888_v26, %s4225_s27  ;;  %989 = vrot.lane.b32.xlu2 %v884_v28, %s4225_s27  ;;  %v3694_v26 = vrot.slane %v796_v18, 9  ;;  %v3699_v18 = vrot.slane %v811_v11, 9 }
  0x84   : > { %v933_v34 = vsel %vm4487_vm6, %v931_v21, %v932_v22 }
  0x85   : > { %v652_v39 = vpop.permute.xlu2 %651  ;;  %v930_v36 = vsel %vm4487_vm6, %v3694_v26, %v929_v15  ;;  %v810_v15 = vld [vmem:[%s4301_s25 + $0x98] sm:$0x1] }
  0x86   : > { %744 = vst.msk [vmem:[#allocation2 + $0x10] sm:$0xf] %vm739_vm7, %v652_v39  ;;  %v801_v39 = vld [vmem:[%s4301_s25 + $0x74] sm:$0x1]  ;;  %v960_v23 = vrot.slane %v810_v15, 5 }
  0x87   : > { %v939_v47 = vrot.slane %v801_v39, 5  ;;  %v3706_v15 = vld [vmem:[%s4301_s25 + $0x24] sm:$0xf] }
  0x8a   : > { %999 = vrot.lane.b32.xlu1 %v902_v40, %s4225_s27  ;;  %v926_v40 = vsel %vm4487_vm6, %v924_v29, %v925_v30  ;;  %v167_v30 = vld [vmem:[%s4301_s25 + $0x90] sm:$0xf] }
  0x8b   : > { %997 = vrot.lane.b32.xlu0 %v898_v42, %s4225_s27  ;;  %995 = vrot.lane.b32.xlu2 %v895_v45, %s4225_s27  ;;  %v3696_v42 = vrot.slane %v802_v35, 9  ;;  %v814_v35 = vld [vmem:[%s4301_s25 + $0xa8] sm:$0xe]  ;;  %200 = vst.msk [vmem:[#allocation2 + $0x60] sm:$0xf] %vm175_vm5, %v167_v30 }
  0x8d   : > { %v654_v56 = vpop.permute.xlu2 %653  ;;  %v944_v54 = vsel %vm4487_vm6, %v3696_v42, %v943_v43  ;;  %v3700_v42 = vrot.slane %v814_v35, 9 }
  0x8e   : > { %745 = vst.msk [vmem:[#allocation2 + $0x14] sm:$0xf] %vm739_vm7, %v654_v56  ;;  %v940_v56 = vsel %vm4487_vm6, %v938_v46, %v939_v47  ;;  %v967_v46 = vrot.slane %v813_v37, 5  ;;  %v171_v47 = vld [vmem:[%s4301_s25 + $0xa8] sm:$0xf] }
  0x8f   : > { %204 = vst.msk [vmem:[#allocation2 + $0x70] sm:$0xf] %vm175_vm5, %v171_v47 }
  0x92   : > { %1005 = vrot.lane.b32.xlu1 %v912_v57, %s4225_s27  ;;  %v807_v57 = vld [vmem:[%s4301_s25 + $0x8c] sm:$0x1] }
  0x93   : > { %1003 = vrot.lane.b32.xlu0 %v909_v58, %s4225_s27  ;;  %1001 = vrot.lane.b32.xlu2 %v905_v63, %s4225_s27  ;;  %v805_v58 = vld [vmem:[%s4301_s25 + $0x84] sm:$0xe]  ;;  %v953_v62 = vrot.slane %v807_v57, 5  ;;  %v166_v63 = vld [vmem:[%s4301_s25 + $0x88] sm:$0xf] }
  0x94   : > { %v648_v5 = vpop.permute.xlu1 %647  ;;  %v3697_v2 = vrot.slane %v805_v58, 9  ;;  %199 = vst.msk [vmem:[#allocation2 + $0x5c] sm:$0xf] %vm175_vm5, %v166_v63  ;;  %v981_v58 = vrot.slane %v819_v53, 5  ;;  %v173_v63 = vld [vmem:[%s4301_s25 + $0xb4] sm:$0xf] }
  0x95   : > { %742 = vst.msk [vmem:[#allocation2 + $0x8] sm:$0xf] %vm739_vm7, %v648_v5  ;;  %v644_v9 = vpop.permute.xlu0 %643  ;;  %v660_v12 = vpop.permute.xlu2 %659  ;;  %v945_v5 = vrot.slane %v943_v43, 4  ;;  %v954_v10 = vsel %vm4487_vm6, %v952_v61, %v953_v62  ;;  %v818_v43 = vld [vmem:[%s4301_s25 + $0xb8] sm:$0xf] }
  0x96   : > { %740 = vst.msk [vmem:[#allocation2] sm:$0xf] %vm739_vm7, %v644_v9  ;;  %v164_v9 = vld [vmem:[%s4301_s25 + $0x7c] sm:$0xf]  ;;  %v174_v61 = vld [vmem:[%s4301_s25 + $0xb8] sm:$0xf] }
  0x97   : > { %748 = vst.msk [vmem:[#allocation2 + $0x20] sm:$0xf] %vm739_vm7, %v660_v12  ;;  %v951_v12 = vsel %vm4487_vm6, %v3697_v2, %v950_v55  ;;  %v817_v55 = vld [vmem:[%s4301_s25 + $0xb4] sm:$0xe]  ;;  %v3735_v53 = vld [vmem:[%s4301_s25 + $0x10] sm:$0xf] }
  0x98   : > { %197 = vst.msk [vmem:[#allocation2 + $0x54] sm:$0xf] %vm175_vm5, %v164_v9  ;;  %v3701_v60 = vrot.slane %v817_v55, 9  ;;  %v3703_v9 = vld [vmem:[%s4301_s25 + $0x10] sm:$0xf] }
  0x99   : > { %207 = vst.msk [vmem:[#allocation2 + $0x7c] sm:$0xf] %vm175_vm5, %v174_v61  ;;  %v3728_v61 = vld [vmem:[%s4301_s25 + $0xa8] sm:$0xf] }
  0x9a   : > { %1011 = vrot.lane.b32.xlu1 %v923_v14, %s4225_s27  ;;  %v957_v14 = vrot.slane %v809_v3, 5  ;;  %206 = vst.msk [vmem:[#allocation2 + $0x78] sm:$0xf] %vm175_vm5, %v173_v63 }
  0x9b   : > { %1009 = vrot.lane.b32.xlu0 %v919_v16, %s4225_s27  ;;  %1007 = vrot.lane.b32.xlu2 %v916_v19, %s4225_s27  ;;  %v947_v16 = vsel %vm4487_vm6, %v945_v5, %v946_v6  ;;  %v964_v19 = vrot.slane %v812_v13, 5  ;;  %v3708_v13 = vld [vmem:[%s4301_s25 + $0x30] sm:$0xf] }
  0x9c   : > { %v650_v24 = vpop.permute.xlu1 %649  ;;  %v959_v22 = vrot.slane %v957_v14, 4 }
  0x9d   : > { %743 = vst.msk [vmem:[#allocation2 + $0xc] sm:$0xf] %vm739_vm7, %v650_v24  ;;  %v646_v28 = vpop.permute.xlu0 %645  ;;  %v666_v32 = vpop.permute.xlu2 %665  ;;  %v815_v24 = vld [vmem:[%s4301_s25 + $0xac] sm:$0xf]  ;;  %v965_v31 = vsel %vm4487_vm6, %v3699_v18, %v964_v19 }
  0x9e   : > { %741 = vst.msk [vmem:[#allocation2 + $0x4] sm:$0xf] %vm739_vm7, %v646_v28  ;;  %v168_v28 = vld [vmem:[%s4301_s25 + $0x94] sm:$0xf]  ;;  %v961_v33 = vsel %vm4487_vm6, %v959_v22, %v960_v23 }
  0x9f   : > { %751 = vst.msk [vmem:[#allocation2 + $0x2c] sm:$0xf] %vm739_vm7, %v666_v32  ;;  %v971_v32 = vrot.slane %v815_v24, 5 }
  0xa0   : > { %201 = vst.msk [vmem:[#allocation2 + $0x64] sm:$0xf] %vm175_vm5, %v168_v28  ;;  %v3712_v28 = vld [vmem:[%s4301_s25 + $0x48] sm:$0xf] }
  0xa1   : > { %v973_v38 = vrot.slane %v971_v32, 4  ;;  %v972_v51 = vsel %vm4487_vm6, %v3700_v42, %v971_v32  ;;  %v3717_v32 = vld [vmem:[%s4301_s25 + $0x64] sm:$0xf] }
  0xa2   : > { %1017 = vrot.lane.b32.xlu1 %v933_v34, %s4225_s27  ;;  %v816_v34 = vld [vmem:[%s4301_s25 + $0xb0] sm:$0x1] }
  0xa3   : > { %1015 = vrot.lane.b32.xlu0 %v930_v36, %s4225_s27  ;;  %1013 = vrot.lane.b32.xlu2 %v926_v40, %s4225_s27  ;;  %v958_v36 = vsel %vm4487_vm6, %v3698_v27, %v957_v14  ;;  %v974_v39 = vrot.slane %v816_v34, 5  ;;  %v172_v40 = vld [vmem:[%s4301_s25 + $0xac] sm:$0xf]  ;;  %v3707_v14 = vld [vmem:[%s4301_s25 + $0x28] sm:$0xf] }
  0xa4   : > { %v658_v45 = vpop.permute.xlu1 %657  ;;  %205 = vst.msk [vmem:[#allocation2 + $0x74] sm:$0xf] %vm175_vm5, %v172_v40  ;;  %v3713_v27 = vld [vmem:[%s4301_s25 + $0x4c] sm:$0xf]  ;;  %v3715_v34 = vld [vmem:[%s4301_s25 + $0x58] sm:$0xf] }
  0xa5   : > { %747 = vst.msk [vmem:[#allocation2 + $0x1c] sm:$0xf] %vm739_vm7, %v658_v45  ;;  %v656_v49 = vpop.permute.xlu0 %655  ;;  %v672_v52 = vpop.permute.xlu2 %671  ;;  %v966_v45 = vrot.slane %v964_v19, 4  ;;  %v975_v50 = vsel %vm4487_vm6, %v973_v38, %v974_v39  ;;  %v3711_v19 = vld [vmem:[%s4301_s25 + $0x40] sm:$0xf] }
  0xa6   : > { %746 = vst.msk [vmem:[#allocation2 + $0x18] sm:$0xf] %vm739_vm7, %v656_v49  ;;  %v170_v49 = vld [vmem:[%s4301_s25 + $0xa0] sm:$0xf]  ;;  %v3720_v38 = vld [vmem:[%s4301_s25 + $0x78] sm:$0xf] }
  0xa7   : > { %754 = vst.msk [vmem:[#allocation2 + $0x38] sm:$0xf] %vm739_vm7, %v672_v52  ;;  %v978_v52 = vrot.slane %v818_v43, 5  ;;  %v3719_v39 = vld [vmem:[%s4301_s25 + $0x70] sm:$0xf] }
  0xa8   : > { %203 = vst.msk [vmem:[#allocation2 + $0x6c] sm:$0xf] %vm175_vm5, %v170_v49  ;;  %v3718_v40 = vld [vmem:[%s4301_s25 + $0x6c] sm:$0xf] }
  0xa9   : > { %v980_v57 = vrot.slane %v978_v52, 4  ;;  %v979_v3 = vsel %vm4487_vm6, %v3701_v60, %v978_v52  ;;  %v3724_v52 = vld [vmem:[%s4301_s25 + $0x90] sm:$0xf]  ;;  %v3729_v60 = vld [vmem:[%s4301_s25 + $0xac] sm:$0xf] }
  0xaa   : > { %1023 = vrot.lane.b32.xlu1 %v944_v54, %s4225_s27  ;;  %v968_v54 = vsel %vm4487_vm6, %v966_v45, %v967_v46  ;;  %v3722_v45 = vld [vmem:[%s4301_s25 + $0x84] sm:$0xf]  ;;  %v3721_v46 = vld [vmem:[%s4301_s25 + $0x7c] sm:$0xf] }
  0xab   : > { %1021 = vrot.lane.b32.xlu0 %v940_v56, %s4225_s27  ;;  %1019 = vrot.lane.b32.xlu2 %v937_v59, %s4225_s27  ;;  %v982_v2 = vsel %vm4487_vm6, %v980_v57, %v981_v58  ;;  %v1364_v58 = vshll.u32 %v3735_v53, 16 }
  0xac   : > { %v664_v0 = vpop.permute.xlu1 %663 }
  0xad   : > { %750 = vst.msk [vmem:[#allocation2 + $0x28] sm:$0xf] %vm739_vm7, %v664_v0  ;;  %v662_v4 = vpop.permute.xlu0 %661  ;;  %v678_v8 = vpop.permute.xlu2 %677  ;;  %v3702_v0 = vld [vmem:[%s4301_s25 + $0xc] sm:$0xf] }
  0xae   : > { %749 = vst.msk [vmem:[#allocation2 + $0x24] sm:$0xf] %vm739_vm7, %v662_v4 }
  0xaf   : > { %757 = vst.msk [vmem:[#allocation2 + $0x44] sm:$0xf] %vm739_vm7, %v678_v8  ;;  %v3704_v8 = vld [vmem:[%s4301_s25 + $0x18] sm:$0xf] }
  0xb2   : > { %1029 = vrot.lane.b32.xlu1 %v954_v10, %s4225_s27 }
  0xb3   : > { %1027 = vrot.lane.b32.xlu0 %v951_v12, %s4225_s27  ;;  %1025 = vrot.lane.b32.xlu2 %v947_v16, %s4225_s27 }
  0xb4   : > { %v670_v21 = vpop.permute.xlu1 %669 }
  0xb5   : > { %753 = vst.msk [vmem:[#allocation2 + $0x34] sm:$0xf] %vm739_vm7, %v670_v21  ;;  %v668_v26 = vpop.permute.xlu0 %667  ;;  %v684_v29 = vpop.permute.xlu2 %683  ;;  %v3709_v21 = vld [vmem:[%s4301_s25 + $0x34] sm:$0xf] }
  0xb6   : > { %752 = vst.msk [vmem:[#allocation2 + $0x30] sm:$0xf] %vm739_vm7, %v668_v26  ;;  %v3714_v26 = vld [vmem:[%s4301_s25 + $0x54] sm:$0xf] }
  0xb7   : > { %760 = vst.msk [vmem:[#allocation2 + $0x50] sm:$0xf] %vm739_vm7, %v684_v29 }
  0xba   : > { %1035 = vrot.lane.b32.xlu1 %v965_v31, %s4225_s27 }
  0xbb   : > { %1033 = vrot.lane.b32.xlu0 %v961_v33, %s4225_s27  ;;  %1031 = vrot.lane.b32.xlu2 %v958_v36, %s4225_s27  ;;  %v3716_v33 = vld [vmem:[%s4301_s25 + $0x60] sm:$0xf] }
  0xbc   : > { %v676_v41 = vpop.permute.xlu1 %675 }
  0xbd   : > { %756 = vst.msk [vmem:[#allocation2 + $0x40] sm:$0xf] %vm739_vm7, %v676_v41  ;;  %v674_v44 = vpop.permute.xlu0 %673  ;;  %v690_v48 = vpop.permute.xlu2 %689 }
  0xbe   : > { %755 = vst.msk [vmem:[#allocation2 + $0x3c] sm:$0xf] %vm739_vm7, %v674_v44  ;;  %v3723_v44 = vld [vmem:[%s4301_s25 + $0x88] sm:$0xf] }
  0xbf   : > { %763 = vst.msk [vmem:[#allocation2 + $0x5c] sm:$0xf] %vm739_vm7, %v690_v48 }
  0xc2   : > { %1041 = vrot.lane.b32.xlu1 %v975_v50, %s4225_s27  ;;  %v3726_v50 = vld [vmem:[%s4301_s25 + $0x9c] sm:$0xf] }
  0xc3   : > { %1039 = vrot.lane.b32.xlu0 %v972_v51, %s4225_s27  ;;  %1037 = vrot.lane.b32.xlu2 %v968_v54, %s4225_s27  ;;  %v3725_v51 = vld [vmem:[%s4301_s25 + $0x94] sm:$0xf] }
  0xc4   : > { %v682_v56 = vpop.permute.xlu1 %681 }
  0xc5   : > { %759 = vst.msk [vmem:[#allocation2 + $0x4c] sm:$0xf] %vm739_vm7, %v682_v56  ;;  %v680_v59 = vpop.permute.xlu0 %679  ;;  %v696_v62 = vpop.permute.xlu2 %695  ;;  %v3734_v56 = vld [vmem:[%s4301_s25 + $0xc] sm:$0xf] }
  0xc6   : > { %758 = vst.msk [vmem:[#allocation2 + $0x48] sm:$0xf] %vm739_vm7, %v680_v59  ;;  %v1368_v59 = vshrl.u32 %v3735_v53, 16  ;;  %v1358_v63 = vshll.u32 %v3734_v56, 16  ;;  %v3733_v53 = vld [vmem:[%s4301_s25 + $0xc4] sm:$0xf] }
  0xc7   : > { %766 = vst.msk [vmem:[#allocation2 + $0x68] sm:$0xf] %vm739_vm7, %v696_v62  ;;  %v1355_v62 = vshrl.u32 %v3734_v56, 16 }
  0xca   : > { %1177 = vrot.lane.b32.xlu1 %v3702_v0, %s4226_s28  ;;  %v3727_v0 = vld [vmem:[%s4301_s25 + $0xa0] sm:$0xf] }
  0xcb   : > { %1045 = vrot.lane.b32.xlu0 %v982_v2, %s4225_s27  ;;  %1043 = vrot.lane.b32.xlu2 %v979_v3, %s4225_s27  ;;  %v4799_v2 = vrot.slane %v1364_v58, 5  ;;  %v1370_v3 = vrot.slane %v1368_v59, 4 }
  0xcc   : > { %v688_v4 = vpop.permute.xlu1 %687 }
  0xcd   : > { %762 = vst.msk [vmem:[#allocation2 + $0x58] sm:$0xf] %vm739_vm7, %v688_v4  ;;  %v686_v5 = vpop.permute.xlu0 %685  ;;  %v702_v6 = vpop.permute.xlu2 %701  ;;  %v3736_v4 = vld [vmem:[%s4301_s25 + $0x14] sm:$0x1] }
  0xce   : > { %761 = vst.msk [vmem:[#allocation2 + $0x54] sm:$0xf] %vm739_vm7, %v686_v5 }
  0xcf   : > { %769 = vst.msk [vmem:[#allocation2 + $0x74] sm:$0xf] %vm739_vm7, %v702_v6  ;;  %v1357_v6 = vrot.slane %v1355_v62, 4  ;;  %v3749_v62 = vld [vmem:[%s4301_s25 + $0x48] sm:$0xf] }
  0xd2   : > { %1183 = vrot.lane.b32.xlu1 %v3705_v7, %s4226_s28  ;;  %v1360_v7 = vrot.slane %v1358_v63, 5 }
  0xd3   : > { %1181 = vrot.lane.b32.xlu0 %v3704_v8, %s4226_s28  ;;  %1179 = vrot.lane.b32.xlu2 %v3703_v9, %s4226_s28  ;;  %v3740_v8 = vld [vmem:[%s4301_s25 + $0x24] sm:$0xf] }
  0xd4   : > { %v694_v10 = vpop.permute.xlu1 %693 }
  0xd5   : > { %765 = vst.msk [vmem:[#allocation2 + $0x64] sm:$0xf] %vm739_vm7, %v694_v10  ;;  %v692_v11 = vpop.permute.xlu0 %691  ;;  %v984_v12 = vpop.permute.xlu2 %983  ;;  %v3738_v10 = vld [vmem:[%s4301_s25 + $0x1c] sm:$0xf] }
  0xd6   : > { %764 = vst.msk [vmem:[#allocation2 + $0x60] sm:$0xf] %vm739_vm7, %v692_v11  ;;  %v1371_v11 = vor.u32 %v1370_v3, %v4799_v2  ;;  %v3747_v3 = vld [vmem:[%s4301_s25 + $0x40] sm:$0xf] }
  0xd7   : > { %1080 = vst.msk [vmem:[#allocation2] sm:$0xf] %vm1079_vm8, %v984_v12  ;;  %v1374_v12 = vshll.u32 %v3736_v4, 16 }
  0xda   : > { %1189 = vrot.lane.b32.xlu1 %v3708_v13, %s4226_s28 }
  0xdb   : > { %1187 = vrot.lane.b32.xlu0 %v3707_v14, %s4226_s28  ;;  %1185 = vrot.lane.b32.xlu2 %v3706_v15, %s4226_s28  ;;  %v3737_v14 = vld [vmem:[%s4301_s25 + $0x18] sm:$0xf]  ;;  %v3732_v15 = vld [vmem:[%s4301_s25 + $0xc0] sm:$0xf] }
  0xdc   : > { %v700_v16 = vpop.permute.xlu1 %699 }
  0xdd   : > { %768 = vst.msk [vmem:[#allocation2 + $0x70] sm:$0xf] %vm739_vm7, %v700_v16  ;;  %v698_v17 = vpop.permute.xlu0 %697  ;;  %v990_v18 = vpop.permute.xlu2 %989  ;;  %v1403_v16 = vshrl.u32 %v3740_v8, 16 }
  0xde   : > { %767 = vst.msk [vmem:[#allocation2 + $0x6c] sm:$0xf] %vm739_vm7, %v698_v17  ;;  %v1406_v17 = vshll.u32 %v3740_v8, 16 }
  0xdf   : > { %1083 = vst.msk [vmem:[#allocation2 + $0xc] sm:$0xf] %vm1079_vm8, %v990_v18  ;;  %v3731_v18 = vld [vmem:[%s4301_s25 + $0xb8] sm:$0xf] }
  0xe2   : > { %1195 = vrot.lane.b32.xlu1 %v3711_v19, %s4226_s28  ;;  %v1361_v19 = vor.u32 %v1360_v7, %v1357_v6  ;;  %v3746_v7 = vld [vmem:[%s4301_s25 + $0x3c] sm:$0xf] }
  0xe3   : > { %1193 = vrot.lane.b32.xlu0 %v3710_v20, %s4226_s28  ;;  %1191 = vrot.lane.b32.xlu2 %v3709_v21, %s4226_s28  ;;  %v1388_v20 = vshll.u32 %v3738_v10, 16  ;;  %v1392_v21 = vshrl.u32 %v3738_v10, 16 }
  0xe4   : > { %v706_v22 = vpop.permute.xlu1 %705 }
  0xe5   : > { %771 = vst.msk [vmem:[#allocation2 + $0x7c] sm:$0xf] %vm739_vm7, %v706_v22  ;;  %v704_v23 = vpop.permute.xlu0 %703  ;;  %v996_v24 = vpop.permute.xlu2 %995  ;;  %v3730_v22 = vld [vmem:[%s4301_s25 + $0xb4] sm:$0xf] }
  0xe6   : > { %770 = vst.msk [vmem:[#allocation2 + $0x78] sm:$0xf] %vm739_vm7, %v704_v23  ;;  %v1379_v23 = vshrl.u32 %v3737_v14, 16 }
  0xe7   : > { %1086 = vst.msk [vmem:[#allocation2 + $0x18] sm:$0xf] %vm1079_vm8, %v996_v24  ;;  %v1382_v24 = vshll.u32 %v3737_v14, 16 }
  0xea   : > { %1201 = vrot.lane.b32.xlu1 %v3714_v26, %s4226_s28  ;;  %v1372_v26 = vrot.slane %v1371_v11, 4 }
  0xeb   : > { %1199 = vrot.lane.b32.xlu0 %v3713_v27, %s4226_s28  ;;  %1197 = vrot.lane.b32.xlu2 %v3712_v28, %s4226_s28  ;;  %v1376_v27 = vrot.slane %v1374_v12, 5  ;;  %v1405_v28 = vrot.slane %v1403_v16, 4  ;;  %v1475_v12 = vshrl.u32 %v3749_v62, 16  ;;  %v1460_v16 = vshll.u32 %v3747_v3, 16 }
  0xec   : > { %v988_v29 = vpop.permute.xlu1 %987 }
  0xed   : > { %1082 = vst.msk [vmem:[#allocation2 + $0x8] sm:$0xf] %vm1079_vm8, %v988_v29  ;;  %v986_v30 = vpop.permute.xlu0 %985  ;;  %v1002_v31 = vpop.permute.xlu2 %1001  ;;  %v1408_v29 = vrot.slane %v1406_v17, 5  ;;  %v1464_v17 = vshrl.u32 %v3747_v3, 16 }
  0xee   : > { %1081 = vst.msk [vmem:[#allocation2 + $0x4] sm:$0xf] %vm1079_vm8, %v986_v30  ;;  %v3744_v30 = vld [vmem:[%s4301_s25 + $0x34] sm:$0xf] }
  0xef   : > { %1089 = vst.msk [vmem:[#allocation2 + $0x24] sm:$0xf] %vm1079_vm8, %v1002_v31  ;;  %v3743_v31 = vld [vmem:[%s4301_s25 + $0x30] sm:$0xf] }
  0xf2   : > { %1207 = vrot.lane.b32.xlu1 %v3717_v32, %s4226_s28 }
  0xf3   : > { %1205 = vrot.lane.b32.xlu0 %v3716_v33, %s4226_s28  ;;  %1203 = vrot.lane.b32.xlu2 %v3715_v34, %s4226_s28  ;;  %v1362_v33 = vrot.slane %v1361_v19, 4  ;;  %v3741_v34 = vld [vmem:[%s4301_s25 + $0x28] sm:$0xf]  ;;  %v3753_v19 = vld [vmem:[%s4301_s25 + $0x58] sm:$0xf] }
  0xf4   : > { %v994_v35 = vpop.permute.xlu1 %993 }
  0xf5   : > { %1085 = vst.msk [vmem:[#allocation2 + $0x14] sm:$0xf] %vm1079_vm8, %v994_v35  ;;  %v992_v36 = vpop.permute.xlu0 %991  ;;  %v1008_v37 = vpop.permute.xlu2 %1007  ;;  %v4820_v35 = vrot.slane %v1388_v20, 5  ;;  %v1451_v20 = vshrl.u32 %v3746_v7, 16 }
  0xf6   : > { %1084 = vst.msk [vmem:[#allocation2 + $0x10] sm:$0xf] %vm1079_vm8, %v992_v36  ;;  %v1394_v36 = vrot.slane %v1392_v21, 4  ;;  %v1454_v21 = vshll.u32 %v3746_v7, 16  ;;  %v3756_v7 = vld [vmem:[%s4301_s25 + $0x64] sm:$0xf] }
  0xf7   : > { %1092 = vst.msk [vmem:[#allocation2 + $0x30] sm:$0xf] %vm1079_vm8, %v1008_v37 }
  0xfa   : > { %1213 = vrot.lane.b32.xlu1 %v3720_v38, %s4226_s28  ;;  %v3739_v38 = vld [vmem:[%s4301_s25 + $0x20] sm:$0x1] }
  0xfb   : > { %1211 = vrot.lane.b32.xlu0 %v3719_v39, %s4226_s28  ;;  %1209 = vrot.lane.b32.xlu2 %v3718_v40, %s4226_s28  ;;  %v1381_v39 = vrot.slane %v1379_v23, 4  ;;  %v1384_v40 = vrot.slane %v1382_v24, 5 }
  0xfc   : > { %v1000_v41 = vpop.permute.xlu1 %999 }
  0xfd   : > { %1088 = vst.msk [vmem:[#allocation2 + $0x20] sm:$0xf] %vm1079_vm8, %v1000_v41  ;;  %v998_v42 = vpop.permute.xlu0 %997  ;;  %v1014_v43 = vpop.permute.xlu2 %1013 }
  0xfe   : > { %1087 = vst.msk [vmem:[#allocation2 + $0x1c] sm:$0xf] %vm1079_vm8, %v998_v42  ;;  %v1436_v42 = vshll.u32 %v3744_v30, 16 }
  0xff   : > { %1095 = vst.msk [vmem:[#allocation2 + $0x3c] sm:$0xf] %vm1079_vm8, %v1014_v43  ;;  %v1440_v43 = vshrl.u32 %v3744_v30, 16  ;;  %v1477_v30 = vrot.slane %v1475_v12, 4 }
 0x101   : > { %v1442_v56 = vrot.slane %v1440_v43, 4 }
 0x102   : > { %1219 = vrot.lane.b32.xlu1 %v3723_v44, %s4226_s28  ;;  %v1427_v44 = vshrl.u32 %v3743_v31, 16 }
 0x103   : > { %1217 = vrot.lane.b32.xlu0 %v3722_v45, %s4226_s28  ;;  %1215 = vrot.lane.b32.xlu2 %v3721_v46, %s4226_s28  ;;  %v1430_v45 = vshll.u32 %v3743_v31, 16  ;;  %v1377_v46 = vsel %vm4312_vm2, %v1372_v26, %v1376_v27 }
 0x104   : > { %v1006_v47 = vpop.permute.xlu1 %1005 }
 0x105   : > { %1091 = vst.msk [vmem:[#allocation2 + $0x2c] sm:$0xf] %vm1079_vm8, %v1006_v47  ;;  %v1004_v48 = vpop.permute.xlu0 %1003  ;;  %v1020_v49 = vpop.permute.xlu2 %1019  ;;  %v1409_v47 = vor.u32 %v1408_v29, %v1405_v28  ;;  %v1432_v58 = vrot.slane %v1430_v45, 5  ;;  %v3750_v29 = vld [vmem:[%s4301_s25 + $0x4c] sm:$0xf] }
 0x106   : > { %1090 = vst.msk [vmem:[#allocation2 + $0x28] sm:$0xf] %vm1079_vm8, %v1004_v48  ;;  %v1412_v48 = vshll.u32 %v3741_v34, 16 }
 0x107   : > { %1098 = vst.msk [vmem:[#allocation2 + $0x48] sm:$0xf] %vm1079_vm8, %v1020_v49  ;;  %v1367_v49 = vsel %vm4312_vm2, %v1362_v33, %v4799_v2  ;;  %v1410_v59 = vrot.slane %v1409_v47, 4  ;;  %v4859_v33 = vrot.slane %v1460_v16, 5 }
 0x10a   : > { %1225 = vrot.lane.b32.xlu1 %v3726_v50, %s4226_s28  ;;  %v1395_v50 = vor.u32 %v1394_v36, %v4820_v35  ;;  %v1508_v36 = vshll.u32 %v3753_v19, 16 }
 0x10b   : > { %1223 = vrot.lane.b32.xlu0 %v3725_v51, %s4226_s28  ;;  %1221 = vrot.lane.b32.xlu2 %v3724_v52, %s4226_s28  ;;  %v1398_v51 = vshll.u32 %v3739_v38, 16  ;;  %v1416_v52 = vshrl.u32 %v3741_v34, 16  ;;  %v1466_v34 = vrot.slane %v1464_v17, 4  ;;  %v3752_v38 = vld [vmem:[%s4301_s25 + $0x54] sm:$0xf]  ;;  %v1532_v17 = vshll.u32 %v3756_v7, 16 }
 0x10c   : > { %v1012_v54 = vpop.permute.xlu1 %1011 }
 0x10d   : > { %1094 = vst.msk [vmem:[#allocation2 + $0x38] sm:$0xf] %vm1079_vm8, %v1012_v54  ;;  %v1010_v55 = vpop.permute.xlu0 %1009  ;;  %v1026_v57 = vpop.permute.xlu2 %1025  ;;  %v1385_v54 = vor.u32 %v1384_v40, %v1381_v39  ;;  %v1400_v2 = vrot.slane %v1398_v51, 5  ;;  %v1418_v6 = vrot.slane %v1416_v52, 4  ;;  %v1453_v39 = vrot.slane %v1451_v20, 4 }
 0x10e   : > { %1093 = vst.msk [vmem:[#allocation2 + $0x34] sm:$0xf] %vm1079_vm8, %v1010_v55  ;;  %v4834_v55 = vrot.slane %v1436_v42, 5  ;;  %v1456_v40 = vrot.slane %v1454_v21, 5  ;;  %v1499_v51 = vshrl.u32 %v3752_v38, 16  ;;  %v4872_v52 = vrot.slane %v1508_v36, 5 }
 0x10f   : > { %1101 = vst.msk [vmem:[#allocation2 + $0x54] sm:$0xf] %vm1079_vm8, %v1026_v57  ;;  %v1429_v57 = vrot.slane %v1427_v44, 4 }
 0x110   : > { %v1443_v8 = vor.u32 %v1442_v56, %v4834_v55  ;;  %v1457_v56 = vor.u32 %v1456_v40, %v1453_v39 }
 0x111   : > { %v1433_v10 = vor.u32 %v1432_v58, %v1429_v57  ;;  %v1488_v57 = vshrl.u32 %v3750_v29, 16 }
 0x112   : > { %1231 = vrot.lane.b32.xlu1 %v3729_v60, %s4226_s28  ;;  %v1414_v60 = vrot.slane %v1412_v48, 5  ;;  %v1444_v26 = vrot.slane %v1443_v8, 4 }
 0x113   : > { %1229 = vrot.lane.b32.xlu0 %v3728_v61, %s4226_s28  ;;  %1227 = vrot.lane.b32.xlu2 %v3727_v0, %s4226_s28  ;;  %v3745_v61 = vld [vmem:[%s4301_s25 + $0x38] sm:$0x1]  ;;  %v1396_v0 = vrot.slane %v1395_v50, 4  ;;  %v1434_v28 = vrot.slane %v1433_v10, 4 }
 0x114   : > { %v1018_v5 = vpop.permute.xlu1 %1017  ;;  %v1415_v14 = vsel %vm4312_vm2, %v1410_v59, %v1414_v60  ;;  %v1419_v23 = vor.u32 %v1418_v6, %v1414_v60  ;;  %v3758_v60 = vld [vmem:[%s4301_s25 + $0x6c] sm:$0xf]  ;;  %v1458_v6 = vrot.slane %v1457_v56, 4 }
 0x115   : > { %1097 = vst.msk [vmem:[#allocation2 + $0x44] sm:$0xf] %vm1079_vm8, %v1018_v5  ;;  %v1016_v9 = vpop.permute.xlu0 %1015  ;;  %v1032_v13 = vpop.permute.xlu2 %1031  ;;  %v1386_v5 = vrot.slane %v1385_v54, 4  ;;  %v1439_v45 = vsel %vm4312_vm2, %v1434_v28, %v4834_v55  ;;  %v1502_v54 = vshll.u32 %v3752_v38, 16  ;;  %v3754_v55 = vld [vmem:[%s4301_s25 + $0x5c] sm:$0x1] }
 0x116   : > { %1096 = vst.msk [vmem:[#allocation2 + $0x40] sm:$0xf] %vm1079_vm8, %v1016_v9  ;;  %v1446_v9 = vshll.u32 %v3745_v61, 16  ;;  %v1420_v42 = vrot.slane %v1419_v23, 4  ;;  %v1550_v10 = vshll.u32 %v3758_v60, 16 }
 0x117   : > { %1104 = vst.msk [vmem:[#allocation2 + $0x60] sm:$0xf] %vm1079_vm8, %v1032_v13  ;;  %v3742_v13 = vld [vmem:[%s4301_s25 + $0x2c] sm:$0x1]  ;;  %v3757_v38 = vld [vmem:[%s4301_s25 + $0x68] sm:$0x1] }
 0x118   : > { %v1422_v24 = vshll.u32 %v3742_v13, 16  ;;  %v1448_v27 = vrot.slane %v1446_v9, 5  ;;  %v1547_v9 = vshrl.u32 %v3758_v60, 16  ;;  %v3751_v13 = vld [vmem:[%s4301_s25 + $0x50] sm:$0x1] }
 0x11a   : > { %1237 = vrot.lane.b32.xlu1 %v3732_v15, %s4226_s28  ;;  %v1478_v15 = vshll.u32 %v3749_v62, 16  ;;  %v1424_v43 = vrot.slane %v1422_v24, 5  ;;  %v1449_v44 = vsel %vm4312_vm2, %v1444_v26, %v1448_v27  ;;  %v1494_v24 = vshll.u32 %v3751_v13, 16 }
 0x11b   : > { %1235 = vrot.lane.b32.xlu0 %v3731_v18, %s4226_s28  ;;  %1233 = vrot.lane.b32.xlu2 %v3730_v22, %s4226_s28  ;;  %v1401_v18 = vsel %vm4312_vm2, %v1396_v0, %v1400_v2  ;;  %v1391_v22 = vsel %vm4312_vm2, %v1386_v5, %v4820_v35  ;;  %v1512_v35 = vshrl.u32 %v3753_v19, 16  ;;  %v1501_v0 = vrot.slane %v1499_v51, 4 }
 0x11c   : > { %v1024_v32 = vpop.permute.xlu1 %1023  ;;  %v1480_v31 = vrot.slane %v1478_v15, 5  ;;  %v1425_v58 = vsel %vm4312_vm2, %v1420_v42, %v1424_v43  ;;  %v1504_v5 = vrot.slane %v1502_v54, 5  ;;  %v1549_v28 = vrot.slane %v1547_v9, 4  ;;  %v3764_v9 = vld [vmem:[%s4301_s25 + $0x84] sm:$0xf] }
 0x11d   : > { %1100 = vst.msk [vmem:[#allocation2 + $0x50] sm:$0xf] %vm1079_vm8, %v1024_v32  ;;  %v1022_v37 = vpop.permute.xlu0 %1021  ;;  %v1038_v41 = vpop.permute.xlu2 %1037  ;;  %v3748_v32 = vld [vmem:[%s4301_s25 + $0x44] sm:$0x1] }
 0x11e   : > { %1099 = vst.msk [vmem:[#allocation2 + $0x4c] sm:$0xf] %vm1079_vm8, %v1022_v37  ;;  %v1481_v48 = vor.u32 %v1480_v31, %v1477_v30  ;;  %v1470_v50 = vshll.u32 %v3748_v32, 16  ;;  %v1505_v21 = vor.u32 %v1504_v5, %v1501_v0  ;;  %v4897_v30 = vrot.slane %v1532_v17, 5  ;;  %v3762_v32 = vld [vmem:[%s4301_s25 + $0x7c] sm:$0xf] }
 0x11f   : > { %1107 = vst.msk [vmem:[#allocation2 + $0x6c] sm:$0xf] %vm1079_vm8, %v1038_v41  ;;  %v3765_v5 = vld [vmem:[%s4301_s25 + $0x88] sm:$0xf] }
 0x120   : > { %v1482_v61 = vrot.slane %v1481_v48, 4 }
 0x122   : > { %1740 = vrot.lane.b32.xlu1 %v1377_v46, %s4227_s29  ;;  %v1484_v46 = vshll.u32 %v3750_v29, 16  ;;  %v1552_v29 = vrot.slane %v1550_v10, 5 }
 0x123   : > { %1738 = vrot.lane.b32.xlu0 %v1367_v49, %s4227_s29  ;;  %1239 = vrot.lane.b32.xlu2 %v3733_v53, %s4226_s28  ;;  %v1467_v49 = vor.u32 %v1466_v34, %v4859_v33  ;;  %v1514_v53 = vrot.slane %v1512_v35, 4  ;;  %v3761_v34 = vld [vmem:[%s4301_s25 + $0x78] sm:$0xf]  ;;  %v3759_v35 = vld [vmem:[%s4301_s25 + $0x70] sm:$0xf]  ;;  %s3614_s28 = scalar_lea.hbm %s5788_s2, %s4101_s24 }
 0x124   : > { %v1030_v63 = vpop.permute.xlu1 %1029  ;;  %v1486_v59 = vrot.slane %v1484_v46, 5  ;;  %v1584_v46 = vshrl.u32 %v3762_v32, 16  ;;  %v1574_v48 = vshll.u32 %v3761_v34, 16  ;;  %v1560_v56 = vshrl.u32 %v3759_v35, 16 }
 0x125   : > { %1103 = vst.msk [vmem:[#allocation2 + $0x5c] sm:$0xf] %vm1079_vm8, %v1030_v63  ;;  %v1028_v4 = vpop.permute.xlu0 %1027  ;;  %v1044_v11 = vpop.permute.xlu2 %1043  ;;  %v1468_v62 = vrot.slane %v1467_v49, 4  ;;  %v1472_v63 = vrot.slane %v1470_v50, 5  ;;  %v1515_v3 = vor.u32 %v1514_v53, %v4872_v52  ;;  %v1553_v49 = vor.u32 %v1552_v29, %v1549_v28 }
 0x126   : > { %1102 = vst.msk [vmem:[#allocation2 + $0x58] sm:$0xf] %vm1079_vm8, %v1028_v4  ;;  %v1518_v4 = vshll.u32 %v3754_v55, 16  ;;  %v1487_v15 = vsel %vm4312_vm2, %v1482_v61, %v1486_v59  ;;  %v1556_v50 = vshll.u32 %v3759_v35, 16  ;;  %v1542_v53 = vshll.u32 %v3757_v38, 16 }
 0x127   : > { %1110 = vst.msk [vmem:[#allocation2 + $0x78] sm:$0xf] %vm1079_vm8, %v1044_v11  ;;  %v1490_v11 = vrot.slane %v1488_v57, 4  ;;  %v1473_v16 = vsel %vm4312_vm2, %v1468_v62, %v1472_v63  ;;  %v1516_v19 = vrot.slane %v1515_v3, 4  ;;  %v1576_v61 = vrot.slane %v1574_v48, 5 }
 0x128   : > { %v1520_v20 = vrot.slane %v1518_v4, 5  ;;  %v1554_v62 = vrot.slane %v1553_v49, 4  ;;  %v1558_v63 = vrot.slane %v1556_v50, 5  ;;  %v1544_v0 = vrot.slane %v1542_v53, 5  ;;  %v3767_v4 = vld [vmem:[%s4301_s25 + $0x90] sm:$0xf] }
 0x129   : > { %v1491_v23 = vor.u32 %v1490_v11, %v1486_v59  ;;  %v1586_v59 = vrot.slane %v1584_v46, 4  ;;  %v1619_v17 = vshrl.u32 %v3767_v4, 16 }
 0x12a   : > { %1746 = vrot.lane.b32.xlu1 %v1415_v14, %s4227_s29  ;;  %v3755_v14 = vld [vmem:[%s4301_s25 + $0x60] sm:$0xf] }
 0x12b   : > { %1744 = vrot.lane.b32.xlu0 %v1401_v18, %s4227_s29  ;;  %1742 = vrot.lane.b32.xlu2 %v1391_v22, %s4227_s29  ;;  %v1536_v18 = vshrl.u32 %v3756_v7, 16  ;;  %v1463_v22 = vsel %vm4312_vm2, %v1458_v6, %v4859_v33  ;;  %v1523_v26 = vshrl.u32 %v3755_v14, 16  ;;  %v1526_v27 = vshll.u32 %v3755_v14, 16  ;;  %v3760_v14 = vld [vmem:[%s4301_s25 + $0x74] sm:$0x1] }
 0x12c   : > { %v1036_v37 = vpop.permute.xlu1 %1035  ;;  %v1521_v33 = vsel %vm4312_vm2, %v1516_v19, %v1520_v20  ;;  %v1492_v40 = vrot.slane %v1491_v23, 4  ;;  %v1604_v19 = vshll.u32 %v3765_v5, 16  ;;  %v1608_v20 = vshrl.u32 %v3765_v5, 16 }
 0x12d   : > { %1106 = vst.msk [vmem:[#allocation2 + $0x68] sm:$0xf] %vm1079_vm8, %v1036_v37  ;;  %v1034_v41 = vpop.permute.xlu0 %1033  ;;  %v1180_v47 = vpop.permute.xlu2 %1179  ;;  %v1538_v31 = vrot.slane %v1536_v18, 4  ;;  %v1506_v37 = vrot.slane %v1505_v21, 4  ;;  %v1525_v42 = vrot.slane %v1523_v26, 4  ;;  %v1528_v43 = vrot.slane %v1526_v27, 5 }
 0x12e   : > { %1105 = vst.msk [vmem:[#allocation2 + $0x64] sm:$0xf] %vm1079_vm8, %v1034_v41  ;;  %v1496_v41 = vrot.slane %v1494_v24, 5  ;;  %v1622_v18 = vshll.u32 %v3767_v4, 16  ;;  %v1595_v21 = vshrl.u32 %v3764_v9, 16  ;;  %v1566_v26 = vshll.u32 %v3760_v14, 16 }
 0x12f   : > { %1275 = vst.msk [vmem:[#allocation2 + $0x4] sm:$0xf] %vm1273_vm9, %v1180_v47  ;;  %v1571_v47 = vshrl.u32 %v3761_v34, 16  ;;  %v1539_v51 = vor.u32 %v1538_v31, %v4897_v30  ;;  %v1511_v54 = vsel %vm4312_vm2, %v1506_v37, %v4872_v52  ;;  %v1621_v31 = vrot.slane %v1619_v17, 4  ;;  %v3771_v34 = vld [vmem:[%s4301_s25 + $0xa0] sm:$0xf] }
 0x130   : > { %v1497_v57 = vsel %vm4312_vm2, %v1492_v40, %v1496_v41  ;;  %v3768_v37 = vld [vmem:[%s4301_s25 + $0x94] sm:$0xf]  ;;  %v4942_v35 = vrot.slane %v1604_v19, 5  ;;  %v1597_v38 = vrot.slane %v1595_v21, 4  ;;  %v3766_v41 = vld [vmem:[%s4301_s25 + $0x8c] sm:$0x1] }
 0x131   : > { %v1573_v60 = vrot.slane %v1571_v47, 4  ;;  %v1540_v52 = vrot.slane %v1539_v51, 4  ;;  %v1656_v46 = vshrl.u32 %v3771_v34, 16  ;;  %v1628_v51 = vshll.u32 %v3768_v37, 16  ;;  %v3769_v14 = vld [vmem:[%s4301_s25 + $0x98] sm:$0x1] }
 0x132   : > { %1752 = vrot.lane.b32.xlu1 %v1449_v44, %s4227_s29 }
 0x133   : > { %1750 = vrot.lane.b32.xlu0 %v1439_v45, %s4227_s29  ;;  %1748 = vrot.lane.b32.xlu2 %v1425_v58, %s4227_s29  ;;  %v1580_v45 = vshll.u32 %v3762_v32, 16  ;;  %v1529_v58 = vor.u32 %v1528_v43, %v1525_v42  ;;  %v1624_v32 = vrot.slane %v1622_v18, 5  ;;  %v1568_v43 = vrot.slane %v1566_v26, 5 }
 0x134   : > { %v1042_v2 = vpop.permute.xlu1 %1041 }
 0x135   : > { %1109 = vst.msk [vmem:[#allocation2 + $0x74] sm:$0xf] %vm1079_vm8, %v1042_v2  ;;  %v1040_v8 = vpop.permute.xlu0 %1039  ;;  %v1186_v12 = vpop.permute.xlu2 %1185  ;;  %v4916_v55 = vrot.slane %v1580_v45, 5  ;;  %v3763_v2 = vld [vmem:[%s4301_s25 + $0x80] sm:$0x1]  ;;  %v1530_v7 = vrot.slane %v1529_v58, 4  ;;  %v1625_v50 = vor.u32 %v1624_v32, %v1621_v31 }
 0x136   : > { %1108 = vst.msk [vmem:[#allocation2 + $0x70] sm:$0xf] %vm1079_vm8, %v1040_v8  ;;  %v1562_v8 = vrot.slane %v1560_v56, 4  ;;  %v1590_v11 = vshll.u32 %v3763_v2, 16  ;;  %v1652_v45 = vshll.u32 %v3771_v34, 16  ;;  %v1614_v56 = vshll.u32 %v3766_v41, 16 }
 0x137   : > { %1278 = vst.msk [vmem:[#allocation2 + $0x10] sm:$0xf] %vm1273_vm9, %v1186_v12  ;;  %v1587_v10 = vor.u32 %v1586_v59, %v4916_v55  ;;  %v1577_v12 = vor.u32 %v1576_v61, %v1573_v60  ;;  %v1535_v23 = vsel %vm4312_vm2, %v1530_v7, %v4897_v30  ;;  %v1610_v30 = vrot.slane %v1608_v20, 4  ;;  %v3772_v60 = vld [vmem:[%s4301_s25 + $0xa4] sm:$0x1] }
 0x138   : > { %v1563_v24 = vor.u32 %v1562_v8, %v1558_v63  ;;  %v1592_v28 = vrot.slane %v1590_v11, 5  ;;  %v1632_v58 = vshrl.u32 %v3768_v37, 16  ;;  %v4958_v61 = vrot.slane %v1652_v45, 5  ;;  %v3777_v32 = vld [vmem:[%s4301_s25 + $0xb8] sm:$0xf] }
 0x139   : > { %v1588_v27 = vrot.slane %v1587_v10, 4  ;;  %v1578_v29 = vrot.slane %v1577_v12, 4  ;;  %v1616_v4 = vrot.slane %v1614_v56, 5  ;;  %v1662_v8 = vshll.u32 %v3772_v60, 16 }
 0x13a   : > { %1758 = vrot.lane.b32.xlu1 %v1487_v15, %s4227_s29  ;;  %v1559_v15 = vsel %vm4312_vm2, %v1554_v62, %v1558_v63  ;;  %v1564_v42 = vrot.slane %v1563_v24, 4  ;;  %v1658_v62 = vrot.slane %v1656_v46, 4  ;;  %v1634_v10 = vrot.slane %v1632_v58, 4 }
 0x13b   : > { %1756 = vrot.lane.b32.xlu0 %v1473_v16, %s4227_s29  ;;  %1754 = vrot.lane.b32.xlu2 %v1463_v22, %s4227_s29  ;;  %v1545_v16 = vsel %vm4312_vm2, %v1540_v52, %v1544_v0  ;;  %v1598_v22 = vshll.u32 %v3764_v9, 16  ;;  %v1593_v49 = vsel %vm4312_vm2, %v1588_v27, %v1592_v28  ;;  %v1583_v53 = vsel %vm4312_vm2, %v1578_v29, %v4916_v55  ;;  %v3774_v9 = vld [vmem:[%s4301_s25 + $0xac] sm:$0xf] }
 0x13c   : > { %v1178_v36 = vpop.permute.xlu1 %1177  ;;  %v1569_v59 = vsel %vm4312_vm2, %v1564_v42, %v1568_v43  ;;  %v1626_v55 = vrot.slane %v1625_v50, 4  ;;  %v1630_v0 = vrot.slane %v1628_v51, 5  ;;  %v1659_v11 = vor.u32 %v1658_v62, %v4958_v61 }
 0x13d   : > { %1274 = vst.msk [vmem:[#allocation2] sm:$0xf] %vm1273_vm9, %v1178_v36  ;;  %v1046_v39 = vpop.permute.xlu0 %1045  ;;  %v1192_v44 = vpop.permute.xlu2 %1191  ;;  %v3770_v36 = vld [vmem:[%s4301_s25 + $0x9c] sm:$0xf]  ;;  %v1676_v21 = vshll.u32 %v3774_v9, 16  ;;  %v1638_v24 = vshll.u32 %v3769_v14, 16 }
 0x13e   : > { %1111 = vst.msk [vmem:[#allocation2 + $0x7c] sm:$0xf] %vm1079_vm8, %v1046_v39  ;;  %v1600_v39 = vrot.slane %v1598_v22, 5  ;;  %v1643_v47 = vshrl.u32 %v3770_v36, 16  ;;  %v1646_v48 = vshll.u32 %v3770_v36, 16  ;;  %v1680_v22 = vshrl.u32 %v3774_v9, 16 }
 0x13f   : > { %1281 = vst.msk [vmem:[#allocation2 + $0x1c] sm:$0xf] %vm1273_vm9, %v1192_v44  ;;  %v1660_v28 = vrot.slane %v1659_v11, 4  ;;  %v1664_v29 = vrot.slane %v1662_v8, 5  ;;  %v1640_v42 = vrot.slane %v1638_v24, 5  ;;  %v1704_v58 = vshrl.u32 %v3777_v32, 16 }
 0x140   : > { %v1645_v63 = vrot.slane %v1643_v47, 4  ;;  %v1648_v52 = vrot.slane %v1646_v48, 5  ;;  %v3783_v24 = vld [vmem:[%s4301_s25 + $0x10] sm:$0xf] }
 0x141   : > { %v1665_v45 = vsel %vm4312_vm2, %v1660_v28, %v1664_v29  ;;  %v1706_v8 = vrot.slane %v1704_v58, 4 }
 0x142   : > { %1764 = vrot.lane.b32.xlu1 %v1521_v33, %s4227_s29  ;;  %v1649_v12 = vor.u32 %v1648_v52, %v1645_v63 }
 0x143   : > { %1762 = vrot.lane.b32.xlu0 %v1511_v54, %s4227_s29  ;;  %1760 = vrot.lane.b32.xlu2 %v1497_v57, %s4227_s29  ;;  %v1611_v54 = vor.u32 %v1610_v30, %v4942_v35  ;;  %v1601_v57 = vor.u32 %v1600_v39, %v1597_v38  ;;  %v1682_v30 = vrot.slane %v1680_v22, 4  ;;  %v3780_v38 = vld [vmem:[%s4301_s25 + $0xc4] sm:$0xf]  ;;  %v3779_v39 = vld [vmem:[%s4301_s25 + $0xc0] sm:$0xf] }
 0x144   : > { %v1184_v3 = vpop.permute.xlu1 %1183  ;;  %v1650_v31 = vrot.slane %v1649_v12, 4  ;;  %v1724_v50 = vshll.u32 %v3780_v38, 16  ;;  %v1728_v51 = vshrl.u32 %v3780_v38, 16  ;;  %v1715_v56 = vshrl.u32 %v3779_v39, 16 }
 0x145   : > { %1277 = vst.msk [vmem:[#allocation2 + $0xc] sm:$0xf] %vm1273_vm9, %v1184_v3  ;;  %v1182_v6 = vpop.permute.xlu0 %1181  ;;  %v1198_v13 = vpop.permute.xlu2 %1197  ;;  %v1612_v3 = vrot.slane %v1611_v54, 4  ;;  %v1602_v5 = vrot.slane %v1601_v57, 4  ;;  %v1718_v57 = vshll.u32 %v3779_v39, 16 }
 0x146   : > { %1276 = vst.msk [vmem:[#allocation2 + $0x8] sm:$0xf] %vm1273_vm9, %v1182_v6  ;;  %v3776_v6 = vld [vmem:[%s4301_s25 + $0xb4] sm:$0xf]  ;;  %v1655_v46 = vsel %vm4312_vm2, %v1650_v31, %v4958_v61  ;;  %v1726_v63 = vrot.slane %v1724_v50, 5  ;;  %v1730_v52 = vrot.slane %v1728_v51, 4 }
 0x147   : > { %1284 = vst.msk [vmem:[#allocation2 + $0x28] sm:$0xf] %vm1273_vm9, %v1198_v13  ;;  %v1691_v17 = vshrl.u32 %v3776_v6, 16  ;;  %v1694_v18 = vshll.u32 %v3776_v6, 16  ;;  %v1617_v19 = vsel %vm4312_vm2, %v1612_v3, %v1616_v4  ;;  %v1607_v20 = vsel %vm4312_vm2, %v1602_v5, %v4942_v35  ;;  %v3781_v3 = vld [vmem:[%s4301_s25 + $0xc8] sm:$0x1] }
 0x148   : > { %v1678_v35 = vrot.slane %v1676_v21, 5  ;;  %v1717_v4 = vrot.slane %v1715_v56, 4  ;;  %v1720_v5 = vrot.slane %v1718_v57, 5  ;;  %v1731_v12 = vor.u32 %v1730_v52, %v1726_v63  ;;  %v3788_v50 = vld [vmem:[%s4301_s25 + $0x24] sm:$0xe] }
 0x149   : > { %v1693_v34 = vrot.slane %v1691_v17, 4  ;;  %v1696_v36 = vrot.slane %v1694_v18, 5  ;;  %v3832_v58 = vrot.slane %v3788_v50, 9 }
 0x14a   : > { %1770 = vrot.lane.b32.xlu1 %v1559_v15, %s4227_s29  ;;  %v3773_v15 = vld [vmem:[%s4301_s25 + $0xa8] sm:$0xf] }
 0x14b   : > { %1768 = vrot.lane.b32.xlu0 %v1545_v16, %s4227_s29  ;;  %1766 = vrot.lane.b32.xlu2 %v1535_v23, %s4227_s29  ;;  %v1631_v16 = vsel %vm4312_vm2, %v1626_v55, %v1630_v0  ;;  %v1635_v23 = vor.u32 %v1634_v10, %v1630_v0  ;;  %v1667_v26 = vshrl.u32 %v3773_v15, 16  ;;  %v1670_v27 = vshll.u32 %v3773_v15, 16  ;;  %v3778_v10 = vld [vmem:[%s4301_s25 + $0xbc] sm:$0x1] }
 0x14c   : > { %v1190_v33 = vpop.permute.xlu1 %1189  ;;  %v1697_v48 = vor.u32 %v1696_v36, %v1693_v34  ;;  %v1721_v15 = vor.u32 %v1720_v5, %v1717_v4  ;;  %v1710_v18 = vshll.u32 %v3778_v10, 16  ;;  %v3786_v34 = vld [vmem:[%s4301_s25 + $0x1c] sm:$0xf]  ;;  %v1965_v36 = vrot.slane %v3783_v24, 5  ;;  %v3793_v4 = vld [vmem:[%s4301_s25 + $0x38] sm:$0x1] }
 0x14d   : > { %1280 = vst.msk [vmem:[#allocation2 + $0x18] sm:$0xf] %vm1273_vm9, %v1190_v33  ;;  %v1188_v40 = vpop.permute.xlu0 %1187  ;;  %v1204_v44 = vpop.permute.xlu2 %1203  ;;  %v3775_v33 = vld [vmem:[%s4301_s25 + $0xb0] sm:$0x1]  ;;  %v1636_v41 = vrot.slane %v1635_v23, 4  ;;  %v1669_v43 = vrot.slane %v1667_v26, 4 }
 0x14e   : > { %1279 = vst.msk [vmem:[#allocation2 + $0x14] sm:$0xf] %vm1273_vm9, %v1188_v40  ;;  %v1686_v54 = vshll.u32 %v3775_v33, 16  ;;  %v1698_v61 = vrot.slane %v1697_v48, 4  ;;  %v1722_v22 = vrot.slane %v1721_v15, 4  ;;  %v1972_v38 = vrot.slane %v3786_v34, 5 }
 0x14f   : > { %1287 = vst.msk [vmem:[#allocation2 + $0x34] sm:$0xf] %vm1273_vm9, %v1204_v44  ;;  %v1672_v44 = vrot.slane %v1670_v27, 5  ;;  %v1712_v27 = vrot.slane %v1710_v18, 5  ;;  %v3784_v33 = vld [vmem:[%s4301_s25 + $0x14] sm:$0x1] }
 0x150   : > { %v1727_v31 = vsel %vm4312_vm2, %v1722_v22, %v1726_v63  ;;  %v3796_v22 = vld [vmem:[%s4301_s25 + $0x44] sm:$0x1] }
 0x151   : > { %v1673_v60 = vor.u32 %v1672_v44, %v1669_v43 }
 0x152   : > { %1776 = vrot.lane.b32.xlu1 %v1593_v49, %s4227_s29  ;;  %v1700_v49 = vshll.u32 %v3777_v32, 16  ;;  %v3785_v32 = vld [vmem:[%s4301_s25 + $0x18] sm:$0xe] }
 0x153   : > { %1774 = vrot.lane.b32.xlu0 %v1583_v53, %s4227_s29  ;;  %1772 = vrot.lane.b32.xlu2 %v1569_v59, %s4227_s29  ;;  %v1683_v53 = vor.u32 %v1682_v30, %v1678_v35  ;;  %v1641_v59 = vsel %vm4312_vm2, %v1636_v41, %v1640_v42  ;;  %v3831_v30 = vrot.slane %v3785_v32, 9  ;;  %v1968_v41 = vrot.slane %v3784_v33, 5  ;;  %v3789_v42 = vld [vmem:[%s4301_s25 + $0x28] sm:$0xf] }
 0x154   : > { %v1196_v2 = vpop.permute.xlu1 %1195  ;;  %v1702_v62 = vrot.slane %v1700_v49, 5  ;;  %v3790_v49 = vld [vmem:[%s4301_s25 + $0x2c] sm:$0x1]  ;;  %v1996_v32 = vrot.slane %v3796_v22, 5 }
 0x155   : > { %1283 = vst.msk [vmem:[#allocation2 + $0x24] sm:$0xf] %vm1273_vm9, %v1196_v2  ;;  %v1194_v7 = vpop.permute.xlu0 %1193  ;;  %v1210_v13 = vpop.permute.xlu2 %1209  ;;  %v1684_v0 = vrot.slane %v1683_v53, 4  ;;  %v1688_v2 = vrot.slane %v1686_v54, 5  ;;  %v3787_v53 = vld [vmem:[%s4301_s25 + $0x20] sm:$0x1] }
 0x156   : > { %1282 = vst.msk [vmem:[#allocation2 + $0x20] sm:$0xf] %vm1273_vm9, %v1194_v7  ;;  %v1674_v7 = vrot.slane %v1673_v60, 4  ;;  %v1703_v11 = vsel %vm4312_vm2, %v1698_v61, %v1702_v62  ;;  %v1707_v17 = vor.u32 %v1706_v8, %v1702_v62  ;;  %v1982_v56 = vrot.slane %v3790_v49, 5  ;;  %v3792_v60 = vld [vmem:[%s4301_s25 + $0x34] sm:$0xf] }
 0x157   : > { %1290 = vst.msk [vmem:[#allocation2 + $0x40] sm:$0xf] %vm1273_vm9, %v1210_v13  ;;  %v1734_v13 = vshll.u32 %v3781_v3, 16  ;;  %v1689_v14 = vsel %vm4312_vm2, %v1684_v0, %v1688_v2  ;;  %v1974_v61 = vrot.slane %v1972_v38, 4  ;;  %v1975_v62 = vrot.slane %v3787_v53, 5 }
 0x158   : > { %v1708_v26 = vrot.slane %v1707_v17, 4  ;;  %v3794_v0 = vld [vmem:[%s4301_s25 + $0x3c] sm:$0xe]  ;;  %v3795_v2 = vld [vmem:[%s4301_s25 + $0x40] sm:$0xf]  ;;  %v1986_v3 = vrot.slane %v3792_v60, 5 }
 0x159   : > { %v1976_v5 = vsel %vm4487_vm6, %v1974_v61, %v1975_v62  ;;  %v1993_v8 = vrot.slane %v3795_v2, 5 }
 0x15a   : > { %1782 = vrot.lane.b32.xlu1 %v1631_v16, %s4227_s29  ;;  %v1679_v16 = vsel %vm4312_vm2, %v1674_v7, %v1678_v35  ;;  %v3782_v35 = vld [vmem:[%s4301_s25 + $0xc] sm:$0xe]  ;;  %v3834_v7 = vrot.slane %v3794_v0, 9  ;;  %v1988_v10 = vrot.slane %v1986_v3, 4 }
 0x15b   : > { %1780 = vrot.lane.b32.xlu0 %v1617_v19, %s4227_s29  ;;  %1778 = vrot.lane.b32.xlu2 %v1607_v20, %s4227_s29  ;;  %v1732_v19 = vrot.slane %v1731_v12, 4  ;;  %v1736_v20 = vrot.slane %v1734_v13, 5  ;;  %v3830_v44 = vrot.slane %v3782_v35, 9  ;;  %v3798_v12 = vld [vmem:[%s4301_s25 + $0x4c] sm:$0xf] }
 0x15c   : > { %v1202_v37 = vpop.permute.xlu1 %1201  ;;  %v2000_v17 = vrot.slane %v3798_v12, 5  ;;  %v3804_v35 = vld [vmem:[%s4301_s25 + $0x64] sm:$0xf] }
 0x15d   : > { %1286 = vst.msk [vmem:[#allocation2 + $0x30] sm:$0xf] %vm1273_vm9, %v1202_v37  ;;  %v1200_v40 = vpop.permute.xlu0 %1199  ;;  %v1216_v47 = vpop.permute.xlu2 %1215  ;;  %v1737_v29 = vsel %vm4312_vm2, %v1732_v19, %v1736_v20  ;;  %v1713_v37 = vsel %vm4312_vm2, %v1708_v26, %v1712_v27  ;;  %v1966_v51 = vsel %vm4487_vm6, %v3830_v44, %v1965_v36  ;;  %v3799_v19 = vld [vmem:[%s4301_s25 + $0x50] sm:$0x1]  ;;  %v3797_v20 = vld [vmem:[%s4301_s25 + $0x48] sm:$0xe] }
 0x15e   : > { %1285 = vst.msk [vmem:[#allocation2 + $0x2c] sm:$0xf] %vm1273_vm9, %v1200_v40  ;;  %v1967_v40 = vrot.slane %v1965_v36, 4  ;;  %v2003_v24 = vrot.slane %v3799_v19, 5  ;;  %v3835_v27 = vrot.slane %v3797_v20, 9 }
 0x15f   : > { %1293 = vst.msk [vmem:[#allocation2 + $0x4c] sm:$0xf] %vm1273_vm9, %v1216_v47  ;;  %v1979_v47 = vrot.slane %v3789_v42, 5  ;;  %v2014_v42 = vrot.slane %v3804_v35, 5 }
 0x160   : > { %v1969_v48 = vsel %vm4487_vm6, %v1967_v40, %v1968_v41  ;;  %v2001_v33 = vsel %vm4487_vm6, %v3835_v27, %v2000_v17  ;;  %v3800_v40 = vld [vmem:[%s4301_s25 + $0x54] sm:$0xe]  ;;  %v3814_v27 = vld [vmem:[%s4301_s25 + $0x8c] sm:$0x1] }
 0x161   : > { %v1981_v54 = vrot.slane %v1979_v47, 4 }
 0x162   : > { %1788 = vrot.lane.b32.xlu1 %v1665_v45, %s4227_s29 }
 0x163   : > { %1786 = vrot.lane.b32.xlu0 %v1655_v46, %s4227_s29  ;;  %1784 = vrot.lane.b32.xlu2 %v1641_v59, %s4227_s29  ;;  %v1973_v46 = vsel %vm4487_vm6, %v3831_v30, %v1972_v38  ;;  %v1983_v52 = vsel %vm4487_vm6, %v1981_v54, %v1982_v56  ;;  %v3802_v38 = vld [vmem:[%s4301_s25 + $0x5c] sm:$0x1]  ;;  %v3808_v54 = vld [vmem:[%s4301_s25 + $0x74] sm:$0x1] }
 0x164   : > { %v1208_v55 = vpop.permute.xlu1 %1207  ;;  %v3806_v56 = vld [vmem:[%s4301_s25 + $0x6c] sm:$0xe]  ;;  %v2024_v60 = vrot.slane %v3808_v54, 5 }
 0x165   : > { %1289 = vst.msk [vmem:[#allocation2 + $0x3c] sm:$0xf] %vm1273_vm9, %v1208_v55  ;;  %v1206_v6 = vpop.permute.xlu0 %1205  ;;  %v1222_v9 = vpop.permute.xlu2 %1221  ;;  %v1980_v55 = vsel %vm4487_vm6, %v3832_v58, %v1979_v47  ;;  %v3805_v58 = vld [vmem:[%s4301_s25 + $0x68] sm:$0x1]  ;;  %v3838_v62 = vrot.slane %v3806_v56, 9 }
 0x166   : > { %1288 = vst.msk [vmem:[#allocation2 + $0x38] sm:$0xf] %vm1273_vm9, %v1206_v6  ;;  %v3791_v6 = vld [vmem:[%s4301_s25 + $0x30] sm:$0xe]  ;;  %v2017_v0 = vrot.slane %v3805_v58, 5 }
 0x167   : > { %1296 = vst.msk [vmem:[#allocation2 + $0x58] sm:$0xf] %vm1273_vm9, %v1222_v9 }
 0x16a   : > { %1794 = vrot.lane.b32.xlu1 %v1703_v11, %s4227_s29  ;;  %v1989_v11 = vrot.slane %v3793_v4, 5 }
 0x16b   : > { %1792 = vrot.lane.b32.xlu0 %v1689_v14, %s4227_s29  ;;  %1790 = vrot.lane.b32.xlu2 %v1679_v16, %s4227_s29  ;;  %v3833_v14 = vrot.slane %v3791_v6, 9  ;;  %v1994_v16 = vsel %vm4487_vm6, %v3834_v7, %v1993_v8  ;;  %v3813_v6 = vld [vmem:[%s4301_s25 + $0x88] sm:$0xf] }
 0x16c   : > { %v1214_v21 = vpop.permute.xlu1 %1213  ;;  %v1990_v18 = vsel %vm4487_vm6, %v1988_v10, %v1989_v11  ;;  %v3809_v10 = vld [vmem:[%s4301_s25 + $0x78] sm:$0xe]  ;;  %v2035_v12 = vrot.slane %v3813_v6, 5 }
 0x16d   : > { %1292 = vst.msk [vmem:[#allocation2 + $0x48] sm:$0xf] %vm1273_vm9, %v1214_v21  ;;  %v1212_v23 = vpop.permute.xlu0 %1211  ;;  %v1228_v28 = vpop.permute.xlu2 %1227  ;;  %v1987_v21 = vsel %vm4487_vm6, %v3833_v14, %v1986_v3 }
 0x16e   : > { %1291 = vst.msk [vmem:[#allocation2 + $0x44] sm:$0xf] %vm1273_vm9, %v1212_v23  ;;  %v2002_v23 = vrot.slane %v2000_v17, 4 }
 0x16f   : > { %1299 = vst.msk [vmem:[#allocation2 + $0x64] sm:$0xf] %vm1273_vm9, %v1228_v28 }
 0x170   : > { %v2004_v36 = vsel %vm4487_vm6, %v2002_v23, %v2003_v24  ;;  %v3817_v23 = vld [vmem:[%s4301_s25 + $0x98] sm:$0x1]  ;;  %v3815_v24 = vld [vmem:[%s4301_s25 + $0x90] sm:$0xe] }
 0x172   : > { %1800 = vrot.lane.b32.xlu1 %v1737_v29, %s4227_s29  ;;  %v3801_v29 = vld [vmem:[%s4301_s25 + $0x58] sm:$0xf] }
 0x173   : > { %1798 = vrot.lane.b32.xlu0 %v1727_v31, %s4227_s29  ;;  %1796 = vrot.lane.b32.xlu2 %v1713_v37, %s4227_s29  ;;  %v1995_v31 = vrot.slane %v1993_v8, 4  ;;  %v3803_v37 = vld [vmem:[%s4301_s25 + $0x60] sm:$0xe]  ;;  %v2007_v30 = vrot.slane %v3801_v29, 5  ;;  %v3811_v8 = vld [vmem:[%s4301_s25 + $0x80] sm:$0x1] }
 0x174   : > { %v1220_v39 = vpop.permute.xlu1 %1219  ;;  %v3837_v41 = vrot.slane %v3803_v37, 9  ;;  %v2045_v29 = vrot.slane %v3817_v23, 5  ;;  %v2038_v37 = vrot.slane %v3814_v27, 5  ;;  %v3848_v27 = vld [vmem:[%s4301_s25 + $0x24] sm:$0xf]  ;;  %s3615_s29 = sshll.u32 %s5694_s23, 4  ;;  %s3616_s29 = int_to_ptr.vmem [resolvable:$true] %s3615_s29 }
 0x175   : > { %1295 = vst.msk [vmem:[#allocation2 + $0x54] sm:$0xf] %vm1273_vm9, %v1220_v39  ;;  %v1218_v43 = vpop.permute.xlu0 %1217  ;;  %v1234_v45 = vpop.permute.xlu2 %1233  ;;  %v1997_v39 = vsel %vm4487_vm6, %v1995_v31, %v1996_v32  ;;  %v2009_v44 = vrot.slane %v2007_v30, 4  ;;  %v3841_v32 = vrot.slane %v3815_v24, 9 }
 0x176   : > { %1294 = vst.msk [vmem:[#allocation2 + $0x50] sm:$0xf] %vm1273_vm9, %v1218_v43  ;;  %v2015_v50 = vsel %vm4487_vm6, %v3837_v41, %v2014_v42 }
 0x177   : > { %1302 = vst.msk [vmem:[#allocation2 + $0x70] sm:$0xf] %vm1273_vm9, %v1234_v45  ;;  %v2010_v45 = vrot.slane %v3802_v38, 5 }
 0x179   : > { %v2011_v53 = vsel %vm4487_vm6, %v2009_v44, %v2010_v45  ;;  %v3818_v44 = vld [vmem:[%s4301_s25 + $0x9c] sm:$0xe] }
 0x17a   : > { %2079 = vrot.lane.b32.xlu1 %v1973_v46, %s4228_s30  ;;  %v3807_v46 = vld [vmem:[%s4301_s25 + $0x70] sm:$0xf] }
 0x17b   : > { %2077 = vrot.lane.b32.xlu0 %v1969_v48, %s4228_s30  ;;  %2075 = vrot.lane.b32.xlu2 %v1966_v51, %s4228_s30  ;;  %v3836_v48 = vrot.slane %v3800_v40, 9  ;;  %v2021_v51 = vrot.slane %v3807_v46, 5  ;;  %v3822_v40 = vld [vmem:[%s4301_s25 + $0xac] sm:$0xf] }
 0x17c   : > { %v1226_v57 = vpop.permute.xlu1 %1225  ;;  %v2056_v46 = vrot.slane %v3822_v40, 5  ;;  %v3853_v40 = vld [vmem:[%s4301_s25 + $0x40] sm:$0xf] }
 0x17d   : > { %1298 = vst.msk [vmem:[#allocation2 + $0x60] sm:$0xf] %vm1273_vm9, %v1226_v57  ;;  %v1224_v59 = vpop.permute.xlu0 %1223  ;;  %v1240_v63 = vpop.permute.xlu2 %1239  ;;  %v2008_v57 = vsel %vm4487_vm6, %v3836_v48, %v2007_v30  ;;  %v2022_v4 = vsel %vm4487_vm6, %v3838_v62, %v2021_v51  ;;  %v3823_v62 = vld [vmem:[%s4301_s25 + $0xb0] sm:$0x1] }
 0x17e   : > { %1297 = vst.msk [vmem:[#allocation2 + $0x5c] sm:$0xf] %vm1273_vm9, %v1224_v59  ;;  %v2023_v59 = vrot.slane %v2021_v51, 4 }
 0x17f   : > { %1305 = vst.msk [vmem:[#allocation2 + $0x7c] sm:$0xf] %vm1273_vm9, %v1240_v63 }
 0x180   : > { %v2025_v3 = vsel %vm4487_vm6, %v2023_v59, %v2024_v60  ;;  %v3826_v59 = vld [vmem:[%s4301_s25 + $0xbc] sm:$0x1]  ;;  %v3824_v60 = vld [vmem:[%s4301_s25 + $0xb4] sm:$0xe] }
 0x182   : > { %2085 = vrot.lane.b32.xlu1 %v1983_v52, %s4228_s30  ;;  %v3810_v52 = vld [vmem:[%s4301_s25 + $0x7c] sm:$0xf] }
 0x183   : > { %2083 = vrot.lane.b32.xlu0 %v1980_v55, %s4228_s30  ;;  %2081 = vrot.lane.b32.xlu2 %v1976_v5, %s4228_s30  ;;  %v2016_v55 = vrot.slane %v2014_v42, 4  ;;  %v3812_v5 = vld [vmem:[%s4301_s25 + $0x84] sm:$0xe]  ;;  %v2028_v7 = vrot.slane %v3810_v52, 5  ;;  %v3820_v42 = vld [vmem:[%s4301_s25 + $0xa4] sm:$0x1] }
 0x184   : > { %v1232_v9 = vpop.permute.xlu1 %1231  ;;  %v3840_v11 = vrot.slane %v3812_v5, 9  ;;  %v2066_v52 = vrot.slane %v3826_v59, 5  ;;  %v2059_v5 = vrot.slane %v3823_v62, 5 }
 0x185   : > { %1301 = vst.msk [vmem:[#allocation2 + $0x6c] sm:$0xf] %vm1273_vm9, %v1232_v9  ;;  %v1230_v13 = vpop.permute.xlu0 %1229  ;;  %v1743_v15 = vpop.permute.xlu2 %1742  ;;  %v2018_v9 = vsel %vm4487_vm6, %v2016_v55, %v2017_v0  ;;  %v2030_v14 = vrot.slane %v2028_v7, 4  ;;  %v3844_v0 = vrot.slane %v3824_v60, 9  ;;  %v3859_v60 = vld [vmem:[%s4301_s25 + $0x64] sm:$0xf] }
 0x186   : > { %1300 = vst.msk [vmem:[#allocation2 + $0x68] sm:$0xf] %vm1273_vm9, %v1230_v13  ;;  %v2036_v20 = vsel %vm4487_vm6, %v3840_v11, %v2035_v12 }
 0x187   : > { %1837 = vst.msk [vmem:[#allocation2 + $0x8] sm:$0xf] %vm1834_vm10, %v1743_v15  ;;  %v2031_v15 = vrot.slane %v3811_v8, 5 }
 0x189   : > { %v2032_v22 = vsel %vm4487_vm6, %v2030_v14, %v2031_v15 }
 0x18a   : > { %2091 = vrot.lane.b32.xlu1 %v1994_v16, %s4228_s30  ;;  %v3816_v16 = vld [vmem:[%s4301_s25 + $0x94] sm:$0xf] }
 0x18b   : > { %2089 = vrot.lane.b32.xlu0 %v1990_v18, %s4228_s30  ;;  %2087 = vrot.lane.b32.xlu2 %v1987_v21, %s4228_s30  ;;  %v3839_v18 = vrot.slane %v3809_v10, 9  ;;  %v2042_v21 = vrot.slane %v3816_v16, 5  ;;  %v3829_v10 = vld [vmem:[%s4301_s25 + $0xc8] sm:$0x1] }
 0x18c   : > { %v1238_v26 = vpop.permute.xlu1 %1237  ;;  %v2073_v15 = vrot.slane %v3829_v10, 5 }
 0x18d   : > { %1304 = vst.msk [vmem:[#allocation2 + $0x78] sm:$0xf] %vm1273_vm9, %v1238_v26  ;;  %v1236_v28 = vpop.permute.xlu0 %1235  ;;  %v1749_v34 = vpop.permute.xlu2 %1748  ;;  %v2029_v26 = vsel %vm4487_vm6, %v3839_v18, %v2028_v7  ;;  %v2043_v38 = vsel %vm4487_vm6, %v3841_v32, %v2042_v21 }
 0x18e   : > { %1303 = vst.msk [vmem:[#allocation2 + $0x74] sm:$0xf] %vm1273_vm9, %v1236_v28  ;;  %v2044_v28 = vrot.slane %v2042_v21, 4 }
 0x18f   : > { %1840 = vst.msk [vmem:[#allocation2 + $0x14] sm:$0xf] %vm1834_vm10, %v1749_v34 }
 0x190   : > { %v2046_v30 = vsel %vm4487_vm6, %v2044_v28, %v2045_v29  ;;  %v3847_v28 = vld [vmem:[%s4301_s25 + $0x1c] sm:$0xf] }
 0x192   : > { %2097 = vrot.lane.b32.xlu1 %v2004_v36, %s4228_s30  ;;  %v3819_v36 = vld [vmem:[%s4301_s25 + $0xa0] sm:$0xf] }
 0x193   : > { %2095 = vrot.lane.b32.xlu0 %v2001_v33, %s4228_s30  ;;  %2093 = vrot.lane.b32.xlu2 %v1997_v39, %s4228_s30  ;;  %v2037_v33 = vrot.slane %v2035_v12, 4  ;;  %v3821_v39 = vld [vmem:[%s4301_s25 + $0xa8] sm:$0xe]  ;;  %v2049_v41 = vrot.slane %v3819_v36, 5  ;;  %v3827_v12 = vld [vmem:[%s4301_s25 + $0xc0] sm:$0xe] }
 0x194   : > { %v1741_v43 = vpop.permute.xlu1 %1740  ;;  %v3843_v45 = vrot.slane %v3821_v39, 9  ;;  %v3851_v36 = vld [vmem:[%s4301_s25 + $0x34] sm:$0xf]  ;;  %v3854_v39 = vld [vmem:[%s4301_s25 + $0x48] sm:$0xf] }
 0x195   : > { %1836 = vst.msk [vmem:[#allocation2 + $0x4] sm:$0xf] %vm1834_vm10, %v1741_v43  ;;  %v1739_v47 = vpop.permute.xlu0 %1738  ;;  %v1755_v49 = vpop.permute.xlu2 %1754  ;;  %v2039_v43 = vsel %vm4487_vm6, %v2037_v33, %v2038_v37  ;;  %v2051_v48 = vrot.slane %v2049_v41, 4  ;;  %v3850_v33 = vld [vmem:[%s4301_s25 + $0x30] sm:$0xf] }
 0x196   : > { %1835 = vst.msk [vmem:[#allocation2] sm:$0xf] %vm1834_vm10, %v1739_v47  ;;  %v2057_v56 = vsel %vm4487_vm6, %v3843_v45, %v2056_v46  ;;  %v3857_v45 = vld [vmem:[%s4301_s25 + $0x58] sm:$0xf] }
 0x197   : > { %1843 = vst.msk [vmem:[#allocation2 + $0x20] sm:$0xf] %vm1834_vm10, %v1755_v49  ;;  %v2052_v49 = vrot.slane %v3820_v42, 5 }
 0x199   : > { %v2053_v58 = vsel %vm4487_vm6, %v2051_v48, %v2052_v49  ;;  %v3903_v48 = vld [vmem:[%s4301_s25 + $0x7c] sm:$0xf] }
 0x19a   : > { %2103 = vrot.lane.b32.xlu1 %v2015_v50, %s4228_s30  ;;  %v3825_v50 = vld [vmem:[%s4301_s25 + $0xb8] sm:$0xf] }
 0x19b   : > { %2101 = vrot.lane.b32.xlu0 %v2011_v53, %s4228_s30  ;;  %2099 = vrot.lane.b32.xlu2 %v2008_v57, %s4228_s30  ;;  %v3842_v53 = vrot.slane %v3818_v44, 9  ;;  %v2063_v57 = vrot.slane %v3825_v50, 5  ;;  %v3858_v44 = vld [vmem:[%s4301_s25 + $0x60] sm:$0xf]  ;;  %v3902_v50 = vld [vmem:[%s4301_s25 + $0x78] sm:$0xf] }
 0x19c   : > { %v1747_v61 = vpop.permute.xlu1 %1746  ;;  %v2642_v59 = vshll.u32 %v3902_v50, 16 }
 0x19d   : > { %1839 = vst.msk [vmem:[#allocation2 + $0x10] sm:$0xf] %vm1834_vm10, %v1747_v61  ;;  %v1745_v63 = vpop.permute.xlu0 %1744  ;;  %v1761_v2 = vpop.permute.xlu2 %1760  ;;  %v2050_v61 = vsel %vm4487_vm6, %v3842_v53, %v2049_v41  ;;  %v2064_v8 = vsel %vm4487_vm6, %v3844_v0, %v2063_v57  ;;  %v3861_v53 = vld [vmem:[%s4301_s25 + $0x70] sm:$0xf] }
 0x19e   : > { %1838 = vst.msk [vmem:[#allocation2 + $0xc] sm:$0xf] %vm1834_vm10, %v1745_v63  ;;  %v2065_v63 = vrot.slane %v2063_v57, 4  ;;  %v3860_v57 = vld [vmem:[%s4301_s25 + $0x6c] sm:$0xf]  ;;  %v2644_v0 = vrot.slane %v2642_v59, 5 }
 0x19f   : > { %1846 = vst.msk [vmem:[#allocation2 + $0x2c] sm:$0xf] %vm1834_vm10, %v1761_v2 }
 0x1a0   : > { %v2067_v7 = vsel %vm4487_vm6, %v2065_v63, %v2066_v52  ;;  %v3904_v52 = vld [vmem:[%s4301_s25 + $0x80] sm:$0x1] }
 0x1a2   : > { %2109 = vrot.lane.b32.xlu1 %v2025_v3, %s4228_s30  ;;  %v3828_v3 = vld [vmem:[%s4301_s25 + $0xc4] sm:$0xf] }
 0x1a3   : > { %2107 = vrot.lane.b32.xlu0 %v2022_v4, %s4228_s30  ;;  %2105 = vrot.lane.b32.xlu2 %v2018_v9, %s4228_s30  ;;  %v2058_v4 = vrot.slane %v2056_v46, 4  ;;  %v2070_v9 = vrot.slane %v3828_v3, 5  ;;  %v3856_v46 = vld [vmem:[%s4301_s25 + $0x54] sm:$0xf]  ;;  %v3915_v3 = vld [vmem:[%s4301_s25 + $0xac] sm:$0xf] }
 0x1a4   : > { %v1753_v13 = vpop.permute.xlu1 %1752 }
 0x1a5   : > { %1842 = vst.msk [vmem:[#allocation2 + $0x1c] sm:$0xf] %vm1834_vm10, %v1753_v13  ;;  %v1751_v17 = vpop.permute.xlu0 %1750  ;;  %v1767_v19 = vpop.permute.xlu2 %1766  ;;  %v2060_v11 = vsel %vm4487_vm6, %v2058_v4, %v2059_v5  ;;  %v2072_v14 = vrot.slane %v2070_v9, 4  ;;  %v3914_v5 = vld [vmem:[%s4301_s25 + $0xa8] sm:$0xf] }
 0x1a6   : > { %1841 = vst.msk [vmem:[#allocation2 + $0x18] sm:$0xf] %vm1834_vm10, %v1751_v17  ;;  %v3845_v17 = vrot.slane %v3827_v12, 9  ;;  %v2748_v12 = vshrl.u32 %v3915_v3, 16 }
 0x1a7   : > { %1849 = vst.msk [vmem:[#allocation2 + $0x38] sm:$0xf] %vm1834_vm10, %v1767_v19  ;;  %v3846_v19 = vld [vmem:[%s4301_s25 + $0x18] sm:$0xf] }
 0x1a8   : > { %v2071_v21 = vsel %vm4487_vm6, %v3845_v17, %v2070_v9  ;;  %v3863_v9 = vld [vmem:[%s4301_s25 + $0x7c] sm:$0xf] }
 0x1aa   : > { %2115 = vrot.lane.b32.xlu1 %v2036_v20, %s4228_s30  ;;  %v2074_v20 = vsel %vm4487_vm6, %v2072_v14, %v2073_v15  ;;  %v2735_v14 = vshrl.u32 %v3914_v5, 16  ;;  %v2738_v15 = vshll.u32 %v3914_v5, 16  ;;  %v3880_v5 = vld [vmem:[%s4301_s25 + $0x20] sm:$0x1] }
 0x1ab   : > { %2113 = vrot.lane.b32.xlu0 %v2032_v22, %s4228_s30  ;;  %2111 = vrot.lane.b32.xlu2 %v2029_v26, %s4228_s30  ;;  %v3849_v26 = vld [vmem:[%s4301_s25 + $0x28] sm:$0xf] }
 0x1ac   : > { %v1759_v31 = vpop.permute.xlu1 %1758 }
 0x1ad   : > { %1845 = vst.msk [vmem:[#allocation2 + $0x28] sm:$0xf] %vm1834_vm10, %v1759_v31  ;;  %v1757_v34 = vpop.permute.xlu0 %1756  ;;  %v1773_v35 = vpop.permute.xlu2 %1772 }
 0x1ae   : > { %1844 = vst.msk [vmem:[#allocation2 + $0x24] sm:$0xf] %vm1834_vm10, %v1757_v34  ;;  %v3852_v34 = vld [vmem:[%s4301_s25 + $0x3c] sm:$0xf] }
 0x1af   : > { %1852 = vst.msk [vmem:[#allocation2 + $0x44] sm:$0xf] %vm1834_vm10, %v1773_v35 }
 0x1b2   : > { %2121 = vrot.lane.b32.xlu1 %v2046_v30, %s4228_s30 }
 0x1b3   : > { %2119 = vrot.lane.b32.xlu0 %v2043_v38, %s4228_s30  ;;  %2117 = vrot.lane.b32.xlu2 %v2039_v43, %s4228_s30  ;;  %v3855_v38 = vld [vmem:[%s4301_s25 + $0x4c] sm:$0xf] }
 0x1b4   : > { %v1765_v47 = vpop.permute.xlu1 %1764 }
 0x1b5   : > { %1848 = vst.msk [vmem:[#allocation2 + $0x34] sm:$0xf] %vm1834_vm10, %v1765_v47  ;;  %v1763_v51 = vpop.permute.xlu0 %1762  ;;  %v1779_v54 = vpop.permute.xlu2 %1778 }
 0x1b6   : > { %1847 = vst.msk [vmem:[#allocation2 + $0x30] sm:$0xf] %vm1834_vm10, %v1763_v51 }
 0x1b7   : > { %1855 = vst.msk [vmem:[#allocation2 + $0x50] sm:$0xf] %vm1834_vm10, %v1779_v54  ;;  %v2648_v54 = vshll.u32 %v3903_v48, 16 }
 0x1ba   : > { %2127 = vrot.lane.b32.xlu1 %v2057_v56, %s4228_s30  ;;  %v2652_v56 = vshrl.u32 %v3903_v48, 16  ;;  %v3878_v48 = vld [vmem:[%s4301_s25 + $0x18] sm:$0xf] }
 0x1bb   : > { %2125 = vrot.lane.b32.xlu0 %v2053_v58, %s4228_s30  ;;  %2123 = vrot.lane.b32.xlu2 %v2050_v61, %s4228_s30  ;;  %v2639_v58 = vshrl.u32 %v3902_v50, 16  ;;  %v2650_v61 = vrot.slane %v2648_v54, 5 }
 0x1bc   : > { %v1771_v55 = vpop.permute.xlu1 %1770  ;;  %v2654_v62 = vrot.slane %v2652_v56, 4  ;;  %v3962_v56 = vld [vmem:[%s4301_s25 + $0xa8] sm:$0xe] }
 0x1bd   : > { %1851 = vst.msk [vmem:[#allocation2 + $0x40] sm:$0xf] %vm1834_vm10, %v1771_v55  ;;  %v1769_v2 = vpop.permute.xlu0 %1768  ;;  %v1785_v6 = vpop.permute.xlu2 %1784  ;;  %v2641_v55 = vrot.slane %v2639_v58, 4 }
 0x1be   : > { %1850 = vst.msk [vmem:[#allocation2 + $0x3c] sm:$0xf] %vm1834_vm10, %v1769_v2 }
 0x1bf   : > { %1858 = vst.msk [vmem:[#allocation2 + $0x5c] sm:$0xf] %vm1834_vm10, %v1785_v6  ;;  %v3870_v6 = vld [vmem:[%s4301_s25 + $0xa8] sm:$0xf]  ;;  %v2645_v10 = vor.u32 %v2644_v0, %v2641_v55  ;;  %v3986_v55 = vrot.slane %v3962_v56, 9 }
 0x1c2   : > { %2133 = vrot.lane.b32.xlu1 %v2067_v7, %s4228_s30  ;;  %v2655_v7 = vor.u32 %v2654_v62, %v2650_v61 }
 0x1c3   : > { %2131 = vrot.lane.b32.xlu0 %v2064_v8, %s4228_s30  ;;  %2129 = vrot.lane.b32.xlu2 %v2060_v11, %s4228_s30  ;;  %v2658_v8 = vshll.u32 %v3904_v52, 16  ;;  %v2744_v11 = vshll.u32 %v3915_v3, 16 }
 0x1c4   : > { %v1777_v13 = vpop.permute.xlu1 %1776 }
 0x1c5   : > { %1854 = vst.msk [vmem:[#allocation2 + $0x4c] sm:$0xf] %vm1834_vm10, %v1777_v13  ;;  %v1775_v16 = vpop.permute.xlu0 %1774  ;;  %v1791_v18 = vpop.permute.xlu2 %1790  ;;  %v3862_v13 = vld [vmem:[%s4301_s25 + $0x78] sm:$0xf]  ;;  %v2660_v17 = vrot.slane %v2658_v8, 5 }
 0x1c6   : > { %1853 = vst.msk [vmem:[#allocation2 + $0x48] sm:$0xf] %vm1834_vm10, %v1775_v16  ;;  %v2656_v16 = vrot.slane %v2655_v7, 4 }
 0x1c7   : > { %1861 = vst.msk [vmem:[#allocation2 + $0x68] sm:$0xf] %vm1834_vm10, %v1791_v18 }
 0x1ca   : > { %2269 = vrot.lane.b32.xlu1 %v3846_v19, %s4229_s3  ;;  %v2646_v19 = vrot.slane %v2645_v10, 4 }
 0x1cb   : > { %2137 = vrot.lane.b32.xlu0 %v2074_v20, %s4228_s30  ;;  %2135 = vrot.lane.b32.xlu2 %v2071_v21, %s4228_s30  ;;  %v2746_v20 = vrot.slane %v2744_v11, 5  ;;  %v2750_v21 = vrot.slane %v2748_v12, 4  ;;  %s3617_s30 = sshll.u32 %s3614_s28, 4  ;;  %s3618_s30 = int_to_ptr.hbm [resolvable:$true] %s3617_s30 }
 0x1cc   : > { %v1783_v22 = vpop.permute.xlu1 %1782 }
 0x1cd   : > { %1857 = vst.msk [vmem:[#allocation2 + $0x58] sm:$0xf] %vm1834_vm10, %v1783_v22  ;;  %v1781_v23 = vpop.permute.xlu0 %1780  ;;  %v1797_v24 = vpop.permute.xlu2 %1796 }
 0x1ce   : > { %1856 = vst.msk [vmem:[#allocation2 + $0x54] sm:$0xf] %vm1834_vm10, %v1781_v23  ;;  %v3916_v23 = vld [vmem:[%s4301_s25 + $0xb0] sm:$0x1] }
 0x1cf   : > { %1864 = vst.msk [vmem:[#allocation2 + $0x74] sm:$0xf] %vm1834_vm10, %v1797_v24  ;;  %v2737_v24 = vrot.slane %v2735_v14, 4 }
 0x1d2   : > { %2275 = vrot.lane.b32.xlu1 %v3849_v26, %s4229_s3  ;;  %v2740_v26 = vrot.slane %v2738_v15, 5 }
 0x1d3   : > { %2273 = vrot.lane.b32.xlu0 %v3848_v27, %s4229_s3  ;;  %2271 = vrot.lane.b32.xlu2 %v3847_v28, %s4229_s3  ;;  %v2661_v28 = vsel %vm4312_vm2, %v2656_v16, %v2660_v17 }
 0x1d4   : > { %v1789_v29 = vpop.permute.xlu1 %1788 }
 0x1d5   : > { %1860 = vst.msk [vmem:[#allocation2 + $0x64] sm:$0xf] %vm1834_vm10, %v1789_v29  ;;  %v1787_v31 = vpop.permute.xlu0 %1786  ;;  %v2076_v32 = vpop.permute.xlu2 %2075  ;;  %v2651_v29 = vsel %vm4312_vm2, %v2646_v19, %v2650_v61  ;;  %v2450_v61 = vshll.u32 %v3878_v48, 16  ;;  %v2466_v19 = vshll.u32 %v3880_v5, 16 }
 0x1d6   : > { %1859 = vst.msk [vmem:[#allocation2 + $0x60] sm:$0xf] %vm1834_vm10, %v1787_v31  ;;  %v3950_v31 = vld [vmem:[%s4301_s25 + $0x78] sm:$0xe] }
 0x1d7   : > { %2172 = vst.msk [vmem:[#allocation2] sm:$0xf] %vm2171_vm11, %v2076_v32  ;;  %v3951_v32 = vld [vmem:[%s4301_s25 + $0x7c] sm:$0xf]  ;;  %v2452_v12 = vrot.slane %v2450_v61, 5 }
 0x1da   : > { %2281 = vrot.lane.b32.xlu1 %v3852_v34, %s4229_s3  ;;  %v2751_v34 = vor.u32 %v2750_v21, %v2746_v20 }
 0x1db   : > { %2279 = vrot.lane.b32.xlu0 %v3851_v36, %s4229_s3  ;;  %2277 = vrot.lane.b32.xlu2 %v3850_v33, %s4229_s3  ;;  %v2754_v36 = vshll.u32 %v3916_v23, 16  ;;  %v3871_v33 = vld [vmem:[%s4301_s25 + $0xac] sm:$0xf] }
 0x1dc   : > { %v1795_v37 = vpop.permute.xlu1 %1794 }
 0x1dd   : > { %1863 = vst.msk [vmem:[#allocation2 + $0x70] sm:$0xf] %vm1834_vm10, %v1795_v37  ;;  %v1793_v35 = vpop.permute.xlu0 %1792  ;;  %v2082_v30 = vpop.permute.xlu2 %2081  ;;  %v2741_v37 = vor.u32 %v2740_v26, %v2737_v24 }
 0x1de   : > { %1862 = vst.msk [vmem:[#allocation2 + $0x6c] sm:$0xf] %vm1834_vm10, %v1793_v35  ;;  %v3982_v35 = vrot.slane %v3950_v31, 9 }
 0x1df   : > { %2175 = vst.msk [vmem:[#allocation2 + $0xc] sm:$0xf] %vm2171_vm11, %v2082_v30  ;;  %v3113_v30 = vrot.slane %v3951_v32, 5 }
 0x1e2   : > { %2287 = vrot.lane.b32.xlu1 %v3855_v38, %s4229_s3 }
 0x1e3   : > { %2285 = vrot.lane.b32.xlu0 %v3854_v39, %s4229_s3  ;;  %2283 = vrot.lane.b32.xlu2 %v3853_v40, %s4229_s3  ;;  %v2752_v39 = vrot.slane %v2751_v34, 4  ;;  %v2756_v40 = vrot.slane %v2754_v36, 5 }
 0x1e4   : > { %v1801_v41 = vpop.permute.xlu1 %1800 }
 0x1e5   : > { %1866 = vst.msk [vmem:[#allocation2 + $0x7c] sm:$0xf] %vm1834_vm10, %v1801_v41  ;;  %v1799_v42 = vpop.permute.xlu0 %1798  ;;  %v2088_v43 = vpop.permute.xlu2 %2087  ;;  %v3963_v41 = vld [vmem:[%s4301_s25 + $0xac] sm:$0xf]  ;;  %v2757_v54 = vsel %vm4312_vm2, %v2752_v39, %v2756_v40  ;;  %v3926_v39 = vld [vmem:[%s4301_s25 + $0x18] sm:$0xe] }
 0x1e6   : > { %1865 = vst.msk [vmem:[#allocation2 + $0x78] sm:$0xf] %vm1834_vm10, %v1799_v42  ;;  %v3890_v42 = vld [vmem:[%s4301_s25 + $0x48] sm:$0xf]  ;;  %v3141_v50 = vrot.slane %v3963_v41, 5 }
 0x1e7   : > { %2178 = vst.msk [vmem:[#allocation2 + $0x18] sm:$0xf] %vm2171_vm11, %v2088_v43 }
 0x1e8   : > { %v3143_v52 = vrot.slane %v3141_v50, 4  ;;  %v3142_v17 = vsel %vm4487_vm6, %v3986_v55, %v3141_v50 }
 0x1ea   : > { %2293 = vrot.lane.b32.xlu1 %v3858_v44, %s4229_s3  ;;  %v2742_v44 = vrot.slane %v2741_v37, 4 }
 0x1eb   : > { %2291 = vrot.lane.b32.xlu0 %v3857_v45, %s4229_s3  ;;  %2289 = vrot.lane.b32.xlu2 %v3856_v46, %s4229_s3  ;;  %v3879_v45 = vld [vmem:[%s4301_s25 + $0x1c] sm:$0xf]  ;;  %v3964_v46 = vld [vmem:[%s4301_s25 + $0xb0] sm:$0x1] }
 0x1ec   : > { %v2080_v47 = vpop.permute.xlu1 %2079  ;;  %v2460_v58 = vshrl.u32 %v3879_v45, 16  ;;  %v2747_v59 = vsel %vm4312_vm2, %v2742_v44, %v2746_v20  ;;  %v3144_v62 = vrot.slane %v3964_v46, 5  ;;  %v3974_v46 = vrot.slane %v3926_v39, 9 }
 0x1ed   : > { %2174 = vst.msk [vmem:[#allocation2 + $0x8] sm:$0xf] %vm2171_vm11, %v2080_v47  ;;  %v2078_v49 = vpop.permute.xlu0 %2077  ;;  %v2094_v51 = vpop.permute.xlu2 %2093 }
 0x1ee   : > { %2173 = vst.msk [vmem:[#allocation2 + $0x4] sm:$0xf] %vm2171_vm11, %v2078_v49  ;;  %v3114_v49 = vsel %vm4487_vm6, %v3982_v35, %v3113_v30  ;;  %v2462_v7 = vrot.slane %v2460_v58, 4  ;;  %v3145_v14 = vsel %vm4487_vm6, %v3143_v52, %v3144_v62 }
 0x1ef   : > { %2181 = vst.msk [vmem:[#allocation2 + $0x24] sm:$0xf] %vm2171_vm11, %v2094_v51  ;;  %v2543_v51 = vshrl.u32 %v3890_v42, 16 }
 0x1f1   : > { %v2545_v0 = vrot.slane %v2543_v51, 4 }
 0x1f2   : > { %2299 = vrot.lane.b32.xlu1 %v3861_v53, %s4229_s3  ;;  %v2546_v53 = vshll.u32 %v3890_v42, 16 }
 0x1f3   : > { %2297 = vrot.lane.b32.xlu0 %v3860_v57, %s4229_s3  ;;  %2295 = vrot.lane.b32.xlu2 %v3859_v60, %s4229_s3  ;;  %v2456_v57 = vshll.u32 %v3879_v45, 16  ;;  %v2447_v60 = vshrl.u32 %v3878_v48, 16  ;;  %v3939_v48 = vld [vmem:[%s4301_s25 + $0x4c] sm:$0xf] }
 0x1f4   : > { %v2086_v63 = vpop.permute.xlu1 %2085  ;;  %v3085_v56 = vrot.slane %v3939_v48, 5  ;;  %v3955_v48 = vld [vmem:[%s4301_s25 + $0x8c] sm:$0x1] }
 0x1f5   : > { %2177 = vst.msk [vmem:[#allocation2 + $0x14] sm:$0xf] %vm2171_vm11, %v2086_v63  ;;  %v2084_v2 = vpop.permute.xlu0 %2083  ;;  %v2100_v4 = vpop.permute.xlu2 %2099  ;;  %v3952_v63 = vld [vmem:[%s4301_s25 + $0x80] sm:$0x1]  ;;  %v2449_v11 = vrot.slane %v2447_v60, 4 }
 0x1f6   : > { %2176 = vst.msk [vmem:[#allocation2 + $0x10] sm:$0xf] %vm2171_vm11, %v2084_v2  ;;  %v2548_v2 = vrot.slane %v2546_v53, 5  ;;  %v3116_v10 = vrot.slane %v3952_v63, 5  ;;  %v3087_v61 = vrot.slane %v3085_v56, 4 }
 0x1f7   : > { %2184 = vst.msk [vmem:[#allocation2 + $0x30] sm:$0xf] %vm2171_vm11, %v2100_v4  ;;  %v3891_v4 = vld [vmem:[%s4301_s25 + $0x4c] sm:$0xf]  ;;  %v3917_v63 = vld [vmem:[%s4301_s25 + $0xb4] sm:$0xf] }
 0x1f8   : > { %v2549_v15 = vor.u32 %v2548_v2, %v2545_v0  ;;  %v2552_v16 = vshll.u32 %v3891_v4, 16  ;;  %v2556_v20 = vshrl.u32 %v3891_v4, 16  ;;  %v3906_v0 = vld [vmem:[%s4301_s25 + $0x88] sm:$0xf]  ;;  %v3864_v4 = vld [vmem:[%s4301_s25 + $0x84] sm:$0xf] }
 0x1f9   : > { %v2759_v5 = vshrl.u32 %v3917_v63, 16 }
 0x1fa   : > { %2317 = vrot.lane.b32.xlu1 %v3870_v6, %s4229_s3  ;;  %v2458_v6 = vrot.slane %v2456_v57, 5  ;;  %v2550_v23 = vrot.slane %v2549_v15, 4  ;;  %v2554_v24 = vrot.slane %v2552_v16, 5  ;;  %v2558_v34 = vrot.slane %v2556_v20, 4  ;;  %v3940_v57 = vld [vmem:[%s4301_s25 + $0x50] sm:$0x1] }
 0x1fb   : > { %2303 = vrot.lane.b32.xlu0 %v3863_v9, %s4229_s3  ;;  %2301 = vrot.lane.b32.xlu2 %v3862_v13, %s4229_s3  ;;  %v3115_v9 = vrot.slane %v3113_v30, 4  ;;  %v3088_v62 = vrot.slane %v3940_v57, 5  ;;  %v3918_v16 = vld [vmem:[%s4301_s25 + $0xb8] sm:$0xf]  ;;  %v3907_v20 = vld [vmem:[%s4301_s25 + $0x8c] sm:$0x1] }
 0x1fc   : > { %v2092_v18 = vpop.permute.xlu1 %2091  ;;  %v2555_v37 = vsel %vm4312_vm2, %v2550_v23, %v2554_v24  ;;  %v2559_v41 = vor.u32 %v2558_v34, %v2554_v24  ;;  %v3873_v24 = vld [vmem:[%s4301_s25 + $0xb8] sm:$0xf]  ;;  %v3865_v34 = vld [vmem:[%s4301_s25 + $0x88] sm:$0xf] }
 0x1fd   : > { %2180 = vst.msk [vmem:[#allocation2 + $0x20] sm:$0xf] %vm2171_vm11, %v2092_v18  ;;  %v2090_v22 = vpop.permute.xlu0 %2089  ;;  %v2106_v27 = vpop.permute.xlu2 %2105  ;;  %v2463_v18 = vor.u32 %v2462_v7, %v2458_v6  ;;  %v3117_v21 = vsel %vm4487_vm6, %v3115_v9, %v3116_v10  ;;  %v3089_v7 = vsel %vm4487_vm6, %v3087_v61, %v3088_v62  ;;  %v2676_v9 = vshrl.u32 %v3906_v0, 16 }
 0x1fe   : > { %2179 = vst.msk [vmem:[#allocation2 + $0x1c] sm:$0xf] %vm2171_vm11, %v2090_v22  ;;  %v2453_v22 = vor.u32 %v2452_v12, %v2449_v11 }
 0x1ff   : > { %2187 = vst.msk [vmem:[#allocation2 + $0x3c] sm:$0xf] %vm2171_vm11, %v2106_v27  ;;  %v2464_v27 = vrot.slane %v2463_v18, 4  ;;  %v2678_v18 = vrot.slane %v2676_v9, 4 }
 0x200   : > { %v2454_v32 = vrot.slane %v2453_v22, 4 }
 0x202   : > { %2864 = vrot.lane.b32.xlu1 %v2661_v28, %s4230_s4  ;;  %v2468_v28 = vrot.slane %v2466_v19, 5  ;;  %v2459_v40 = vsel %vm4312_vm2, %v2454_v32, %v2458_v6  ;;  %v2762_v6 = vshll.u32 %v3917_v63, 16  ;;  %v2772_v32 = vshrl.u32 %v3918_v16, 16 }
 0x203   : > { %2862 = vrot.lane.b32.xlu0 %v2651_v29, %s4230_s4  ;;  %2319 = vrot.lane.b32.xlu2 %v3871_v33, %s4229_s3  ;;  %v3927_v29 = vld [vmem:[%s4301_s25 + $0x1c] sm:$0xf]  ;;  %v3892_v33 = vld [vmem:[%s4301_s25 + $0x50] sm:$0x1] }
 0x204   : > { %v2098_v38 = vpop.permute.xlu1 %2097  ;;  %v3057_v35 = vrot.slane %v3927_v29, 5  ;;  %v2469_v30 = vsel %vm4312_vm2, %v2464_v27, %v2468_v28  ;;  %v2562_v42 = vshll.u32 %v3892_v33, 16  ;;  %v2768_v27 = vshll.u32 %v3918_v16, 16  ;;  %v3872_v28 = vld [vmem:[%s4301_s25 + $0xb4] sm:$0xf] }
 0x205   : > { %2183 = vst.msk [vmem:[#allocation2 + $0x2c] sm:$0xf] %vm2171_vm11, %v2098_v38  ;;  %v2096_v43 = vpop.permute.xlu0 %2095  ;;  %v2112_v47 = vpop.permute.xlu2 %2111  ;;  %v3928_v38 = vld [vmem:[%s4301_s25 + $0x20] sm:$0x1] }
 0x206   : > { %2182 = vst.msk [vmem:[#allocation2 + $0x28] sm:$0xf] %vm2171_vm11, %v2096_v43  ;;  %v3059_v43 = vrot.slane %v3057_v35, 4  ;;  %v3060_v44 = vrot.slane %v3928_v38, 5  ;;  %v2564_v50 = vrot.slane %v2562_v42, 5 }
 0x207   : > { %2190 = vst.msk [vmem:[#allocation2 + $0x48] sm:$0xf] %vm2171_vm11, %v2112_v47 }
 0x208   : > { %v3061_v53 = vsel %vm4487_vm6, %v3059_v43, %v3060_v44  ;;  %v2774_v43 = vrot.slane %v2772_v32, 4 }
 0x20a   : > { %3199 = vrot.lane.b32.xlu1 %v3114_v49, %s4231_s5  ;;  %v2560_v49 = vrot.slane %v2559_v41, 4 }
 0x20b   : > { %2880 = vrot.lane.b32.xlu0 %v2757_v54, %s4230_s4  ;;  %2878 = vrot.lane.b32.xlu2 %v2747_v59, %s4230_s4  ;;  %v3058_v54 = vsel %vm4487_vm6, %v3974_v46, %v3057_v35  ;;  %v3938_v59 = vld [vmem:[%s4301_s25 + $0x48] sm:$0xe]  ;;  %v3919_v46 = vld [vmem:[%s4301_s25 + $0xbc] sm:$0x1] }
 0x20c   : > { %v2104_v3 = vpop.permute.xlu1 %2103  ;;  %v2565_v58 = vsel %vm4312_vm2, %v2560_v49, %v2564_v50  ;;  %v3978_v55 = vrot.slane %v3938_v59, 9  ;;  %v3954_v35 = vld [vmem:[%s4301_s25 + $0x88] sm:$0xf]  ;;  %v2778_v57 = vshll.u32 %v3919_v46, 16  ;;  %v3123_v59 = vrot.slane %v3955_v48, 5 }
 0x20d   : > { %2186 = vst.msk [vmem:[#allocation2 + $0x38] sm:$0xf] %vm2171_vm11, %v2104_v3  ;;  %v2102_v8 = vpop.permute.xlu0 %2101  ;;  %v2118_v13 = vpop.permute.xlu2 %2117  ;;  %v3905_v3 = vld [vmem:[%s4301_s25 + $0x84] sm:$0xf]  ;;  %v3120_v44 = vrot.slane %v3954_v35, 5 }
 0x20e   : > { %2185 = vst.msk [vmem:[#allocation2 + $0x34] sm:$0xf] %vm2171_vm11, %v2102_v8  ;;  %v2672_v8 = vshll.u32 %v3906_v0, 16  ;;  %v3086_v10 = vsel %vm4487_vm6, %v3978_v55, %v3085_v56  ;;  %v2663_v11 = vshrl.u32 %v3905_v3, 16  ;;  %v2666_v12 = vshll.u32 %v3905_v3, 16 }
 0x20f   : > { %2193 = vst.msk [vmem:[#allocation2 + $0x54] sm:$0xf] %vm2171_vm11, %v2118_v13  ;;  %v2761_v13 = vrot.slane %v2759_v5, 4  ;;  %v3966_v55 = vld [vmem:[%s4301_s25 + $0xb8] sm:$0xf] }
 0x210   : > { %v2668_v22 = vrot.slane %v2666_v12, 5  ;;  %v3894_v0 = vld [vmem:[%s4301_s25 + $0x58] sm:$0xf]  ;;  %v3893_v5 = vld [vmem:[%s4301_s25 + $0x54] sm:$0xf] }
 0x212   : > { %3217 = vrot.lane.b32.xlu1 %v3145_v14, %s4231_s5  ;;  %v2764_v14 = vrot.slane %v2762_v6, 5 }
 0x213   : > { %3215 = vrot.lane.b32.xlu0 %v3142_v17, %s4231_s5  ;;  %3201 = vrot.lane.b32.xlu2 %v3117_v21, %s4231_s5  ;;  %v2674_v17 = vrot.slane %v2672_v8, 5  ;;  %v2665_v21 = vrot.slane %v2663_v11, 4  ;;  %v2580_v11 = vshrl.u32 %v3894_v0, 16 }
 0x214   : > { %v2110_v26 = vpop.permute.xlu1 %2109 }
 0x215   : > { %2189 = vst.msk [vmem:[#allocation2 + $0x44] sm:$0xf] %vm2171_vm11, %v2110_v26  ;;  %v2108_v31 = vpop.permute.xlu0 %2107  ;;  %v2124_v36 = vpop.permute.xlu2 %2123  ;;  %v2765_v26 = vor.u32 %v2764_v14, %v2761_v13  ;;  %v2679_v29 = vor.u32 %v2678_v18, %v2674_v17  ;;  %v3148_v13 = vrot.slane %v3966_v55, 5  ;;  %v2567_v14 = vshrl.u32 %v3893_v5, 16 }
 0x216   : > { %2188 = vst.msk [vmem:[#allocation2 + $0x40] sm:$0xf] %vm2171_vm11, %v2108_v31  ;;  %v2682_v31 = vshll.u32 %v3907_v20, 16 }
 0x217   : > { %2196 = vst.msk [vmem:[#allocation2 + $0x60] sm:$0xf] %vm2171_vm11, %v2124_v36  ;;  %v2669_v36 = vor.u32 %v2668_v22, %v2665_v21  ;;  %v2766_v33 = vrot.slane %v2765_v26, 4  ;;  %v2680_v38 = vrot.slane %v2679_v29, 4  ;;  %v3150_v26 = vrot.slane %v3148_v13, 4 }
 0x218   : > { %v2684_v39 = vrot.slane %v2682_v31, 5  ;;  %v2569_v29 = vrot.slane %v2567_v14, 4  ;;  %v3943_v14 = vld [vmem:[%s4301_s25 + $0x5c] sm:$0x1] }
 0x219   : > { %v2670_v42 = vrot.slane %v2669_v36, 4 }
 0x21a   : > { %2846 = vrot.lane.b32.xlu1 %v2555_v37, %s4230_s4  ;;  %v2770_v37 = vrot.slane %v2768_v27, 5 }
 0x21b   : > { %2832 = vrot.lane.b32.xlu0 %v2469_v30, %s4230_s4  ;;  %2830 = vrot.lane.b32.xlu2 %v2459_v40, %s4230_s4  ;;  %v3881_v40 = vld [vmem:[%s4301_s25 + $0x24] sm:$0xf] }
 0x21c   : > { %v2116_v45 = vpop.permute.xlu1 %2115  ;;  %v2471_v49 = vshrl.u32 %v3881_v40, 16  ;;  %v2474_v50 = vshll.u32 %v3881_v40, 16  ;;  %v2775_v56 = vor.u32 %v2774_v43, %v2770_v37 }
 0x21d   : > { %2192 = vst.msk [vmem:[#allocation2 + $0x50] sm:$0xf] %vm2171_vm11, %v2116_v45  ;;  %v2114_v47 = vpop.permute.xlu0 %2113  ;;  %v2130_v51 = vpop.permute.xlu2 %2129 }
 0x21e   : > { %2191 = vst.msk [vmem:[#allocation2 + $0x4c] sm:$0xf] %vm2171_vm11, %v2114_v47  ;;  %v2771_v47 = vsel %vm4312_vm2, %v2766_v33, %v2770_v37  ;;  %v2473_v61 = vrot.slane %v2471_v49, 4  ;;  %v2476_v62 = vrot.slane %v2474_v50, 5  ;;  %v2776_v3 = vrot.slane %v2775_v56, 4 }
 0x21f   : > { %2199 = vst.msk [vmem:[#allocation2 + $0x6c] sm:$0xf] %vm2171_vm11, %v2130_v51  ;;  %v2685_v51 = vsel %vm4312_vm2, %v2680_v38, %v2684_v39  ;;  %v3883_v37 = vld [vmem:[%s4301_s25 + $0x2c] sm:$0x1]  ;;  %v3930_v49 = vld [vmem:[%s4301_s25 + $0x28] sm:$0xf] }
 0x220   : > { %v2477_v8 = vor.u32 %v2476_v62, %v2473_v61  ;;  %v2490_v43 = vshll.u32 %v3883_v37, 16  ;;  %v3929_v62 = vld [vmem:[%s4301_s25 + $0x24] sm:$0xe] }
 0x222   : > { %3169 = vrot.lane.b32.xlu1 %v3061_v53, %s4231_s5  ;;  %v3953_v53 = vld [vmem:[%s4301_s25 + $0x84] sm:$0xe]  ;;  %v2478_v20 = vrot.slane %v2477_v8, 4 }
 0x223   : > { %3167 = vrot.lane.b32.xlu0 %v3058_v54, %s4231_s5  ;;  %2848 = vrot.lane.b32.xlu2 %v2565_v58, %s4230_s4  ;;  %v2675_v54 = vsel %vm4312_vm2, %v2670_v42, %v2674_v17  ;;  %v3122_v58 = vrot.slane %v3120_v44, 4  ;;  %v3967_v17 = vld [vmem:[%s4301_s25 + $0xbc] sm:$0x1] }
 0x224   : > { %v2122_v60 = vpop.permute.xlu1 %2121  ;;  %v3151_v27 = vrot.slane %v3967_v17, 5 }
 0x225   : > { %2195 = vst.msk [vmem:[#allocation2 + $0x5c] sm:$0xf] %vm2171_vm11, %v2122_v60  ;;  %v2120_v52 = vpop.permute.xlu0 %2119  ;;  %v2136_v2 = vpop.permute.xlu2 %2135  ;;  %v3983_v60 = vrot.slane %v3953_v53, 9  ;;  %v3124_v6 = vsel %vm4487_vm6, %v3122_v58, %v3123_v59  ;;  %v3942_v58 = vld [vmem:[%s4301_s25 + $0x58] sm:$0xf]  ;;  %v3064_v59 = vrot.slane %v3930_v49, 5 }
 0x226   : > { %2194 = vst.msk [vmem:[#allocation2 + $0x58] sm:$0xf] %vm2171_vm11, %v2120_v52  ;;  %v3882_v52 = vld [vmem:[%s4301_s25 + $0x28] sm:$0xf]  ;;  %v3152_v39 = vsel %vm4487_vm6, %v3150_v26, %v3151_v27  ;;  %v3867_v27 = vld [vmem:[%s4301_s25 + $0x94] sm:$0xf] }
 0x227   : > { %2202 = vst.msk [vmem:[#allocation2 + $0x78] sm:$0xf] %vm2171_vm11, %v2136_v2  ;;  %v2480_v9 = vshll.u32 %v3882_v52, 16  ;;  %v3121_v12 = vsel %vm4487_vm6, %v3983_v60, %v3120_v44  ;;  %v2484_v16 = vshrl.u32 %v3882_v52, 16  ;;  %v3931_v60 = vld [vmem:[%s4301_s25 + $0x2c] sm:$0x1] }
 0x228   : > { %v3092_v52 = vrot.slane %v3942_v58, 5 }
 0x229   : > { %v2482_v21 = vrot.slane %v2480_v9, 5  ;;  %v2486_v36 = vrot.slane %v2484_v16, 4 }
 0x22a   : > { %2305 = vrot.lane.b32.xlu1 %v3864_v4, %s4229_s3  ;;  %v2780_v4 = vrot.slane %v2778_v57, 5  ;;  %v3941_v57 = vld [vmem:[%s4301_s25 + $0x54] sm:$0xe] }
 0x22b   : > { %3185 = vrot.lane.b32.xlu0 %v3089_v7, %s4231_s5  ;;  %3183 = vrot.lane.b32.xlu2 %v3086_v10, %s4231_s5  ;;  %v2576_v10 = vshll.u32 %v3894_v0, 16  ;;  %v2483_v35 = vsel %vm4312_vm2, %v2478_v20, %v2482_v21  ;;  %v2487_v42 = vor.u32 %v2486_v36, %v2482_v21  ;;  %v3066_v0 = vrot.slane %v3064_v59, 4  ;;  %v3921_v20 = vld [vmem:[%s4301_s25 + $0xc4] sm:$0xf]  ;;  %v3920_v21 = vld [vmem:[%s4301_s25 + $0xc0] sm:$0xf] }
 0x22c   : > { %v2128_v15 = vpop.permute.xlu1 %2127  ;;  %v2781_v18 = vsel %vm4312_vm2, %v2776_v3, %v2780_v4  ;;  %v3908_v3 = vld [vmem:[%s4301_s25 + $0x90] sm:$0xf]  ;;  %v2796_v36 = vshrl.u32 %v3921_v20, 16  ;;  %v2783_v37 = vshrl.u32 %v3920_v21, 16 }
 0x22d   : > { %2198 = vst.msk [vmem:[#allocation2 + $0x68] sm:$0xf] %vm2171_vm11, %v2128_v15  ;;  %v2126_v19 = vpop.permute.xlu0 %2125  ;;  %v2272_v23 = vpop.permute.xlu2 %2271  ;;  %v2570_v15 = vshll.u32 %v3893_v5, 16  ;;  %v2578_v22 = vrot.slane %v2576_v10, 5  ;;  %v2488_v50 = vrot.slane %v2487_v42, 4  ;;  %v3975_v5 = vrot.slane %v3929_v62, 9 }
 0x22e   : > { %2197 = vst.msk [vmem:[#allocation2 + $0x64] sm:$0xf] %vm2171_vm11, %v2126_v19  ;;  %v3965_v19 = vld [vmem:[%s4301_s25 + $0xb4] sm:$0xe]  ;;  %v2687_v8 = vshrl.u32 %v3908_v3, 16  ;;  %v2690_v9 = vshll.u32 %v3908_v3, 16 }
 0x22f   : > { %2367 = vst.msk [vmem:[#allocation2 + $0x4] sm:$0xf] %vm2365_vm12, %v2272_v23  ;;  %v2582_v23 = vrot.slane %v2580_v11, 4  ;;  %v2572_v31 = vrot.slane %v2570_v15, 5  ;;  %v3332_v11 = vld [vmem:[%s5787_s1 + $0x10] sm:$0x3] }
 0x230   : > { %v2689_v15 = vrot.slane %v2687_v8, 4  ;;  %v2692_v16 = vrot.slane %v2690_v9, 5 }
 0x231   : > { %v2573_v40 = vor.u32 %v2572_v31, %v2569_v29  ;;  %v4100_v29 = vld [vmem:[%s5787_s1 + $0x8] sm:$0xff] }
 0x232   : > { %2323 = vrot.lane.b32.xlu1 %v3873_v24, %s4229_s3  ;;  %v2693_v31 = vor.u32 %v2692_v16, %v2689_v15 }
 0x233   : > { %2321 = vrot.lane.b32.xlu0 %v3872_v28, %s4229_s3  ;;  %2307 = vrot.lane.b32.xlu2 %v3865_v34, %s4229_s3  ;;  %v3895_v28 = vld [vmem:[%s4301_s25 + $0x5c] sm:$0x1]  ;;  %v3987_v34 = vrot.slane %v3965_v19, 9  ;;  %v3909_v19 = vld [vmem:[%s4301_s25 + $0x94] sm:$0xf] }
 0x234   : > { %v2134_v30 = vpop.permute.xlu1 %2133  ;;  %v2586_v38 = vshll.u32 %v3895_v28, 16 }
 0x235   : > { %2201 = vst.msk [vmem:[#allocation2 + $0x74] sm:$0xf] %vm2171_vm11, %v2134_v30  ;;  %v2132_v41 = vpop.permute.xlu0 %2131  ;;  %v2278_v45 = vpop.permute.xlu2 %2277  ;;  %v2583_v30 = vor.u32 %v2582_v23, %v2578_v22  ;;  %v3094_v23 = vrot.slane %v3092_v52, 4 }
 0x236   : > { %2200 = vst.msk [vmem:[#allocation2 + $0x70] sm:$0xf] %vm2171_vm11, %v2132_v41  ;;  %v3149_v41 = vsel %vm4487_vm6, %v3987_v34, %v3148_v13  ;;  %v3422_v13 = vunpack.c.l.b16 %v3332_v11  ;;  %v2792_v34 = vshll.u32 %v3921_v20, 16  ;;  %v3956_v20 = vld [vmem:[%s4301_s25 + $0x90] sm:$0xe] }
 0x237   : > { %2370 = vst.msk [vmem:[#allocation2 + $0x10] sm:$0xf] %vm2365_vm12, %v2278_v45  ;;  %v2584_v44 = vrot.slane %v2583_v30, 4  ;;  %v2588_v45 = vrot.slane %v2586_v38, 5  ;;  %v2700_v30 = vshrl.u32 %v3909_v19, 16 }
 0x238   : > { %v3425_v17 = vpack.c.b16 %v3422_v13, %v3422_v13  ;;  %v2794_v42 = vrot.slane %v2792_v34, 5  ;;  %v3984_v34 = vrot.slane %v3956_v20, 9 }
 0x239   : > { %v2702_v49 = vrot.slane %v2700_v30, 4 }
 0x23a   : > { %2882 = vrot.lane.b32.xlu1 %v2771_v47, %s4230_s4  ;;  %v2574_v47 = vrot.slane %v2573_v40, 4  ;;  %v3479_v26 = vsel %vm3477_vm13, %v3425_v17, 0  ;;  %v2694_v40 = vrot.slane %v2693_v31, 4  ;;  %v3958_v17 = vld [vmem:[%s4301_s25 + $0x98] sm:$0x1] }
 0x23b   : > { %2868 = vrot.lane.b32.xlu0 %v2685_v51, %s4230_s4  ;;  %2866 = vrot.lane.b32.xlu2 %v2675_v54, %s4230_s4  ;;  %v2492_v51 = vrot.slane %v2490_v43, 5  ;;  %v2589_v54 = vsel %vm4312_vm2, %v2584_v44, %v2588_v45  ;;  %v2798_v43 = vrot.slane %v2796_v36, 4  ;;  %v3922_v45 = vld [vmem:[%s4301_s25 + $0xc8] sm:$0x1]  ;;  %v3897_v36 = vld [vmem:[%s4301_s25 + $0x64] sm:$0xf] }
 0x23c   : > { %v2270_v63 = vpop.permute.xlu1 %2269  ;;  %v2579_v56 = vsel %vm4312_vm2, %v2574_v47, %v2578_v22  ;;  %4103 = vmatpush.bf16.msra.mxu2 %v3479_v26  ;;  %4104 = vmatpush.bf16.msra.mxu3 %v3479_v26 }
 0x23d   : > { %2366 = vst.msk [vmem:[#allocation2] sm:$0xf] %vm2365_vm12, %v2270_v63  ;;  %v2138_v2 = vpop.permute.xlu0 %2137  ;;  %v2284_v7 = vpop.permute.xlu2 %2283  ;;  %v2493_v61 = vsel %vm4312_vm2, %v2488_v50, %v2492_v51  ;;  %v3979_v63 = vrot.slane %v3941_v57, 9  ;;  %3486 = vmatpush.bf16.msra.mxu0 %v3479_v26  ;;  %4102 = vmatpush.bf16.msra.mxu1 %v3479_v26  ;;  %v3910_v51 = vld [vmem:[%s4301_s25 + $0x98] sm:$0x1] }
 0x23e   : > { %2203 = vst.msk [vmem:[#allocation2 + $0x7c] sm:$0xf] %vm2171_vm11, %v2138_v2  ;;  %v3067_v2 = vrot.slane %v3931_v60, 5  ;;  %v3875_v57 = vld [vmem:[%s4301_s25 + $0xc4] sm:$0xf] }
 0x23f   : > { %2373 = vst.msk [vmem:[#allocation2 + $0x1c] sm:$0xf] %vm2365_vm12, %v2284_v7  ;;  %v3093_v7 = vsel %vm4487_vm6, %v3979_v63, %v3092_v52 }
 0x240   : > { %v3068_v10 = vsel %vm4487_vm6, %v3066_v0, %v3067_v2  ;;  %4106 = vmatpush.bf16.msra.mxu2 %v4100_v29  ;;  %4107 = vmatpush.bf16.msra.mxu3 %v4100_v29  ;;  %v3957_v0 = vld [vmem:[%s4301_s25 + $0x94] sm:$0xf] }
 0x241   : > { %3487 = vmatpush.bf16.msra.mxu0 %v4100_v29  ;;  %4105 = vmatpush.bf16.msra.mxu1 %v4100_v29  ;;  %v3885_v2 = vld [vmem:[%s4301_s25 + $0x34] sm:$0xf] }
 0x242   : > { %3205 = vrot.lane.b32.xlu1 %v3124_v6, %s4231_s5  ;;  %v2504_v11 = vshll.u32 %v3885_v2, 16 }
 0x243   : > { %3203 = vrot.lane.b32.xlu0 %v3121_v12, %s4231_s5  ;;  %2884 = vrot.lane.b32.xlu2 %v2781_v18, %s4230_s4  ;;  %v3065_v12 = vsel %vm4487_vm6, %v3975_v5, %v3064_v59  ;;  %v3874_v59 = vld [vmem:[%s4301_s25 + $0xc0] sm:$0xf] }
 0x244   : > { %v2276_v24 = vpop.permute.xlu1 %2275 }
 0x245   : > { %2369 = vst.msk [vmem:[#allocation2 + $0xc] sm:$0xf] %vm2365_vm12, %v2276_v24  ;;  %v2274_v32 = vpop.permute.xlu0 %2273  ;;  %v2290_v33 = vpop.permute.xlu2 %2289  ;;  %v3095_v24 = vrot.slane %v3943_v14, 5  ;;  %v3969_v14 = vld [vmem:[%s4301_s25 + $0xc4] sm:$0xf] }
 0x246   : > { %2368 = vst.msk [vmem:[#allocation2 + $0x8] sm:$0xf] %vm2365_vm12, %v2274_v32  ;;  %v2696_v32 = vshll.u32 %v3909_v19, 16 }
 0x247   : > { %2376 = vst.msk [vmem:[#allocation2 + $0x28] sm:$0xf] %vm2365_vm12, %v2290_v33  ;;  %v3866_v33 = vld [vmem:[%s4301_s25 + $0x90] sm:$0xf]  ;;  %v3096_v38 = vsel %vm4487_vm6, %v3094_v23, %v3095_v24  ;;  %v2506_v23 = vrot.slane %v2504_v11, 5 }
 0x248   : > { %v3945_v11 = vld [vmem:[%s4301_s25 + $0x64] sm:$0xf] }
 0x24a   : > { %2834 = vrot.lane.b32.xlu1 %v2483_v35, %s4230_s4  ;;  %v2786_v35 = vshll.u32 %v3920_v21, 16  ;;  %v3155_v21 = vrot.slane %v3969_v14, 5 }
 0x24b   : > { %3221 = vrot.lane.b32.xlu0 %v3152_v39, %s4231_s5  ;;  %3219 = vrot.lane.b32.xlu2 %v3149_v41, %s4231_s5  ;;  %v4099_v39 = vld [vmem:[%s5787_s1] sm:$0xff]  ;;  %v2698_v41 = vrot.slane %v2696_v32, 5 }
 0x24c   : > { %v2282_v46 = vpop.permute.xlu1 %2281  ;;  %v2788_v47 = vrot.slane %v2786_v35, 5  ;;  %4109 = vmatpush.bf16.msra.mxu2 %v4099_v39  ;;  %4110 = vmatpush.bf16.msra.mxu3 %v4099_v39 }
 0x24d   : > { %2372 = vst.msk [vmem:[#allocation2 + $0x18] sm:$0xf] %vm2365_vm12, %v2282_v46  ;;  %v2280_v48 = vpop.permute.xlu0 %2279  ;;  %v2296_v53 = vpop.permute.xlu2 %2295  ;;  %v2785_v46 = vrot.slane %v2783_v37, 4  ;;  %3488 = vmatpush.bf16.msra.mxu0 %v4099_v39  ;;  %v2703_v60 = vor.u32 %v2702_v49, %v2698_v41  ;;  %4108 = vmatpush.bf16.msra.mxu1 %v4099_v39  ;;  %v3896_v37 = vld [vmem:[%s4301_s25 + $0x60] sm:$0xf] }
 0x24e   : > { %2371 = vst.msk [vmem:[#allocation2 + $0x14] sm:$0xf] %vm2365_vm12, %v2280_v48 }
 0x24f   : > { %2379 = vst.msk [vmem:[#allocation2 + $0x34] sm:$0xf] %vm2365_vm12, %v2296_v53  ;;  %v2699_v53 = vsel %vm4312_vm2, %v2694_v40, %v2698_v41  ;;  %v2789_v58 = vor.u32 %v2788_v47, %v2785_v46  ;;  %v2600_v41 = vshll.u32 %v3897_v36, 16  ;;  %v3970_v46 = vld [vmem:[%s4301_s25 + $0xc8] sm:$0x1] }
 0x252   : > { %2852 = vrot.lane.b32.xlu1 %v2589_v54, %s4230_s4  ;;  %v2799_v54 = vor.u32 %v2798_v43, %v2794_v42 }
 0x253   : > { %2850 = vrot.lane.b32.xlu0 %v2579_v56, %s4230_s4  ;;  %2836 = vrot.lane.b32.xlu2 %v2493_v61, %s4230_s4  ;;  %v2802_v56 = vshll.u32 %v3922_v45, 16  ;;  %v2706_v61 = vshll.u32 %v3910_v51, 16  ;;  %v2594_v45 = vshll.u32 %v3896_v37, 16  ;;  %v3898_v51 = vld [vmem:[%s4301_s25 + $0x68] sm:$0x1] }
 0x254   : > { %v2288_v55 = vpop.permute.xlu1 %2287  ;;  %v2800_v62 = vrot.slane %v2799_v54, 4 }
 0x255   : > { %2375 = vst.msk [vmem:[#allocation2 + $0x24] sm:$0xf] %vm2365_vm12, %v2288_v55  ;;  %v2286_v4 = vpop.permute.xlu0 %2285  ;;  %v2302_v6 = vpop.permute.xlu2 %2301  ;;  %v2804_v63 = vrot.slane %v2802_v56, 5  ;;  %v2790_v55 = vrot.slane %v2789_v58, 4  ;;  %v2708_v5 = vrot.slane %v2706_v61, 5  ;;  %v3158_v58 = vrot.slane %v3970_v46, 5 }
 0x256   : > { %2374 = vst.msk [vmem:[#allocation2 + $0x20] sm:$0xf] %vm2365_vm12, %v2286_v4  ;;  %v2704_v4 = vrot.slane %v2703_v60, 4  ;;  %v2596_v60 = vrot.slane %v2594_v45, 5 }
 0x257   : > { %2382 = vst.msk [vmem:[#allocation2 + $0x40] sm:$0xf] %vm2365_vm12, %v2302_v6  ;;  %v3884_v6 = vld [vmem:[%s4301_s25 + $0x30] sm:$0xf]  ;;  %v2805_v9 = vsel %vm4312_vm2, %v2800_v62, %v2804_v63  ;;  %v2795_v13 = vsel %vm4312_vm2, %v2790_v55, %v2794_v42  ;;  %v2604_v42 = vshrl.u32 %v3897_v36, 16 }
 0x258   : > { %v2495_v15 = vshrl.u32 %v3884_v6, 16  ;;  %v2498_v16 = vshll.u32 %v3884_v6, 16  ;;  %v3933_v55 = vld [vmem:[%s4301_s25 + $0x34] sm:$0xf] }
 0x259   : > { %v2606_v54 = vrot.slane %v2604_v42, 4  ;;  %v3071_v6 = vrot.slane %v3933_v55, 5 }
 0x25a   : > { %3187 = vrot.lane.b32.xlu1 %v3093_v7, %s4231_s5  ;;  %v3968_v7 = vld [vmem:[%s4301_s25 + $0xc0] sm:$0xe]  ;;  %v2497_v29 = vrot.slane %v2495_v15, 4  ;;  %v2500_v31 = vrot.slane %v2498_v16, 5  ;;  %v3099_v16 = vrot.slane %v3945_v11, 5 }
 0x25b   : > { %3173 = vrot.lane.b32.xlu0 %v3068_v10, %s4231_s5  ;;  %3171 = vrot.lane.b32.xlu2 %v3065_v12, %s4231_s5  ;;  %v3127_v10 = vrot.slane %v3957_v0, 5  ;;  %v2508_v12 = vshrl.u32 %v3885_v2, 16  ;;  %v3988_v19 = vrot.slane %v3968_v7, 9  ;;  %v2610_v2 = vshll.u32 %v3898_v51, 16  ;;  %v3876_v51 = vld [vmem:[%s4301_s25 + $0xcc] sm:$0xf] }
 0x25c   : > { %v2294_v18 = vpop.permute.xlu1 %2293  ;;  %v2501_v40 = vor.u32 %v2500_v31, %v2497_v29 }
 0x25d   : > { %2378 = vst.msk [vmem:[#allocation2 + $0x30] sm:$0xf] %vm2365_vm12, %v2294_v18  ;;  %v2292_v22 = vpop.permute.xlu0 %2291  ;;  %v2320_v28 = vpop.permute.xlu2 %2319  ;;  %v2709_v18 = vsel %vm4312_vm2, %v2704_v4, %v2708_v5  ;;  %v2510_v24 = vrot.slane %v2508_v12, 4  ;;  %v3156_v35 = vsel %vm4487_vm6, %v3988_v19, %v3155_v21  ;;  %v3128_v43 = vsel %vm4487_vm6, %v3984_v34, %v3127_v10  ;;  %v3944_v19 = vld [vmem:[%s4301_s25 + $0x60] sm:$0xe] }
 0x25e   : > { %2377 = vst.msk [vmem:[#allocation2 + $0x2c] sm:$0xf] %vm2365_vm12, %v2292_v22  ;;  %v3129_v22 = vrot.slane %v3127_v10, 4  ;;  %v2612_v10 = vrot.slane %v2610_v2, 5  ;;  %v3925_v2 = vld [vmem:[%s4301_s25 + $0xd4] sm:$0x1] }
 0x25f   : > { %2391 = vst.msk [vmem:[#allocation2 + $0x64] sm:$0xf] %vm2365_vm12, %v2320_v28  ;;  %v3886_v28 = vld [vmem:[%s4301_s25 + $0x38] sm:$0x1]  ;;  %v2511_v30 = vor.u32 %v2510_v24, %v2506_v23 }
 0x261   : > { %v2512_v47 = vrot.slane %v2511_v30, 4 }
 0x262   : > { %2311 = vrot.lane.b32.xlu1 %v3867_v27, %s4229_s3  ;;  %v3130_v27 = vrot.slane %v3958_v17, 5 }
 0x263   : > { %2309 = vrot.lane.b32.xlu0 %v3866_v33, %s4229_s3  ;;  %3189 = vrot.lane.b32.xlu2 %v3096_v38, %s4231_s5  ;;  %v2514_v38 = vshll.u32 %v3886_v28, 16  ;;  %v3911_v28 = vld [vmem:[%s4301_s25 + $0x9c] sm:$0xf] }
 0x264   : > { %v2300_v44 = vpop.permute.xlu1 %2299  ;;  %v3131_v39 = vsel %vm4487_vm6, %v3129_v22, %v3130_v27  ;;  %v3101_v22 = vrot.slane %v3099_v16, 4  ;;  %v3912_v27 = vld [vmem:[%s4301_s25 + $0xa0] sm:$0xf] }
 0x265   : > { %2381 = vst.msk [vmem:[#allocation2 + $0x3c] sm:$0xf] %vm2365_vm12, %v2300_v44  ;;  %v2298_v48 = vpop.permute.xlu0 %2297  ;;  %v2879_v50 = vpop.permute.xlu2 %2878  ;;  %v2591_v44 = vshrl.u32 %v3896_v37, 16  ;;  %v2720_v37 = vshll.u32 %v3912_v27, 16 }
 0x266   : > { %2380 = vst.msk [vmem:[#allocation2 + $0x38] sm:$0xf] %vm2365_vm12, %v2298_v48  ;;  %v2516_v48 = vrot.slane %v2514_v38, 5  ;;  %v2711_v38 = vshrl.u32 %v3911_v28, 16 }
 0x268   : > { %v2517_v62 = vsel %vm4312_vm2, %v2512_v47, %v2516_v48  ;;  %v2713_v45 = vrot.slane %v2711_v38, 4  ;;  %v3924_v48 = vld [vmem:[%s4301_s25 + $0xd0] sm:$0xf] }
 0x26a   : > { %2870 = vrot.lane.b32.xlu1 %v2699_v53, %s4230_s4  ;;  %v2602_v53 = vrot.slane %v2600_v41, 5  ;;  %v2722_v41 = vrot.slane %v2720_v37, 5 }
 0x26b   : > { %2327 = vrot.lane.b32.xlu0 %v3875_v57, %s4229_s3  ;;  %2325 = vrot.lane.b32.xlu2 %v3874_v59, %s4229_s3  ;;  %v3157_v57 = vrot.slane %v3155_v21, 4  ;;  %v2593_v59 = vrot.slane %v2591_v44, 4  ;;  %v3934_v21 = vld [vmem:[%s4301_s25 + $0x38] sm:$0x1]  ;;  %v3913_v44 = vld [vmem:[%s4301_s25 + $0xa4] sm:$0x1] }
 0x26c   : > { %v2318_v52 = vpop.permute.xlu1 %2317  ;;  %v2607_v0 = vor.u32 %v2606_v54, %v2602_v53  ;;  %v3074_v34 = vrot.slane %v3934_v21, 5  ;;  %v2730_v54 = vshll.u32 %v3913_v44, 16 }
 0x26d   : > { %2390 = vst.msk [vmem:[#allocation2 + $0x60] sm:$0xf] %vm2365_vm12, %v2318_v52  ;;  %v2304_v3 = vpop.permute.xlu0 %2303  ;;  %v3202_v8 = vpop.permute.xlu2 %3201  ;;  %v3932_v52 = vld [vmem:[%s4301_s25 + $0x30] sm:$0xe]  ;;  %v2597_v4 = vor.u32 %v2596_v60, %v2593_v59  ;;  %v2820_v59 = vshrl.u32 %v3924_v48, 16 }
 0x26e   : > { %2383 = vst.msk [vmem:[#allocation2 + $0x44] sm:$0xf] %vm2365_vm12, %v2304_v3  ;;  %v3159_v3 = vsel %vm4487_vm6, %v3157_v57, %v3158_v58  ;;  %v3976_v5 = vrot.slane %v3932_v52, 9  ;;  %v2816_v58 = vshll.u32 %v3924_v48, 16  ;;  %v3868_v60 = vld [vmem:[%s4301_s25 + $0x9c] sm:$0xf] }
 0x26f   : > { %2951 = vst.msk [vmem:[#allocation2 + $0x60] sm:$0xf] %vm2926_vm14, %v2879_v50  ;;  %v2502_v50 = vrot.slane %v2501_v40, 4  ;;  %v2732_v52 = vrot.slane %v2730_v54, 5 }
 0x270   : > { %v3072_v15 = vsel %vm4487_vm6, %v3976_v5, %v3071_v6 }
 0x271   : > { %v2507_v63 = vsel %vm4312_vm2, %v2502_v50, %v2506_v23  ;;  %v3923_v50 = vld [vmem:[%s4301_s25 + $0xcc] sm:$0xf] }
 0x272   : > { %2888 = vrot.lane.b32.xlu1 %v2805_v9, %s4230_s4  ;;  %v2608_v9 = vrot.slane %v2607_v0, 4 }
 0x273   : > { %2886 = vrot.lane.b32.xlu0 %v2795_v13, %s4230_s4  ;;  %2872 = vrot.lane.b32.xlu2 %v2709_v18, %s4230_s4  ;;  %v2598_v13 = vrot.slane %v2597_v4, 4  ;;  %v3946_v18 = vld [vmem:[%s4301_s25 + $0x68] sm:$0x1]  ;;  %v2822_v4 = vrot.slane %v2820_v59, 4 }
 0x274   : > { %v2865_v26 = vpop.permute.xlu1 %2864  ;;  %v2613_v17 = vsel %vm4312_vm2, %v2608_v9, %v2612_v10  ;;  %v3102_v23 = vrot.slane %v3946_v18, 5 }
 0x275   : > { %2944 = vst.msk [vmem:[#allocation2 + $0x44] sm:$0xf] %vm2926_vm14, %v2865_v26  ;;  %v2863_v32 = vpop.permute.xlu0 %2862  ;;  %v2831_v33 = vpop.permute.xlu2 %2830  ;;  %v2603_v20 = vsel %vm4312_vm2, %v2598_v13, %v2602_v53  ;;  %v3980_v26 = vrot.slane %v3944_v19, 9  ;;  %v3960_v13 = vld [vmem:[%s4301_s25 + $0xa0] sm:$0xf] }
 0x276   : > { %2943 = vst.msk [vmem:[#allocation2 + $0x40] sm:$0xf] %vm2926_vm14, %v2863_v32  ;;  %v3073_v32 = vrot.slane %v3071_v6, 4  ;;  %v3134_v19 = vrot.slane %v3960_v13, 5 }
 0x277   : > { %3281 = vst.msk [vmem:[#allocation2 + $0x44] sm:$0xf] %vm3263_vm15, %v3202_v8  ;;  %v3100_v30 = vsel %vm4487_vm6, %v3980_v26, %v3099_v16  ;;  %v3877_v16 = vld [vmem:[%s4301_s25 + $0xd0] sm:$0xf] }
 0x278   : > { %2927 = vst.msk [vmem:[#allocation2] sm:$0xf] %vm2926_vm14, %v2831_v33  ;;  %v3103_v33 = vsel %vm4487_vm6, %v3101_v22, %v3102_v23  ;;  %v3075_v40 = vsel %vm4487_vm6, %v3073_v32, %v3074_v34  ;;  %v3972_v23 = vld [vmem:[%s4301_s25 + $0xd0] sm:$0xf] }
 0x27a   : > { %3223 = vrot.lane.b32.xlu1 %v3156_v35, %s4231_s5  ;;  %v2724_v35 = vshrl.u32 %v3912_v27, 16 }
 0x27b   : > { %3209 = vrot.lane.b32.xlu0 %v3131_v39, %s4231_s5  ;;  %3207 = vrot.lane.b32.xlu2 %v3128_v43, %s4231_s5  ;;  %v2714_v39 = vshll.u32 %v3911_v28, 16 }
 0x27c   : > { %v3200_v49 = vpop.permute.xlu1 %3199  ;;  %v2726_v42 = vrot.slane %v2724_v35, 4 }
 0x27d   : > { %3280 = vst.msk [vmem:[#allocation2 + $0x40] sm:$0xf] %vm3263_vm15, %v3200_v49  ;;  %v2881_v56 = vpop.permute.xlu0 %2880  ;;  %v2849_v61 = vpop.permute.xlu2 %2848  ;;  %v2716_v46 = vrot.slane %v2714_v39, 5 }
 0x27e   : > { %2952 = vst.msk [vmem:[#allocation2 + $0x64] sm:$0xf] %vm2926_vm14, %v2881_v56  ;;  %v2727_v53 = vor.u32 %v2726_v42, %v2722_v41  ;;  %v3869_v56 = vld [vmem:[%s4301_s25 + $0xa0] sm:$0xf] }
 0x27f   : > { %2936 = vst.msk [vmem:[#allocation2 + $0x24] sm:$0xf] %vm2926_vm14, %v2849_v61  ;;  %v2717_v57 = vor.u32 %v2716_v46, %v2713_v45  ;;  %v2807_v61 = vshrl.u32 %v3923_v50, 16 }
 0x281   : > { %v2718_v0 = vrot.slane %v2717_v57, 4 }
 0x282   : > { %2840 = vrot.lane.b32.xlu1 %v2517_v62, %s4230_s4  ;;  %v2810_v62 = vshll.u32 %v3923_v50, 16 }
 0x283   : > { %2838 = vrot.lane.b32.xlu0 %v2507_v63, %s4230_s4  ;;  %3225 = vrot.lane.b32.xlu2 %v3159_v3, %s4231_s5  ;;  %v2728_v63 = vrot.slane %v2727_v53, 4  ;;  %v2818_v3 = vrot.slane %v2816_v58, 5  ;;  %v2723_v11 = vsel %vm4312_vm2, %v2718_v0, %v2722_v41  ;;  %v3887_v41 = vld [vmem:[%s4301_s25 + $0x3c] sm:$0xf]  ;;  %v3889_v53 = vld [vmem:[%s4301_s25 + $0x44] sm:$0x1] }
 0x284   : > { %v3218_v7 = vpop.permute.xlu1 %3217  ;;  %v4091_v8 = vld [vmem:[#allocation2 + $0x40] sm:$0xff]  ;;  %v2519_v44 = vshrl.u32 %v3887_v41, 16  ;;  %v2522_v45 = vshll.u32 %v3887_v41, 16  ;;  %v3136_v58 = vrot.slane %v3134_v19, 4 }
 0x285   : > { %3289 = vst.msk [vmem:[#allocation2 + $0x64] sm:$0xf] %vm3263_vm15, %v3218_v7  ;;  %v3216_v12 = vpop.permute.xlu0 %3215  ;;  %4070 = vmatmul.msk.bf16.vlgmr.msra.gmra.mxu2 %vm3428_vm0, %v4091_v8  ;;  %v3184_v14 = vpop.permute.xlu2 %3183  ;;  %v2809_v7 = vrot.slane %v2807_v61, 4  ;;  %v2812_v8 = vrot.slane %v2810_v62, 5  ;;  %v2733_v10 = vsel %vm4312_vm2, %v2728_v63, %v2732_v52 }
 0x286   : > { %3288 = vst.msk [vmem:[#allocation2 + $0x60] sm:$0xf] %vm3263_vm15, %v3216_v12  ;;  %v3959_v12 = vld [vmem:[%s4301_s25 + $0x9c] sm:$0xe]  ;;  %v2524_v61 = vrot.slane %v2522_v45, 5 }
 0x287   : > { %v3985_v18 = vrot.slane %v3959_v12, 9  ;;  %v3936_v12 = vld [vmem:[%s4301_s25 + $0x40] sm:$0xf] }
 0x289   : > { %v3135_v34 = vsel %vm4487_vm6, %v3985_v18, %v3134_v19  ;;  %v3078_v19 = vrot.slane %v3936_v12, 5 }
 0x28a   : > { %3175 = vrot.lane.b32.xlu1 %v3072_v15, %s4231_s5  ;;  %v2826_v15 = vshll.u32 %v3925_v2, 16 }
 0x28b   : > { %2856 = vrot.lane.b32.xlu0 %v2613_v17, %s4230_s4  ;;  %2854 = vrot.lane.b32.xlu2 %v2603_v20, %s4230_s4  ;;  %v2813_v17 = vor.u32 %v2812_v8, %v2809_v7 }
 0x28c   : > { %v2847_v24 = vpop.permute.xlu1 %2846  ;;  %v2828_v22 = vrot.slane %v2826_v15, 5 }
 0x28d   : > { %2935 = vst.msk [vmem:[#allocation2 + $0x20] sm:$0xf] %vm2926_vm14, %v2847_v24  ;;  %v2833_v29 = vpop.permute.xlu0 %2832  ;;  %v4095_v31 = vld [vmem:[#allocation2 + $0x60] sm:$0xff]  ;;  %v2308_v36 = vpop.permute.xlu2 %2307  ;;  %v3899_v24 = vld [vmem:[%s4301_s25 + $0x6c] sm:$0xf]  ;;  %v2814_v28 = vrot.slane %v2813_v17, 4 }
 0x28e   : > { %2928 = vst.msk [vmem:[#allocation2 + $0x4] sm:$0xf] %vm2926_vm14, %v2833_v29  ;;  %4074 = vmatmul.msk.bf16.vlgmr.msra.gmra.mxu3 %vm3428_vm0, %v4095_v31  ;;  %v3888_v29 = vld [vmem:[%s4301_s25 + $0x40] sm:$0xf]  ;;  %v3973_v31 = vld [vmem:[%s4301_s25 + $0xd4] sm:$0x1] }
 0x28f   : > { %3272 = vst.msk [vmem:[#allocation2 + $0x20] sm:$0xf] %vm3263_vm15, %v3184_v14  ;;  %v2823_v14 = vor.u32 %v2822_v4, %v2818_v3  ;;  %v2618_v37 = vshll.u32 %v3899_v24, 16  ;;  %v2528_v38 = vshll.u32 %v3888_v29, 16  ;;  %v2532_v39 = vshrl.u32 %v3888_v29, 16 }
 0x290   : > { %2385 = vst.msk [vmem:[#allocation2 + $0x4c] sm:$0xf] %vm2365_vm12, %v2308_v36  ;;  %v3162_v36 = vrot.slane %v3972_v23, 5  ;;  %v3165_v42 = vrot.slane %v3973_v31, 5  ;;  %v3901_v17 = vld [vmem:[%s4301_s25 + $0x74] sm:$0x1] }
 0x291   : > { %v2824_v21 = vrot.slane %v2823_v14, 4  ;;  %v2530_v54 = vrot.slane %v2528_v38, 5 }
 0x292   : > { %3193 = vrot.lane.b32.xlu1 %v3103_v33, %s4231_s5  ;;  %v2615_v33 = vshrl.u32 %v3899_v24, 16  ;;  %v3164_v46 = vrot.slane %v3162_v36, 4 }
 0x293   : > { %3191 = vrot.lane.b32.xlu0 %v3100_v30, %s4231_s5  ;;  %3177 = vrot.lane.b32.xlu2 %v3075_v40, %s4231_s5  ;;  %v2829_v35 = vsel %vm4312_vm2, %v2824_v21, %v2828_v22  ;;  %v3971_v30 = vld [vmem:[%s4301_s25 + $0xcc] sm:$0xe]  ;;  %v2819_v40 = vsel %vm4312_vm2, %v2814_v28, %v2818_v3  ;;  %v2538_v3 = vshll.u32 %v3889_v53, 16  ;;  %v3937_v21 = vld [vmem:[%s4301_s25 + $0x44] sm:$0x1] }
 0x294   : > { %v3170_v43 = vpop.permute.xlu1 %3169  ;;  %v2617_v48 = vrot.slane %v2615_v33, 4  ;;  %v3166_v63 = vsel %vm4487_vm6, %v3164_v46, %v3165_v42  ;;  %v3935_v22 = vld [vmem:[%s4301_s25 + $0x3c] sm:$0xe]  ;;  %v3081_v28 = vrot.slane %v3937_v21, 5  ;;  %v3947_v42 = vld [vmem:[%s4301_s25 + $0x6c] sm:$0xe] }
 0x295   : > { %3265 = vst.msk [vmem:[#allocation2 + $0x4] sm:$0xf] %vm3263_vm15, %v3170_v43  ;;  %v3168_v47 = vpop.permute.xlu0 %3167  ;;  %v2867_v49 = vpop.permute.xlu2 %2866  ;;  %v3961_v43 = vld [vmem:[%s4301_s25 + $0xa4] sm:$0x1]  ;;  %v3977_v31 = vrot.slane %v3935_v22, 9 }
 0x296   : > { %3264 = vst.msk [vmem:[#allocation2] sm:$0xf] %vm3263_vm15, %v3168_v47  ;;  %v3989_v47 = vrot.slane %v3971_v30, 9  ;;  %v3137_v59 = vrot.slane %v3961_v43, 5 }
 0x297   : > { %v3079_v38 = vsel %vm4487_vm6, %v3977_v31, %v3078_v19 }
 0x298   : > { %v3163_v0 = vsel %vm4487_vm6, %v3989_v47, %v3162_v36 }
 0x29a   : > { %2329 = vrot.lane.b32.xlu1 %v3876_v51, %s4229_s3  ;;  %v3900_v51 = vld [vmem:[%s4301_s25 + $0x70] sm:$0xf] }
 0x29b   : > { %2315 = vrot.lane.b32.xlu0 %v3869_v56, %s4229_s3  ;;  %2313 = vrot.lane.b32.xlu2 %v3868_v60, %s4229_s3  ;;  %v2534_v56 = vrot.slane %v2532_v39, 4  ;;  %v2521_v60 = vrot.slane %v2519_v44, 4  ;;  %v2628_v4 = vshrl.u32 %v3900_v51, 16 }
 0x29c   : > { %v2306_v55 = vpop.permute.xlu1 %2305 }
 0x29d   : > { %2384 = vst.msk [vmem:[#allocation2 + $0x48] sm:$0xf] %vm2365_vm12, %v2306_v55  ;;  %v3186_v5 = vpop.permute.xlu0 %3185  ;;  %v4083_v6 = vld [vmem:[#allocation2] sm:$0xff]  ;;  %v2885_v9 = vpop.permute.xlu2 %2884  ;;  %v2624_v55 = vshll.u32 %v3900_v51, 16  ;;  %v2535_v2 = vor.u32 %v2534_v56, %v2530_v54  ;;  %v2630_v15 = vrot.slane %v2628_v4, 4 }
 0x29e   : > { %3273 = vst.msk [vmem:[#allocation2 + $0x24] sm:$0xf] %vm3263_vm15, %v3186_v5  ;;  %4062 = vmatmul.msk.bf16.vlgmr.msra.gmra.mxu0 %vm3428_vm0, %v4083_v6  ;;  %v3138_v5 = vsel %vm4487_vm6, %v3136_v58, %v3137_v59  ;;  %v2525_v6 = vor.u32 %v2524_v61, %v2521_v60 }
 0x29f   : > { %2945 = vst.msk [vmem:[#allocation2 + $0x48] sm:$0xf] %vm2926_vm14, %v2867_v49  ;;  %v2620_v49 = vrot.slane %v2618_v37, 5  ;;  %v2626_v8 = vrot.slane %v2624_v55, 5 }
 0x2a0   : > { %v2526_v14 = vrot.slane %v2525_v6, 4 }
 0x2a1   : > { %v2621_v52 = vor.u32 %v2620_v49, %v2617_v48  ;;  %v2631_v24 = vor.u32 %v2630_v15, %v2626_v8  ;;  %v3981_v48 = vrot.slane %v3947_v42, 9 }
 0x2a2   : > { %2876 = vrot.lane.b32.xlu1 %v2733_v10, %s4230_s4  ;;  %v2536_v10 = vrot.slane %v2535_v2, 4  ;;  %v2531_v23 = vsel %vm4312_vm2, %v2526_v14, %v2530_v54 }
 0x2a3   : > { %2874 = vrot.lane.b32.xlu0 %v2723_v11, %s4230_s4  ;;  %2331 = vrot.lane.b32.xlu2 %v3877_v16, %s4229_s3  ;;  %v2622_v7 = vrot.slane %v2621_v52, 4  ;;  %v2540_v11 = vrot.slane %v2538_v3, 5  ;;  %v2632_v33 = vrot.slane %v2631_v24, 4  ;;  %s3603_s3 = scalar_lea.sflag [#allocation4], %s134_s21 }
 0x2a4   : > { %v2324_v20 = vpop.permute.xlu1 %2323 }
 0x2a5   : > { %2393 = vst.msk [vmem:[#allocation2 + $0x6c] sm:$0xf] %vm2365_vm12, %v2324_v20  ;;  %v2322_v26 = vpop.permute.xlu0 %2321  ;;  %v4087_v27 = vld [vmem:[#allocation2 + $0x20] sm:$0xff]  ;;  %v3220_v32 = vpop.permute.xlu2 %3219  ;;  %v2627_v18 = vsel %vm4312_vm2, %v2622_v7, %v2626_v8  ;;  %v2541_v20 = vsel %vm4312_vm2, %v2536_v10, %v2540_v11 }
 0x2a6   : > { %2392 = vst.msk [vmem:[#allocation2 + $0x68] sm:$0xf] %vm2365_vm12, %v2322_v26  ;;  %4066 = vmatmul.msk.bf16.vlgmr.msra.gmra.mxu1 %vm3428_vm0, %v4087_v27  ;;  %v2634_v26 = vshll.u32 %v3901_v17, 16  ;;  %v3080_v27 = vrot.slane %v3078_v19, 4 }
 0x2a7   : > { %2954 = vst.msk [vmem:[#allocation2 + $0x6c] sm:$0xf] %vm2926_vm14, %v2885_v9 }
 0x2a8   : > { %v2636_v37 = vrot.slane %v2634_v26, 5  ;;  %v3082_v30 = vsel %vm4487_vm6, %v3080_v27, %v3081_v28 }
 0x2aa   : > { %3211 = vrot.lane.b32.xlu1 %v3135_v34, %s4231_s5  ;;  %v2637_v41 = vsel %vm4312_vm2, %v2632_v33, %v2636_v37 }
 0x2ab   : > { %2892 = vrot.lane.b32.xlu0 %v2829_v35, %s4230_s4  ;;  %2890 = vrot.lane.b32.xlu2 %v2819_v40, %s4230_s4  ;;  %v3949_v40 = vld [vmem:[%s4301_s25 + $0x74] sm:$0x1] }
 0x2ac   : > { %v2883_v50 = vpop.permute.xlu1 %2882  ;;  %v3109_v45 = vrot.slane %v3949_v40, 5 }
 0x2ad   : > { %2953 = vst.msk [vmem:[#allocation2 + $0x68] sm:$0xf] %vm2926_vm14, %v2883_v50  ;;  %v2869_v57 = vpop.permute.xlu0 %2868  ;;  %v2837_v62 = vpop.permute.xlu2 %2836 }
 0x2ae   : > { %2946 = vst.msk [vmem:[#allocation2 + $0x4c] sm:$0xf] %vm2926_vm14, %v2869_v57 }
 0x2af   : > { %3290 = vst.msk [vmem:[#allocation2 + $0x68] sm:$0xf] %vm3263_vm15, %v3220_v32  ;;  %v3948_v32 = vld [vmem:[%s4301_s25 + $0x70] sm:$0xf] }
 0x2b0   : > { %2930 = vst.msk [vmem:[#allocation2 + $0xc] sm:$0xf] %vm2926_vm14, %v2837_v62  ;;  %v3106_v39 = vrot.slane %v3948_v32, 5 }
 0x2b2   : > { %3229 = vrot.lane.b32.xlu1 %v3166_v63, %s4231_s5  ;;  %v3108_v44 = vrot.slane %v3106_v39, 4  ;;  %v3107_v50 = vsel %vm4487_vm6, %v3981_v48, %v3106_v39 }
 0x2b3   : > { %3227 = vrot.lane.b32.xlu0 %v3163_v0, %s4231_s5  ;;  %3213 = vrot.lane.b32.xlu2 %v3138_v5, %s4231_s5 }
 0x2b4   : > { %v3206_v9 = vpop.permute.xlu1 %3205  ;;  %v3110_v25 = vsel %vm4487_vm6, %v3108_v44, %v3109_v45 }
 0x2b5   : > { %3283 = vst.msk [vmem:[#allocation2 + $0x4c] sm:$0xf] %vm3263_vm15, %v3206_v9  ;;  %v3204_v13 = vpop.permute.xlu0 %3203  ;;  %v3172_v16 = vpop.permute.xlu2 %3171 }
 0x2b6   : > { %3282 = vst.msk [vmem:[#allocation2 + $0x48] sm:$0xf] %vm3263_vm15, %v3204_v13 }
 0x2ba   : > { %2858 = vrot.lane.b32.xlu1 %v2627_v18, %s4230_s4 }
 0x2bb   : > { %2844 = vrot.lane.b32.xlu0 %v2541_v20, %s4230_s4  ;;  %2842 = vrot.lane.b32.xlu2 %v2531_v23, %s4230_s4 }
 0x2bc   : > { %v2835_v29 = vpop.permute.xlu1 %2834 }
 0x2bd   : > { %2929 = vst.msk [vmem:[#allocation2 + $0x8] sm:$0xf] %vm2926_vm14, %v2835_v29  ;;  %v3222_v34 = vpop.permute.xlu0 %3221  ;;  %v4092_v36 = vld [vmem:[#allocation2 + $0x48] sm:$0xff]  ;;  %v3190_v35 = vpop.permute.xlu2 %3189 }
 0x2be   : > { %3291 = vst.msk [vmem:[#allocation2 + $0x6c] sm:$0xf] %vm3263_vm15, %v3222_v34  ;;  %4071 = vmatmul.msk.bf16.gmra.mxu2 %vm3428_vm0, %v4092_v36 }
 0x2bf   : > { %3266 = vst.msk [vmem:[#allocation2 + $0x8] sm:$0xf] %vm3263_vm15, %v3172_v16 }
 0x2c2   : > { %3181 = vrot.lane.b32.xlu1 %v3082_v30, %s4231_s5 }
 0x2c3   : > { %3179 = vrot.lane.b32.xlu0 %v3079_v38, %s4231_s5  ;;  %2860 = vrot.lane.b32.xlu2 %v2637_v41, %s4230_s4  ;;  %s4174_s4 = sshra.s32 %s3618_s30, 4  ;;  %s4175_s4 = int_to_ptr.hbm [resolvable:$true] %s4174_s4 }
 0x2c4   : > { %v2853_v43 = vpop.permute.xlu1 %2852  ;;  %s4176_s13 = scalar_lea.hbm %s4175_s4, 256  ;;  %p4181_p0 = scmp.lt.s32.totalorder %s4175_s4, %s5788_s2 }
 0x2c5   : > { %2938 = vst.msk [vmem:[#allocation2 + $0x2c] sm:$0xf] %vm2926_vm14, %v2853_v43  ;;  %v2851_v46 = vpop.permute.xlu0 %2850  ;;  %v4096_v47 = vld [vmem:[#allocation2 + $0x68] sm:$0xff]  ;;  %v2326_v49 = vpop.permute.xlu2 %2325  ;;  %p4177_p11 = scmp.ne.s32.totalorder %s4175_s4, %s4176_s13  ;;  %p4182_p1 = scmp.lt.s32.totalorder %s4180_s7, %s4176_s13 }
 0x2c6   : > { %2937 = vst.msk [vmem:[#allocation2 + $0x28] sm:$0xf] %vm2926_vm14, %v2851_v46  ;;  %4075 = vmatmul.msk.bf16.gmra.mxu3 %vm3428_vm0, %v4096_v47 }
 0x2c7   : > { %3275 = vst.msk [vmem:[#allocation2 + $0x2c] sm:$0xf] %vm3263_vm15, %v3190_v35  ;;  %p4178_p12 = pnand %p4177_p11, %p4286_p5  ;;  %p4183_p2 = por %p4182_p1, %p4181_p0 }
 0x2c8   : > { %2394 = vst.msk [vmem:[#allocation2 + $0x70] sm:$0xf] %vm2365_vm12, %v2326_v49 }
 0x2c9   : > { %p4179_p13 = pneg %p4178_p12 }
 0x2cb   : > { %3197 = vrot.lane.b32.xlu0 %v3110_v25, %s4231_s5  ;;  %3195 = vrot.lane.b32.xlu2 %v3107_v50, %s4231_s5  ;;  %p4184_p3 = pnand %p4183_p2, %p4179_p13 }
 0x2cc   : > { %v3188_v51 = vpop.permute.xlu1 %3187 }
 0x2cd   : > { %3274 = vst.msk [vmem:[#allocation2 + $0x28] sm:$0xf] %vm3263_vm15, %v3188_v51  ;;  %v3174_v53 = vpop.permute.xlu0 %3173  ;;  %v2873_v54 = vpop.permute.xlu2 %2872 }
 0x2ce   : > { %3267 = vst.msk [vmem:[#allocation2 + $0xc] sm:$0xf] %vm3263_vm15, %v3174_v53 }
 0x2d4   : > { %v2312_v56 = vpop.permute.xlu1 %2311  ;;  %v4088_v57 = vld [vmem:[#allocation2 + $0x28] sm:$0xff] }
 0x2d5   : > { %2387 = vst.msk [vmem:[#allocation2 + $0x54] sm:$0xf] %vm2365_vm12, %v2312_v56  ;;  %v2310_v58 = vpop.permute.xlu0 %2309  ;;  %v4084_v59 = vld [vmem:[#allocation2 + $0x8] sm:$0xff]  ;;  %4067 = vmatmul.msk.bf16.gmra.mxu1 %vm3428_vm0, %v4088_v57  ;;  %v3208_v1 = vpop.permute.xlu2 %3207 }
 0x2d6   : > { %2386 = vst.msk [vmem:[#allocation2 + $0x50] sm:$0xf] %vm2365_vm12, %v2310_v58  ;;  %4063 = vmatmul.msk.bf16.gmra.mxu0 %vm3428_vm0, %v4084_v59 }
 0x2d7   : > { %2948 = vst.msk [vmem:[#allocation2 + $0x54] sm:$0xf] %vm2926_vm14, %v2873_v54 }
 0x2dc   : > { %v2871_v60 = vpop.permute.xlu1 %2870 }
 0x2dd   : > { %2947 = vst.msk [vmem:[#allocation2 + $0x50] sm:$0xf] %vm2926_vm14, %v2871_v60  ;;  %v2328_v61 = vpop.permute.xlu0 %2327  ;;  %v3226_v62 = vpop.permute.xlu2 %3225 }
 0x2de   : > { %2395 = vst.msk [vmem:[#allocation2 + $0x74] sm:$0xf] %vm2365_vm12, %v2328_v61 }
 0x2df   : > { %3284 = vst.msk [vmem:[#allocation2 + $0x50] sm:$0xf] %vm3263_vm15, %v3208_v1 }
 0x2e4   : > { %v2889_v63 = vpop.permute.xlu1 %2888 }
 0x2e5   : > { %2956 = vst.msk [vmem:[#allocation2 + $0x74] sm:$0xf] %vm2926_vm14, %v2889_v63  ;;  %v2887_v52 = vpop.permute.xlu0 %2886  ;;  %v2855_v55 = vpop.permute.xlu2 %2854 }
 0x2e6   : > { %2955 = vst.msk [vmem:[#allocation2 + $0x70] sm:$0xf] %vm2926_vm14, %v2887_v52 }
 0x2e7   : > { %3293 = vst.msk [vmem:[#allocation2 + $0x74] sm:$0xf] %vm3263_vm15, %v3226_v62 }
 0x2e8   : > { %2939 = vst.msk [vmem:[#allocation2 + $0x30] sm:$0xf] %vm2926_vm14, %v2855_v55 }
 0x2ec   : > { %v3224_v0 = vpop.permute.xlu1 %3223 }
 0x2ed   : > { %3292 = vst.msk [vmem:[#allocation2 + $0x70] sm:$0xf] %vm3263_vm15, %v3224_v0  ;;  %v3210_v2 = vpop.permute.xlu0 %3209  ;;  %v3178_v3 = vpop.permute.xlu2 %3177 }
 0x2ee   : > { %3285 = vst.msk [vmem:[#allocation2 + $0x54] sm:$0xf] %vm3263_vm15, %v3210_v2 }
 0x2f4   : > { %v2841_v4 = vpop.permute.xlu1 %2840  ;;  %v4097_v5 = vld [vmem:[#allocation2 + $0x70] sm:$0xff] }
 0x2f5   : > { %2932 = vst.msk [vmem:[#allocation2 + $0x14] sm:$0xf] %vm2926_vm14, %v2841_v4  ;;  %v2839_v6 = vpop.permute.xlu0 %2838  ;;  %v4093_v7 = vld [vmem:[#allocation2 + $0x50] sm:$0xff]  ;;  %4076 = vmatmul.msk.bf16.gmra.mxu3 %vm3428_vm0, %v4097_v5  ;;  %v2314_v8 = vpop.permute.xlu2 %2313 }
 0x2f6   : > { %2931 = vst.msk [vmem:[#allocation2 + $0x10] sm:$0xf] %vm2926_vm14, %v2839_v6  ;;  %4072 = vmatmul.msk.bf16.gmra.mxu2 %vm3428_vm0, %v4093_v7 }
 0x2f7   : > { %3269 = vst.msk [vmem:[#allocation2 + $0x14] sm:$0xf] %vm3263_vm15, %v3178_v3 }
 0x2f8   : > { %2388 = vst.msk [vmem:[#allocation2 + $0x58] sm:$0xf] %vm2365_vm12, %v2314_v8 }
 0x2fc   : > { %v3176_v9 = vpop.permute.xlu1 %3175 }
 0x2fd   : > { %3268 = vst.msk [vmem:[#allocation2 + $0x10] sm:$0xf] %vm3263_vm15, %v3176_v9  ;;  %v2857_v10 = vpop.permute.xlu0 %2856  ;;  %v2332_v11 = vpop.permute.xlu2 %2331 }
 0x2fe   : > { %2940 = vst.msk [vmem:[#allocation2 + $0x34] sm:$0xf] %vm2926_vm14, %v2857_v10 }
 0x2ff   : > { %2397 = vst.msk [vmem:[#allocation2 + $0x7c] sm:$0xf] %vm2365_vm12, %v2332_v11 }
 0x304   : > { %v3194_v12 = vpop.permute.xlu1 %3193  ;;  %v4085_v13 = vld [vmem:[#allocation2 + $0x10] sm:$0xff] }
 0x305   : > { %3277 = vst.msk [vmem:[#allocation2 + $0x34] sm:$0xf] %vm3263_vm15, %v3194_v12  ;;  %v3192_v14 = vpop.permute.xlu0 %3191  ;;  %4064 = vmatmul.msk.bf16.gmra.mxu0 %vm3428_vm0, %v4085_v13  ;;  %v2891_v15 = vpop.permute.xlu2 %2890 }
 0x306   : > { %3276 = vst.msk [vmem:[#allocation2 + $0x30] sm:$0xf] %vm3263_vm15, %v3192_v14 }
 0x308   : > { %v3530_v16 = vpop.f32.mrf.mxu2 }
 0x309   : > { %3586 = vst [vmem:[%s5694_s23 + $0x80] sm:$0xff] %v3530_v16 }
 0x30c   : > { %v2330_v17 = vpop.permute.xlu1 %2329 }
 0x30d   : > { %2396 = vst.msk [vmem:[#allocation2 + $0x78] sm:$0xf] %vm2365_vm12, %v2330_v17  ;;  %v2316_v18 = vpop.permute.xlu0 %2315  ;;  %v4089_v19 = vld [vmem:[#allocation2 + $0x30] sm:$0xff]  ;;  %v3214_v20 = vpop.permute.xlu2 %3213 }
 0x30e   : > { %2389 = vst.msk [vmem:[#allocation2 + $0x5c] sm:$0xf] %vm2365_vm12, %v2316_v18  ;;  %4068 = vmatmul.msk.bf16.gmra.mxu1 %vm3428_vm0, %v4089_v19 }
 0x30f   : > { %2957 = vst.msk [vmem:[#allocation2 + $0x78] sm:$0xf] %vm2926_vm14, %v2891_v15 }
 0x310   : > { %v3532_v21 = vpop.f32.mrf.mxu2 }
 0x311   : > { %3587 = vst [vmem:[%s5694_s23 + $0x88] sm:$0xff] %v3532_v21  ;;  %v3550_v22 = vpop.f32.mrf.mxu3 }
 0x312   : > { %3594 = vst [vmem:[%s5694_s23 + $0xc0] sm:$0xff] %v3550_v22 }
 0x314   : > { %v2877_v23 = vpop.permute.xlu1 %2876 }
 0x315   : > { %2950 = vst.msk [vmem:[#allocation2 + $0x5c] sm:$0xf] %vm2926_vm14, %v2877_v23  ;;  %v2875_v24 = vpop.permute.xlu0 %2874  ;;  %v2843_v26 = vpop.permute.xlu2 %2842 }
 0x316   : > { %2949 = vst.msk [vmem:[#allocation2 + $0x58] sm:$0xf] %vm2926_vm14, %v2875_v24 }
 0x317   : > { %3287 = vst.msk [vmem:[#allocation2 + $0x5c] sm:$0xf] %vm3263_vm15, %v3214_v20 }
 0x318   : > { %2933 = vst.msk [vmem:[#allocation2 + $0x18] sm:$0xf] %vm2926_vm14, %v2843_v26 }
 0x319   : > { %v3552_v27 = vpop.f32.mrf.mxu3 }
 0x31a   : > { %3595 = vst [vmem:[%s5694_s23 + $0xc8] sm:$0xff] %v3552_v27 }
 0x31b   : > { %v3490_v29 = vpop.f32.mrf.mxu0 }
 0x31c   : > { %v3212_v28 = vpop.permute.xlu1 %3211  ;;  %3570 = vst [vmem:[%s5694_s23] sm:$0xff] %v3490_v29 }
 0x31d   : > { %3286 = vst.msk [vmem:[#allocation2 + $0x58] sm:$0xf] %vm3263_vm15, %v3212_v28  ;;  %v2893_v31 = vpop.permute.xlu0 %2892  ;;  %v2861_v32 = vpop.permute.xlu2 %2860 }
 0x31e   : > { %2958 = vst.msk [vmem:[#allocation2 + $0x7c] sm:$0xf] %vm2926_vm14, %v2893_v31 }
 0x31f   : > { %2942 = vst.msk [vmem:[#allocation2 + $0x3c] sm:$0xf] %vm2926_vm14, %v2861_v32 }
 0x323   : > { %v3492_v36 = vpop.f32.mrf.mxu0  ;;  %v3510_v35 = vpop.f32.mrf.mxu1 }
 0x324   : > { %v3230_v34 = vpop.permute.xlu1 %3229  ;;  %v4094_v33 = vld [vmem:[#allocation2 + $0x58] sm:$0xff]  ;;  %3571 = vst [vmem:[%s5694_s23 + $0x8] sm:$0xff] %v3492_v36 }
 0x325   : > { %3295 = vst.msk [vmem:[#allocation2 + $0x7c] sm:$0xf] %vm3263_vm15, %v3230_v34  ;;  %v3228_v37 = vpop.permute.xlu0 %3227  ;;  %4073 = vmatmul.msk.bf16.gmra.mxu2 %vm3428_vm0, %v4094_v33  ;;  %v3196_v38 = vpop.permute.xlu2 %3195 }
 0x326   : > { %3294 = vst.msk [vmem:[#allocation2 + $0x78] sm:$0xf] %vm3263_vm15, %v3228_v37 }
 0x327   : > { %3578 = vst [vmem:[%s5694_s23 + $0x40] sm:$0xff] %v3510_v35 }
 0x32b   : > { %v3512_v40 = vpop.f32.mrf.mxu1 }
 0x32c   : > { %v2859_v30 = vpop.permute.xlu1 %2858  ;;  %3579 = vst [vmem:[%s5694_s23 + $0x48] sm:$0xff] %v3512_v40 }
 0x32d   : > { %2941 = vst.msk [vmem:[#allocation2 + $0x38] sm:$0xf] %vm2926_vm14, %v2859_v30  ;;  %v2845_v39 = vpop.permute.xlu0 %2844  ;;  %v4098_v41 = vld [vmem:[#allocation2 + $0x78] sm:$0xff] }
 0x32e   : > { %2934 = vst.msk [vmem:[#allocation2 + $0x1c] sm:$0xf] %vm2926_vm14, %v2845_v39  ;;  %4077 = vmatmul.msk.bf16.gmra.mxu3 %vm3428_vm0, %v4098_v41 }
 0x32f   : > { %3278 = vst.msk [vmem:[#allocation2 + $0x38] sm:$0xf] %vm3263_vm15, %v3196_v38 }
 0x334   : > { %v3182_v42 = vpop.permute.xlu1 %3181 }
 0x335   : > { %3271 = vst.msk [vmem:[#allocation2 + $0x1c] sm:$0xf] %vm3263_vm15, %v3182_v42  ;;  %v3180_v43 = vpop.permute.xlu0 %3179 }
 0x336   : > { %3270 = vst.msk [vmem:[#allocation2 + $0x18] sm:$0xf] %vm3263_vm15, %v3180_v43 }
 0x33d   : > { %v3198_v44 = vpop.permute.xlu0 %3197  ;;  %v4086_v45 = vld [vmem:[#allocation2 + $0x18] sm:$0xff] }
 0x33e   : > { %3279 = vst.msk [vmem:[#allocation2 + $0x3c] sm:$0xf] %vm3263_vm15, %v3198_v44  ;;  %4065 = vmatmul.msk.bf16.gmra.mxu0 %vm3428_vm0, %v4086_v45 }
 0x341   : > { %v3535_v46 = vpop.f32.mrf.mxu2 }
 0x342   : > { %3588 = vst [vmem:[%s5694_s23 + $0x90] sm:$0xff] %v3535_v46 }
 0x345   : > { %v4090_v47 = vld [vmem:[#allocation2 + $0x38] sm:$0xff] }
 0x346   : > { %4069 = vmatmul.msk.bf16.gmra.mxu1 %vm3428_vm0, %v4090_v47 }
 0x349   : > { %v3537_v48 = vpop.f32.mrf.mxu2  ;;  %v3555_v49 = vpop.f32.mrf.mxu3 }
 0x34a   : > { %3589 = vst [vmem:[%s5694_s23 + $0x98] sm:$0xff] %v3537_v48 }
 0x34b   : > { %3596 = vst [vmem:[%s5694_s23 + $0xd0] sm:$0xff] %v3555_v49 }
 0x351   : > { %v3557_v25 = vpop.f32.mrf.mxu3 }
 0x352   : > { %3597 = vst [vmem:[%s5694_s23 + $0xd8] sm:$0xff] %v3557_v25  ;;  %v3515_v50 = vpop.f32.mrf.mxu1 }
 0x353   : > { %v3495_v51 = vpop.f32.mrf.mxu0  ;;  %3580 = vst [vmem:[%s5694_s23 + $0x50] sm:$0xff] %v3515_v50 }
 0x354   : > { %3572 = vst [vmem:[%s5694_s23 + $0x10] sm:$0xff] %v3495_v51 }
 0x35a   : > { %v3517_v53 = vpop.f32.mrf.mxu1 }
 0x35b   : > { %v3497_v54 = vpop.f32.mrf.mxu0  ;;  %3581 = vst [vmem:[%s5694_s23 + $0x58] sm:$0xff] %v3517_v53 }
 0x35c   : > { %3573 = vst [vmem:[%s5694_s23 + $0x18] sm:$0xff] %v3497_v54 }
 0x378   : > { %v3560_v56 = vpop.f32.mrf.mxu3 }
 0x379   : > { %v3540_v57 = vpop.f32.mrf.mxu2  ;;  %3598 = vst [vmem:[%s5694_s23 + $0xe0] sm:$0xff] %v3560_v56 }
 0x37a   : > { %3590 = vst [vmem:[%s5694_s23 + $0xa0] sm:$0xff] %v3540_v57 }
 0x380   : > { %v3562_v58 = vpop.f32.mrf.mxu3 }
 0x381   : > { %v3542_v59 = vpop.f32.mrf.mxu2  ;;  %3599 = vst [vmem:[%s5694_s23 + $0xe8] sm:$0xff] %v3562_v58 }
 0x382   : > { %3591 = vst [vmem:[%s5694_s23 + $0xa8] sm:$0xff] %v3542_v59  ;;  %v3500_v1 = vpop.f32.mrf.mxu0 }
 0x383   : > { %3574 = vst [vmem:[%s5694_s23 + $0x20] sm:$0xff] %v3500_v1 }
 0x38a   : > { %v3502_v60 = vpop.f32.mrf.mxu0 }
 0x38b   : > { %3575 = vst [vmem:[%s5694_s23 + $0x28] sm:$0xff] %v3502_v60  ;;  %v3520_v61 = vpop.f32.mrf.mxu1 }
 0x38c   : > { %3582 = vst [vmem:[%s5694_s23 + $0x60] sm:$0xff] %v3520_v61 }
 0x393   : > { %v3522_v62 = vpop.f32.mrf.mxu1 }
 0x394   : > { %3583 = vst [vmem:[%s5694_s23 + $0x68] sm:$0xff] %v3522_v62 }
 0x3a8   : > { %v3545_v63 = vpop.f32.mrf.mxu2 }
 0x3a9   : > { %3592 = vst [vmem:[%s5694_s23 + $0xb0] sm:$0xff] %v3545_v63 }
 0x3b0   : > { %v3547_v52 = vpop.f32.mrf.mxu2 }
 0x3b1   : > { %3593 = vst [vmem:[%s5694_s23 + $0xb8] sm:$0xff] %v3547_v52  ;;  %v3565_v55 = vpop.f32.mrf.mxu3 }
 0x3b2   : > { %3600 = vst [vmem:[%s5694_s23 + $0xf0] sm:$0xff] %v3565_v55 }
 0x3b9   : > { %v3567_v0 = vpop.f32.mrf.mxu3 }
 0x3ba   : > { %3601 = vst [vmem:[%s5694_s23 + $0xf8] sm:$0xff] %v3567_v0 }
 0x3bb   : > { %v3505_v2 = vpop.f32.mrf.mxu0 }
 0x3bc   : > { %3576 = vst [vmem:[%s5694_s23 + $0x30] sm:$0xff] %v3505_v2 }
 0x3c3   : > { %v3507_v3 = vpop.f32.mrf.mxu0  ;;  %v3525_v4 = vpop.f32.mrf.mxu1 }
 0x3c4   : > { %3577 = vst [vmem:[%s5694_s23 + $0x38] sm:$0xff] %v3507_v3 }
 0x3c5   : > { %3584 = vst [vmem:[%s5694_s23 + $0x70] sm:$0xff] %v3525_v4 }
 0x3cb   : > { %v3527_v5 = vpop.f32.mrf.mxu1 }
 0x3cc   : > { %3585 = vst [vmem:[%s5694_s23 + $0x78] sm:$0xff] %v3527_v5 }
 0x3cd   : > { %4187 = shalt.err (!%p4184_p3)
}
 0x3ce   : > { %s4232_s16 = smov 128  }
 0x3cf   : > { %4112 = dma.vmem_to_hbm [thread:$0]  (%p4286_p5), %s3616_s29, 4096, %s3618_s30, %s3603_s3, %s4232_s16, %s4232_s16, %s4225_s27  }
 0x3d0 PF: > { %p4118_p4 = scmp.ge.s32.totalorder %s4222_s12, 2  ;;  %s3632_s17 = sand.u32 1, %s4210_s9  }
 0x3d1   : > { %s3633_s21 = scalar_lea.sflag [#allocation4], %s3632_s17 }
 0x3d2   : > { %p4115_p7 = pnand %p4118_p4, %p4290_p6 }
 0x3d4   : > { %p4116_p8 = pneg %p4115_p7 }
 0x3d6   : > { %4205 = dma.done.wait (%p4116_p8), %s3633_s21, 4096  }
 0x3d7   : > { %4207 = vsyncadd (%p4116_p8), %s3633_s21, 4294963200  ;;  %p12_p9 = scmp.ge.s32.totalorder %s4273_s15, 4   ;;  %s5795_s9 = smov %s4214_s10 }
 0x3d8   : > { %s5796_s10 = smov %s4218_s11  ;;  %s5797_s11 = smov %s4284_s18 }
 0x3d9   : > { %s5798_s12 = smov %s4273_s15  ;;  %14 = sbr.rel (!%p12_p9) target bundleno = 3 (0x3), region = 65 }
 0x3de   :  { %3639 = vsyncpa [#allocation4], 1 }
 0x3df   :  { %3641 = vsyncpa [#allocation4 + $0x1], 1 }

</bundles_post_ra>
